<compile_context>
chip_gen: v7x
topology: tpu7x:2x2x1
jax: 0.10.0
libtpu: 0.0.40
codegen_flags: <defaults>
</compile_context>

<pallas_src>
import functools

import jax
import jax.numpy as jnp
from jax.experimental import pallas as pl
from jax.experimental.pallas import tpu as pltpu

BN_EPS = 1e-5
_LANE = 128


def _round_up(x, m):
    return (x + m - 1) // m * m


def _bn_fold(gamma, beta, mean, var, eps=BN_EPS):
    scale = (gamma / jnp.sqrt(var + eps)).astype(jnp.float32)
    bias = (beta - mean * scale).astype(jnp.float32)
    return scale, bias                      # (C,), (C,)


# --------------------------------- kernel ---------------------------------
def _basic_block_kernel(x_ref, w1_ref, b1_ref, w2_ref, b2_ref, o_ref,
                        xs_ref, acc_ref):
    # x_ref : (1, H, W, Cp) f32  -- conv1 input AND residual (kept f32)
    # w*_ref: (3, 3, Cp, Cp) mxu_dtype (BN scale pre-folded, channel-padded)
    # b*_ref: (1, Cp) f32
    # o_ref : (1, H, W, Cp) f32
    # xs_ref: (3, H+2, W, Cp) mxu_dtype scratch -- 3 column-shifted slabs
    # acc_ref: (H*W, Cp) f32 scratch -- conv accumulator
    _, H, W, Cp = o_ref.shape
    mdt = xs_ref.dtype

    # Only the halo rows (0 and H+1) rely on this; interiors are always
    # overwritten by fill_slabs below.
    xs_ref[...] = jnp.zeros_like(xs_ref)

    def fill_slabs(src_f32):
        # xs_ref[kw][h, j, :] == padded(src)[h, j + kw, :], padded = 1-px halo.
        # Column shifts are done on the value (one concat per shifted slab);
        # the stores themselves are row-aligned (no sublane-offset stores).
        zcol = jnp.zeros((H, 1, Cp), jnp.float32)
        xs_ref[1, 1:H + 1, :, :] = src_f32.astype(mdt)
        xs_ref[0, 1:H + 1, :, :] = jnp.concatenate(
            [zcol, src_f32[:, :W - 1, :]], axis=1).astype(mdt)
        xs_ref[2, 1:H + 1, :, :] = jnp.concatenate(
            [src_f32[:, 1:, :], zcol], axis=1).astype(mdt)

    def conv3x3(w_ref):
        # 9 lane-dense (H*W, Cp) @ (Cp, Cp) MXU matmuls, f32 accumulation in
        # the VMEM scratch.  LHS slices are along the major (row) axis only.
        first = True
        for kh in range(3):
            for kw in range(3):
                lhs = xs_ref[kw, kh:kh + H].reshape(H * W, Cp)
                contrib = jnp.dot(lhs, w_ref[kh, kw],
                                  preferred_element_type=jnp.float32)
                if first:
                    acc_ref[...] = contrib
                    first = False
                else:
                    acc_ref[...] += contrib

    # conv1 + bn1 + relu (scale folded into w1, so epilogue is +bias, relu)
    fill_slabs(x_ref[0])
    conv3x3(w1_ref)
    y1 = jnp.maximum(acc_ref[...] + b1_ref[...], 0.0)          # f32, (H*W, Cp)

    # conv2 + bn2 + identity + relu (residual add in f32)
    fill_slabs(y1.reshape(H, W, Cp))
    conv3x3(w2_ref)
    y2 = acc_ref[...] + b2_ref[...]
    y2 = y2.reshape(H, W, Cp) + x_ref[0]
    o_ref[0] = jnp.maximum(y2, 0.0).astype(o_ref.dtype)


# --------------------------------- wrapper --------------------------------
def _fold_and_pad_params(params, C, Cp, mxu_dtype):
    s1, b1 = _bn_fold(params["gamma1"], params["beta1"], params["mean1"], params["var1"])
    s2, b2 = _bn_fold(params["gamma2"], params["beta2"], params["mean2"], params["var2"])
    pc = Cp - C
    w1 = params["w1"].astype(jnp.float32) * s1[None, None, None, :]
    w2 = params["w2"].astype(jnp.float32) * s2[None, None, None, :]
    w1 = jnp.pad(w1, ((0, 0), (0, 0), (0, pc), (0, pc))).astype(mxu_dtype)
    w2 = jnp.pad(w2, ((0, 0), (0, 0), (0, pc), (0, pc))).astype(mxu_dtype)
    b1 = jnp.pad(b1, ((0, pc),)).reshape(1, Cp)
    b2 = jnp.pad(b2, ((0, pc),)).reshape(1, Cp)
    return w1, b1, w2, b2


@functools.partial(jax.jit, static_argnames=("mxu_dtype",))
def basic_block_forward(x_nchw, params, mxu_dtype=jnp.bfloat16):
    """ResNet BasicBlock forward (stride=1, downsample=None). NCHW in/out, f32."""
    N, C, H, W = x_nchw.shape
    Cout = params["w1"].shape[-1]
    assert C == Cout, "only the stride=1 / no-downsample configuration is implemented"
    Cp = _round_up(max(C, _LANE), _LANE)                     # lane-dense channels

    x = jnp.transpose(x_nchw, (0, 2, 3, 1)).astype(jnp.float32)   # NCHW -> NHWC
    x = jnp.pad(x, ((0, 0), (0, 0), (0, 0), (0, Cp - C)))         # channel pad only
    w1, b1, w2, b2 = _fold_and_pad_params(params, C, Cp, mxu_dtype)

    out = pl.pallas_call(
        _basic_block_kernel,
        out_shape=jax.ShapeDtypeStruct((N, H, W, Cp), jnp.float32),
        grid=(N,),
        in_specs=[
            pl.BlockSpec((1, H, W, Cp), lambda n: (n, 0, 0, 0)),    # x (f32, residual)
            pl.BlockSpec((3, 3, Cp, Cp), lambda n: (0, 0, 0, 0)),   # w1 (bn1 folded)
            pl.BlockSpec((1, Cp), lambda n: (0, 0)),                # b1
            pl.BlockSpec((3, 3, Cp, Cp), lambda n: (0, 0, 0, 0)),   # w2 (bn2 folded)
            pl.BlockSpec((1, Cp), lambda n: (0, 0)),                # b2
        ],
        out_specs=pl.BlockSpec((1, H, W, Cp), lambda n: (n, 0, 0, 0)),
        scratch_shapes=[
            pltpu.VMEM((3, H + 2, W, Cp), mxu_dtype),   # 3 column-shifted slabs
            pltpu.VMEM((H * W, Cp), jnp.float32),       # conv accumulator
        ],
        compiler_params=pltpu.CompilerParams(
            dimension_semantics=("parallel",),          # N>=2 -> both v7x TCs busy
            vmem_limit_bytes=32 * 1024 * 1024,
        ),
    )(x, w1, b1, w2, b2)

    out = out[..., :Cout]
    return jnp.transpose(out, (0, 3, 1, 2))                          # NHWC -> NCHW


# --------------------------- reference (pure JAX) --------------------------
def _ref_forward(x_nchw, params, conv_dtype=jnp.float32):
    """Pure-JAX reference with identical BN folding; conv operands are cast to
    `conv_dtype` (f32 accumulation) so it can match the kernel's MXU precision."""
    def conv(x, w):
        return jax.lax.conv_general_dilated(
            x.astype(conv_dtype), w.astype(conv_dtype),
            window_strides=(1, 1), padding="SAME",
            dimension_numbers=("NHWC", "HWIO", "NHWC"),
            preferred_element_type=jnp.float32)

    x = jnp.transpose(x_nchw, (0, 2, 3, 1)).astype(jnp.float32)
    s1, b1 = _bn_fold(params["gamma1"], params["beta1"], params["mean1"], params["var1"])
    s2, b2 = _bn_fold(params["gamma2"], params["beta2"], params["mean2"], params["var2"])
    w1 = params["w1"] * s1[None, None, None, :]
    w2 = params["w2"] * s2[None, None, None, :]
    out = jnp.maximum(conv(x, w1) + b1, 0.0)
    out = conv(out, w2) + b2
    out = jnp.maximum(out + x, 0.0)
    return jnp.transpose(out, (0, 3, 1, 2))


if __name__ == "__main__":
    N, C, H, W = 2, 4, 16, 16        # in_channels == out_channels, stride=1
    key = jax.random.PRNGKey(0)
    ks = jax.random.split(key, 11)

    params = {
        # conv weights stored HWIO (3,3,Cin,Cout); PyTorch OIHW would be transposed.
        "w1": 0.1 * jax.random.normal(ks[0], (3, 3, C, C), jnp.float32),
        "w2": 0.1 * jax.random.normal(ks[1], (3, 3, C, C), jnp.float32),
        "gamma1": jax.random.uniform(ks[2], (C,), jnp.float32, 0.5, 1.5),
        "beta1": 0.1 * jax.random.normal(ks[3], (C,), jnp.float32),
        "mean1": 0.1 * jax.random.normal(ks[4], (C,), jnp.float32),
        "var1": jax.random.uniform(ks[5], (C,), jnp.float32, 0.5, 1.5),
        "gamma2": jax.random.uniform(ks[6], (C,), jnp.float32, 0.5, 1.5),
        "beta2": 0.1 * jax.random.normal(ks[7], (C,), jnp.float32),
        "mean2": 0.1 * jax.random.normal(ks[8], (C,), jnp.float32),
        "var2": jax.random.uniform(ks[9], (C,), jnp.float32, 0.5, 1.5),
    }
    x = jax.random.normal(ks[10], (N, C, H, W), jnp.float32)

    # Optimized path: bf16 MXU operands, f32 accumulation / epilogue (v6e/v7x).
    out_bf16 = jax.block_until_ready(basic_block_forward(x, params))
    # Exact-f32 operand path (e.g. v5e or strict-f32 requirements).
    out_f32 = jax.block_until_ready(basic_block_forward(x, params, mxu_dtype=jnp.float32))

    ref_f32 = jax.block_until_ready(_ref_forward(x, params, conv_dtype=jnp.float32))
    ref_bf16 = jax.block_until_ready(_ref_forward(x, params, conv_dtype=jnp.bfloat16))

    assert out_bf16.shape == (N, C, H, W) and out_f32.shape == (N, C, H, W)
    # Kernel vs. reference with matching conv-operand precision (tight check).
    err_b = float(jnp.max(jnp.abs(out_bf16 - ref_bf16)))
    assert jnp.allclose(out_bf16, ref_bf16, atol=1e-4, rtol=1e-4), err_b
    err_f = float(jnp.max(jnp.abs(out_f32 - ref_f32)))
    assert jnp.allclose(out_f32, ref_f32, atol=1e-4, rtol=1e-4), err_f
    # bf16-MXU output vs. the exact-f32 module semantics (loose sanity check).
    err_x = float(jnp.max(jnp.abs(out_bf16 - ref_f32)))
    assert jnp.allclose(out_bf16, ref_f32, atol=2e-2, rtol=2e-2), err_x
    print("KERNEL_OK")
</pallas_src>

<mosaic_0001>
module attributes {stable_mosaic.version = 11 : i64} {
  func.func @_basic_block_kernel(%arg0: i32, %arg1: memref<1x16x16x128xf32, #tpu.memory_space<vmem>>, %arg2: memref<3x3x128x128xbf16, #tpu.memory_space<vmem>>, %arg3: memref<1x128xf32, #tpu.memory_space<vmem>>, %arg4: memref<3x3x128x128xbf16, #tpu.memory_space<vmem>>, %arg5: memref<1x128xf32, #tpu.memory_space<vmem>>, %arg6: memref<1x16x16x128xf32, #tpu.memory_space<vmem>>, %arg7: memref<3x18x16x128xbf16, #tpu.memory_space<vmem>>, %arg8: memref<256x128xf32, #tpu.memory_space<vmem>>) attributes {dimension_semantics = [#tpu.dimension_semantics<parallel>], iteration_bounds = array<i64: 2>, scalar_prefetch = 0 : i64, scratch_operands = 2 : i64, tpu.core_type = #tpu.core_type<tc>, window_params = [{transform_indices = @transform_0, window_bounds = array<i64: 1, 16, 16, 128>}, {pipeline_mode = #tpu.pipeline_mode<synchronous>, transform_indices = @transform_1, window_bounds = array<i64: 3, 3, 128, 128>}, {pipeline_mode = #tpu.pipeline_mode<synchronous>, transform_indices = @transform_2, window_bounds = array<i64: 1, 128>}, {pipeline_mode = #tpu.pipeline_mode<synchronous>, transform_indices = @transform_3, window_bounds = array<i64: 3, 3, 128, 128>}, {pipeline_mode = #tpu.pipeline_mode<synchronous>, transform_indices = @transform_4, window_bounds = array<i64: 1, 128>}, {transform_indices = @transform_5, window_bounds = array<i64: 1, 16, 16, 128>}]} {
    %cst = arith.constant 0.000000e+00 : bf16
    %0 = vector.broadcast %cst : bf16 to vector<3x18x16x128xbf16>
    %c0 = arith.constant 0 : index
    %c0_0 = arith.constant 0 : index
    %c0_1 = arith.constant 0 : index
    %c0_2 = arith.constant 0 : index
    %1 = vector.load %arg7[%c0, %c0_0, %c0_1, %c0_2] : memref<3x18x16x128xbf16, #tpu.memory_space<vmem>>, vector<3x18x16x128xbf16>
    tpu.vector_store %arg7[%c0, %c0_0, %c0_1, %c0_2], %0 {strides = array<i32>} : memref<3x18x16x128xbf16, #tpu.memory_space<vmem>>, vector<3x18x16x128xbf16>,
    %c0_3 = arith.constant 0 : index
    %c0_4 = arith.constant 0 : index
    %c0_5 = arith.constant 0 : index
    %c0_6 = arith.constant 0 : index
    %2 = vector.load %arg1[%c0_3, %c0_4, %c0_5, %c0_6] : memref<1x16x16x128xf32, #tpu.memory_space<vmem>>, vector<1x16x16x128xf32>
    %3 = vector.shape_cast %2 : vector<1x16x16x128xf32> to vector<16x16x128xf32>
    %cst_7 = arith.constant 0.000000e+00 : f32
    %4 = vector.broadcast %cst_7 : f32 to vector<16x1x128xf32>
    %5 = arith.truncf %3 : vector<16x16x128xf32> to vector<16x16x128xbf16>
    %c1 = arith.constant 1 : index
    %c1_8 = arith.constant 1 : index
    %c0_9 = arith.constant 0 : index
    %c0_10 = arith.constant 0 : index
    %6 = vector.load %arg7[%c1, %c1_8, %c0_9, %c0_10] : memref<3x18x16x128xbf16, #tpu.memory_space<vmem>>, vector<1x16x16x128xbf16>
    %7 = vector.shape_cast %6 : vector<1x16x16x128xbf16> to vector<16x16x128xbf16>
    %8 = vector.shape_cast %5 : vector<16x16x128xbf16> to vector<1x16x16x128xbf16>
    tpu.vector_store %arg7[%c1, %c1_8, %c0_9, %c0_10], %8 {strides = array<i32>} : memref<3x18x16x128xbf16, #tpu.memory_space<vmem>>, vector<1x16x16x128xbf16>,
    %9 = vector.extract_strided_slice %3 {offsets = [0, 0, 0], sizes = [16, 15, 128], strides = [1, 1, 1]} : vector<16x16x128xf32> to vector<16x15x128xf32>
    %10 = tpu.concatenate %4, %9 in 1 : vector<16x1x128xf32>, vector<16x15x128xf32> -> vector<16x16x128xf32>
    %11 = arith.truncf %10 : vector<16x16x128xf32> to vector<16x16x128xbf16>
    %c0_11 = arith.constant 0 : index
    %c1_12 = arith.constant 1 : index
    %c0_13 = arith.constant 0 : index
    %c0_14 = arith.constant 0 : index
    %12 = vector.load %arg7[%c0_11, %c1_12, %c0_13, %c0_14] : memref<3x18x16x128xbf16, #tpu.memory_space<vmem>>, vector<1x16x16x128xbf16>
    %13 = vector.shape_cast %12 : vector<1x16x16x128xbf16> to vector<16x16x128xbf16>
    %14 = vector.shape_cast %11 : vector<16x16x128xbf16> to vector<1x16x16x128xbf16>
    tpu.vector_store %arg7[%c0_11, %c1_12, %c0_13, %c0_14], %14 {strides = array<i32>} : memref<3x18x16x128xbf16, #tpu.memory_space<vmem>>, vector<1x16x16x128xbf16>,
    %15 = vector.extract_strided_slice %3 {offsets = [0, 1, 0], sizes = [16, 15, 128], strides = [1, 1, 1]} : vector<16x16x128xf32> to vector<16x15x128xf32>
    %16 = tpu.concatenate %15, %4 in 1 : vector<16x15x128xf32>, vector<16x1x128xf32> -> vector<16x16x128xf32>
    %17 = arith.truncf %16 : vector<16x16x128xf32> to vector<16x16x128xbf16>
    %c2 = arith.constant 2 : index
    %c1_15 = arith.constant 1 : index
    %c0_16 = arith.constant 0 : index
    %c0_17 = arith.constant 0 : index
    %18 = vector.load %arg7[%c2, %c1_15, %c0_16, %c0_17] : memref<3x18x16x128xbf16, #tpu.memory_space<vmem>>, vector<1x16x16x128xbf16>
    %19 = vector.shape_cast %18 : vector<1x16x16x128xbf16> to vector<16x16x128xbf16>
    %20 = vector.shape_cast %17 : vector<16x16x128xbf16> to vector<1x16x16x128xbf16>
    tpu.vector_store %arg7[%c2, %c1_15, %c0_16, %c0_17], %20 {strides = array<i32>} : memref<3x18x16x128xbf16, #tpu.memory_space<vmem>>, vector<1x16x16x128xbf16>,
    %c0_18 = arith.constant 0 : index
    %c0_19 = arith.constant 0 : index
    %c0_20 = arith.constant 0 : index
    %c0_21 = arith.constant 0 : index
    %21 = vector.load %arg7[%c0_18, %c0_19, %c0_20, %c0_21] : memref<3x18x16x128xbf16, #tpu.memory_space<vmem>>, vector<1x16x16x128xbf16>
    %22 = vector.shape_cast %21 : vector<1x16x16x128xbf16> to vector<16x16x128xbf16>
    %23 = vector.shape_cast %22 : vector<16x16x128xbf16> to vector<256x128xbf16>
    %c0_22 = arith.constant 0 : index
    %c0_23 = arith.constant 0 : index
    %c0_24 = arith.constant 0 : index
    %c0_25 = arith.constant 0 : index
    %24 = vector.load %arg2[%c0_22, %c0_23, %c0_24, %c0_25] : memref<3x3x128x128xbf16, #tpu.memory_space<vmem>>, vector<1x1x128x128xbf16>
    %25 = vector.shape_cast %24 : vector<1x1x128x128xbf16> to vector<128x128xbf16>
    %cst_26 = arith.constant dense<0.000000e+00> : vector<256x128xf32>
    %26 = tpu.matmul %23, %25, %cst_26 {dimension_numbers = #tpu.dot_dimension_numbers<[1], [0], [0], [1], [0, 0, 1, 1], [], []>} : vector<256x128xbf16>, vector<128x128xbf16>, vector<256x128xf32> -> vector<256x128xf32>
    %c0_27 = arith.constant 0 : index
    %c0_28 = arith.constant 0 : index
    %27 = vector.load %arg8[%c0_27, %c0_28] : memref<256x128xf32, #tpu.memory_space<vmem>>, vector<256x128xf32>
    tpu.vector_store %arg8[%c0_27, %c0_28], %26 {strides = array<i32>} : memref<256x128xf32, #tpu.memory_space<vmem>>, vector<256x128xf32>,
    %c1_29 = arith.constant 1 : index
    %c0_30 = arith.constant 0 : index
    %c0_31 = arith.constant 0 : index
    %c0_32 = arith.constant 0 : index
    %28 = vector.load %arg7[%c1_29, %c0_30, %c0_31, %c0_32] : memref<3x18x16x128xbf16, #tpu.memory_space<vmem>>, vector<1x16x16x128xbf16>
    %29 = vector.shape_cast %28 : vector<1x16x16x128xbf16> to vector<16x16x128xbf16>
    %30 = vector.shape_cast %29 : vector<16x16x128xbf16> to vector<256x128xbf16>
    %c0_33 = arith.constant 0 : index
    %c1_34 = arith.constant 1 : index
    %c0_35 = arith.constant 0 : index
    %c0_36 = arith.constant 0 : index
    %31 = vector.load %arg2[%c0_33, %c1_34, %c0_35, %c0_36] : memref<3x3x128x128xbf16, #tpu.memory_space<vmem>>, vector<1x1x128x128xbf16>
    %32 = vector.shape_cast %31 : vector<1x1x128x128xbf16> to vector<128x128xbf16>
    %cst_37 = arith.constant dense<0.000000e+00> : vector<256x128xf32>
    %33 = tpu.matmul %30, %32, %cst_37 {dimension_numbers = #tpu.dot_dimension_numbers<[1], [0], [0], [1], [0, 0, 1, 1], [], []>} : vector<256x128xbf16>, vector<128x128xbf16>, vector<256x128xf32> -> vector<256x128xf32>
    %c0_38 = arith.constant 0 : index
    %c0_39 = arith.constant 0 : index
    %34 = vector.load %arg8[%c0_38, %c0_39] : memref<256x128xf32, #tpu.memory_space<vmem>>, vector<256x128xf32>
    %35 = arith.addf %34, %33 : vector<256x128xf32>
    %c0_40 = arith.constant 0 : index
    %c0_41 = arith.constant 0 : index
    %36 = vector.load %arg8[%c0_40, %c0_41] : memref<256x128xf32, #tpu.memory_space<vmem>>, vector<256x128xf32>
    tpu.vector_store %arg8[%c0_40, %c0_41], %35 {strides = array<i32>} : memref<256x128xf32, #tpu.memory_space<vmem>>, vector<256x128xf32>,
    %c2_42 = arith.constant 2 : index
    %c0_43 = arith.constant 0 : index
    %c0_44 = arith.constant 0 : index
    %c0_45 = arith.constant 0 : index
    %37 = vector.load %arg7[%c2_42, %c0_43, %c0_44, %c0_45] : memref<3x18x16x128xbf16, #tpu.memory_space<vmem>>, vector<1x16x16x128xbf16>
    %38 = vector.shape_cast %37 : vector<1x16x16x128xbf16> to vector<16x16x128xbf16>
    %39 = vector.shape_cast %38 : vector<16x16x128xbf16> to vector<256x128xbf16>
    %c0_46 = arith.constant 0 : index
    %c2_47 = arith.constant 2 : index
    %c0_48 = arith.constant 0 : index
    %c0_49 = arith.constant 0 : index
    %40 = vector.load %arg2[%c0_46, %c2_47, %c0_48, %c0_49] : memref<3x3x128x128xbf16, #tpu.memory_space<vmem>>, vector<1x1x128x128xbf16>
    %41 = vector.shape_cast %40 : vector<1x1x128x128xbf16> to vector<128x128xbf16>
    %cst_50 = arith.constant dense<0.000000e+00> : vector<256x128xf32>
    %42 = tpu.matmul %39, %41, %cst_50 {dimension_numbers = #tpu.dot_dimension_numbers<[1], [0], [0], [1], [0, 0, 1, 1], [], []>} : vector<256x128xbf16>, vector<128x128xbf16>, vector<256x128xf32> -> vector<256x128xf32>
    %c0_51 = arith.constant 0 : index
    %c0_52 = arith.constant 0 : index
    %43 = vector.load %arg8[%c0_51, %c0_52] : memref<256x128xf32, #tpu.memory_space<vmem>>, vector<256x128xf32>
    %44 = arith.addf %43, %42 : vector<256x128xf32>
    %c0_53 = arith.constant 0 : index
    %c0_54 = arith.constant 0 : index
    %45 = vector.load %arg8[%c0_53, %c0_54] : memref<256x128xf32, #tpu.memory_space<vmem>>, vector<256x128xf32>
    tpu.vector_store %arg8[%c0_53, %c0_54], %44 {strides = array<i32>} : memref<256x128xf32, #tpu.memory_space<vmem>>, vector<256x128xf32>,
    %c0_55 = arith.constant 0 : index
    %c1_56 = arith.constant 1 : index
    %c0_57 = arith.constant 0 : index
    %c0_58 = arith.constant 0 : index
    %46 = vector.load %arg7[%c0_55, %c1_56, %c0_57, %c0_58] : memref<3x18x16x128xbf16, #tpu.memory_space<vmem>>, vector<1x16x16x128xbf16>
    %47 = vector.shape_cast %46 : vector<1x16x16x128xbf16> to vector<16x16x128xbf16>
    %48 = vector.shape_cast %47 : vector<16x16x128xbf16> to vector<256x128xbf16>
    %c1_59 = arith.constant 1 : index
    %c0_60 = arith.constant 0 : index
    %c0_61 = arith.constant 0 : index
    %c0_62 = arith.constant 0 : index
    %49 = vector.load %arg2[%c1_59, %c0_60, %c0_61, %c0_62] : memref<3x3x128x128xbf16, #tpu.memory_space<vmem>>, vector<1x1x128x128xbf16>
    %50 = vector.shape_cast %49 : vector<1x1x128x128xbf16> to vector<128x128xbf16>
    %cst_63 = arith.constant dense<0.000000e+00> : vector<256x128xf32>
    %51 = tpu.matmul %48, %50, %cst_63 {dimension_numbers = #tpu.dot_dimension_numbers<[1], [0], [0], [1], [0, 0, 1, 1], [], []>} : vector<256x128xbf16>, vector<128x128xbf16>, vector<256x128xf32> -> vector<256x128xf32>
    %c0_64 = arith.constant 0 : index
    %c0_65 = arith.constant 0 : index
    %52 = vector.load %arg8[%c0_64, %c0_65] : memref<256x128xf32, #tpu.memory_space<vmem>>, vector<256x128xf32>
    %53 = arith.addf %52, %51 : vector<256x128xf32>
    %c0_66 = arith.constant 0 : index
    %c0_67 = arith.constant 0 : index
    %54 = vector.load %arg8[%c0_66, %c0_67] : memref<256x128xf32, #tpu.memory_space<vmem>>, vector<256x128xf32>
    tpu.vector_store %arg8[%c0_66, %c0_67], %53 {strides = array<i32>} : memref<256x128xf32, #tpu.memory_space<vmem>>, vector<256x128xf32>,
    %c1_68 = arith.constant 1 : index
    %c1_69 = arith.constant 1 : index
    %c0_70 = arith.constant 0 : index
    %c0_71 = arith.constant 0 : index
    %55 = vector.load %arg7[%c1_68, %c1_69, %c0_70, %c0_71] : memref<3x18x16x128xbf16, #tpu.memory_space<vmem>>, vector<1x16x16x128xbf16>
    %56 = vector.shape_cast %55 : vector<1x16x16x128xbf16> to vector<16x16x128xbf16>
    %57 = vector.shape_cast %56 : vector<16x16x128xbf16> to vector<256x128xbf16>
    %c1_72 = arith.constant 1 : index
    %c1_73 = arith.constant 1 : index
    %c0_74 = arith.constant 0 : index
    %c0_75 = arith.constant 0 : index
    %58 = vector.load %arg2[%c1_72, %c1_73, %c0_74, %c0_75] : memref<3x3x128x128xbf16, #tpu.memory_space<vmem>>, vector<1x1x128x128xbf16>
    %59 = vector.shape_cast %58 : vector<1x1x128x128xbf16> to vector<128x128xbf16>
    %cst_76 = arith.constant dense<0.000000e+00> : vector<256x128xf32>
    %60 = tpu.matmul %57, %59, %cst_76 {dimension_numbers = #tpu.dot_dimension_numbers<[1], [0], [0], [1], [0, 0, 1, 1], [], []>} : vector<256x128xbf16>, vector<128x128xbf16>, vector<256x128xf32> -> vector<256x128xf32>
    %c0_77 = arith.constant 0 : index
    %c0_78 = arith.constant 0 : index
    %61 = vector.load %arg8[%c0_77, %c0_78] : memref<256x128xf32, #tpu.memory_space<vmem>>, vector<256x128xf32>
    %62 = arith.addf %61, %60 : vector<256x128xf32>
    %c0_79 = arith.constant 0 : index
    %c0_80 = arith.constant 0 : index
    %63 = vector.load %arg8[%c0_79, %c0_80] : memref<256x128xf32, #tpu.memory_space<vmem>>, vector<256x128xf32>
    tpu.vector_store %arg8[%c0_79, %c0_80], %62 {strides = array<i32>} : memref<256x128xf32, #tpu.memory_space<vmem>>, vector<256x128xf32>,
    %c2_81 = arith.constant 2 : index
    %c1_82 = arith.constant 1 : index
    %c0_83 = arith.constant 0 : index
    %c0_84 = arith.constant 0 : index
    %64 = vector.load %arg7[%c2_81, %c1_82, %c0_83, %c0_84] : memref<3x18x16x128xbf16, #tpu.memory_space<vmem>>, vector<1x16x16x128xbf16>
    %65 = vector.shape_cast %64 : vector<1x16x16x128xbf16> to vector<16x16x128xbf16>
    %66 = vector.shape_cast %65 : vector<16x16x128xbf16> to vector<256x128xbf16>
    %c1_85 = arith.constant 1 : index
    %c2_86 = arith.constant 2 : index
    %c0_87 = arith.constant 0 : index
    %c0_88 = arith.constant 0 : index
    %67 = vector.load %arg2[%c1_85, %c2_86, %c0_87, %c0_88] : memref<3x3x128x128xbf16, #tpu.memory_space<vmem>>, vector<1x1x128x128xbf16>
    %68 = vector.shape_cast %67 : vector<1x1x128x128xbf16> to vector<128x128xbf16>
    %cst_89 = arith.constant dense<0.000000e+00> : vector<256x128xf32>
    %69 = tpu.matmul %66, %68, %cst_89 {dimension_numbers = #tpu.dot_dimension_numbers<[1], [0], [0], [1], [0, 0, 1, 1], [], []>} : vector<256x128xbf16>, vector<128x128xbf16>, vector<256x128xf32> -> vector<256x128xf32>
    %c0_90 = arith.constant 0 : index
    %c0_91 = arith.constant 0 : index
    %70 = vector.load %arg8[%c0_90, %c0_91] : memref<256x128xf32, #tpu.memory_space<vmem>>, vector<256x128xf32>
    %71 = arith.addf %70, %69 : vector<256x128xf32>
    %c0_92 = arith.constant 0 : index
    %c0_93 = arith.constant 0 : index
    %72 = vector.load %arg8[%c0_92, %c0_93] : memref<256x128xf32, #tpu.memory_space<vmem>>, vector<256x128xf32>
    tpu.vector_store %arg8[%c0_92, %c0_93], %71 {strides = array<i32>} : memref<256x128xf32, #tpu.memory_space<vmem>>, vector<256x128xf32>,
    %c0_94 = arith.constant 0 : index
    %c2_95 = arith.constant 2 : index
    %c0_96 = arith.constant 0 : index
    %c0_97 = arith.constant 0 : index
    %73 = vector.load %arg7[%c0_94, %c2_95, %c0_96, %c0_97] : memref<3x18x16x128xbf16, #tpu.memory_space<vmem>>, vector<1x16x16x128xbf16>
    %74 = vector.shape_cast %73 : vector<1x16x16x128xbf16> to vector<16x16x128xbf16>
    %75 = vector.shape_cast %74 : vector<16x16x128xbf16> to vector<256x128xbf16>
    %c2_98 = arith.constant 2 : index
    %c0_99 = arith.constant 0 : index
    %c0_100 = arith.constant 0 : index
    %c0_101 = arith.constant 0 : index
    %76 = vector.load %arg2[%c2_98, %c0_99, %c0_100, %c0_101] : memref<3x3x128x128xbf16, #tpu.memory_space<vmem>>, vector<1x1x128x128xbf16>
    %77 = vector.shape_cast %76 : vector<1x1x128x128xbf16> to vector<128x128xbf16>
    %cst_102 = arith.constant dense<0.000000e+00> : vector<256x128xf32>
    %78 = tpu.matmul %75, %77, %cst_102 {dimension_numbers = #tpu.dot_dimension_numbers<[1], [0], [0], [1], [0, 0, 1, 1], [], []>} : vector<256x128xbf16>, vector<128x128xbf16>, vector<256x128xf32> -> vector<256x128xf32>
    %c0_103 = arith.constant 0 : index
    %c0_104 = arith.constant 0 : index
    %79 = vector.load %arg8[%c0_103, %c0_104] : memref<256x128xf32, #tpu.memory_space<vmem>>, vector<256x128xf32>
    %80 = arith.addf %79, %78 : vector<256x128xf32>
    %c0_105 = arith.constant 0 : index
    %c0_106 = arith.constant 0 : index
    %81 = vector.load %arg8[%c0_105, %c0_106] : memref<256x128xf32, #tpu.memory_space<vmem>>, vector<256x128xf32>
    tpu.vector_store %arg8[%c0_105, %c0_106], %80 {strides = array<i32>} : memref<256x128xf32, #tpu.memory_space<vmem>>, vector<256x128xf32>,
    %c1_107 = arith.constant 1 : index
    %c2_108 = arith.constant 2 : index
    %c0_109 = arith.constant 0 : index
    %c0_110 = arith.constant 0 : index
    %82 = vector.load %arg7[%c1_107, %c2_108, %c0_109, %c0_110] : memref<3x18x16x128xbf16, #tpu.memory_space<vmem>>, vector<1x16x16x128xbf16>
    %83 = vector.shape_cast %82 : vector<1x16x16x128xbf16> to vector<16x16x128xbf16>
    %84 = vector.shape_cast %83 : vector<16x16x128xbf16> to vector<256x128xbf16>
    %c2_111 = arith.constant 2 : index
    %c1_112 = arith.constant 1 : index
    %c0_113 = arith.constant 0 : index
    %c0_114 = arith.constant 0 : index
    %85 = vector.load %arg2[%c2_111, %c1_112, %c0_113, %c0_114] : memref<3x3x128x128xbf16, #tpu.memory_space<vmem>>, vector<1x1x128x128xbf16>
    %86 = vector.shape_cast %85 : vector<1x1x128x128xbf16> to vector<128x128xbf16>
    %cst_115 = arith.constant dense<0.000000e+00> : vector<256x128xf32>
    %87 = tpu.matmul %84, %86, %cst_115 {dimension_numbers = #tpu.dot_dimension_numbers<[1], [0], [0], [1], [0, 0, 1, 1], [], []>} : vector<256x128xbf16>, vector<128x128xbf16>, vector<256x128xf32> -> vector<256x128xf32>
    %c0_116 = arith.constant 0 : index
    %c0_117 = arith.constant 0 : index
    %88 = vector.load %arg8[%c0_116, %c0_117] : memref<256x128xf32, #tpu.memory_space<vmem>>, vector<256x128xf32>
    %89 = arith.addf %88, %87 : vector<256x128xf32>
    %c0_118 = arith.constant 0 : index
    %c0_119 = arith.constant 0 : index
    %90 = vector.load %arg8[%c0_118, %c0_119] : memref<256x128xf32, #tpu.memory_space<vmem>>, vector<256x128xf32>
    tpu.vector_store %arg8[%c0_118, %c0_119], %89 {strides = array<i32>} : memref<256x128xf32, #tpu.memory_space<vmem>>, vector<256x128xf32>,
    %c2_120 = arith.constant 2 : index
    %c2_121 = arith.constant 2 : index
    %c0_122 = arith.constant 0 : index
    %c0_123 = arith.constant 0 : index
    %91 = vector.load %arg7[%c2_120, %c2_121, %c0_122, %c0_123] : memref<3x18x16x128xbf16, #tpu.memory_space<vmem>>, vector<1x16x16x128xbf16>
    %92 = vector.shape_cast %91 : vector<1x16x16x128xbf16> to vector<16x16x128xbf16>
    %93 = vector.shape_cast %92 : vector<16x16x128xbf16> to vector<256x128xbf16>
    %c2_124 = arith.constant 2 : index
    %c2_125 = arith.constant 2 : index
    %c0_126 = arith.constant 0 : index
    %c0_127 = arith.constant 0 : index
    %94 = vector.load %arg2[%c2_124, %c2_125, %c0_126, %c0_127] : memref<3x3x128x128xbf16, #tpu.memory_space<vmem>>, vector<1x1x128x128xbf16>
    %95 = vector.shape_cast %94 : vector<1x1x128x128xbf16> to vector<128x128xbf16>
    %cst_128 = arith.constant dense<0.000000e+00> : vector<256x128xf32>
    %96 = tpu.matmul %93, %95, %cst_128 {dimension_numbers = #tpu.dot_dimension_numbers<[1], [0], [0], [1], [0, 0, 1, 1], [], []>} : vector<256x128xbf16>, vector<128x128xbf16>, vector<256x128xf32> -> vector<256x128xf32>
    %c0_129 = arith.constant 0 : index
    %c0_130 = arith.constant 0 : index
    %97 = vector.load %arg8[%c0_129, %c0_130] : memref<256x128xf32, #tpu.memory_space<vmem>>, vector<256x128xf32>
    %98 = arith.addf %97, %96 : vector<256x128xf32>
    %c0_131 = arith.constant 0 : index
    %c0_132 = arith.constant 0 : index
    %99 = vector.load %arg8[%c0_131, %c0_132] : memref<256x128xf32, #tpu.memory_space<vmem>>, vector<256x128xf32>
    tpu.vector_store %arg8[%c0_131, %c0_132], %98 {strides = array<i32>} : memref<256x128xf32, #tpu.memory_space<vmem>>, vector<256x128xf32>,
    %c0_133 = arith.constant 0 : index
    %c0_134 = arith.constant 0 : index
    %100 = vector.load %arg8[%c0_133, %c0_134] : memref<256x128xf32, #tpu.memory_space<vmem>>, vector<256x128xf32>
    %c0_135 = arith.constant 0 : index
    %c0_136 = arith.constant 0 : index
    %101 = vector.load %arg3[%c0_135, %c0_136] : memref<1x128xf32, #tpu.memory_space<vmem>>, vector<1x128xf32>
    %102 = vector.broadcast %101 : vector<1x128xf32> to vector<256x128xf32>
    %103 = arith.addf %100, %102 : vector<256x128xf32>
    %cst_137 = arith.constant 0.000000e+00 : f32
    %104 = vector.broadcast %cst_137 : f32 to vector<256x128xf32>
    %105 = arith.maximumf %103, %104 : vector<256x128xf32>
    %106 = vector.shape_cast %105 : vector<256x128xf32> to vector<16x16x128xf32>
    %cst_138 = arith.constant 0.000000e+00 : f32
    %107 = vector.broadcast %cst_138 : f32 to vector<16x1x128xf32>
    %108 = arith.truncf %106 : vector<16x16x128xf32> to vector<16x16x128xbf16>
    %c1_139 = arith.constant 1 : index
    %c1_140 = arith.constant 1 : index
    %c0_141 = arith.constant 0 : index
    %c0_142 = arith.constant 0 : index
    %109 = vector.load %arg7[%c1_139, %c1_140, %c0_141, %c0_142] : memref<3x18x16x128xbf16, #tpu.memory_space<vmem>>, vector<1x16x16x128xbf16>
    %110 = vector.shape_cast %109 : vector<1x16x16x128xbf16> to vector<16x16x128xbf16>
    %111 = vector.shape_cast %108 : vector<16x16x128xbf16> to vector<1x16x16x128xbf16>
    tpu.vector_store %arg7[%c1_139, %c1_140, %c0_141, %c0_142], %111 {strides = array<i32>} : memref<3x18x16x128xbf16, #tpu.memory_space<vmem>>, vector<1x16x16x128xbf16>,
    %112 = vector.extract_strided_slice %106 {offsets = [0, 0, 0], sizes = [16, 15, 128], strides = [1, 1, 1]} : vector<16x16x128xf32> to vector<16x15x128xf32>
    %113 = tpu.concatenate %107, %112 in 1 : vector<16x1x128xf32>, vector<16x15x128xf32> -> vector<16x16x128xf32>
    %114 = arith.truncf %113 : vector<16x16x128xf32> to vector<16x16x128xbf16>
    %c0_143 = arith.constant 0 : index
    %c1_144 = arith.constant 1 : index
    %c0_145 = arith.constant 0 : index
    %c0_146 = arith.constant 0 : index
    %115 = vector.load %arg7[%c0_143, %c1_144, %c0_145, %c0_146] : memref<3x18x16x128xbf16, #tpu.memory_space<vmem>>, vector<1x16x16x128xbf16>
    %116 = vector.shape_cast %115 : vector<1x16x16x128xbf16> to vector<16x16x128xbf16>
    %117 = vector.shape_cast %114 : vector<16x16x128xbf16> to vector<1x16x16x128xbf16>
    tpu.vector_store %arg7[%c0_143, %c1_144, %c0_145, %c0_146], %117 {strides = array<i32>} : memref<3x18x16x128xbf16, #tpu.memory_space<vmem>>, vector<1x16x16x128xbf16>,
    %118 = vector.extract_strided_slice %106 {offsets = [0, 1, 0], sizes = [16, 15, 128], strides = [1, 1, 1]} : vector<16x16x128xf32> to vector<16x15x128xf32>
    %119 = tpu.concatenate %118, %107 in 1 : vector<16x15x128xf32>, vector<16x1x128xf32> -> vector<16x16x128xf32>
    %120 = arith.truncf %119 : vector<16x16x128xf32> to vector<16x16x128xbf16>
    %c2_147 = arith.constant 2 : index
    %c1_148 = arith.constant 1 : index
    %c0_149 = arith.constant 0 : index
    %c0_150 = arith.constant 0 : index
    %121 = vector.load %arg7[%c2_147, %c1_148, %c0_149, %c0_150] : memref<3x18x16x128xbf16, #tpu.memory_space<vmem>>, vector<1x16x16x128xbf16>
    %122 = vector.shape_cast %121 : vector<1x16x16x128xbf16> to vector<16x16x128xbf16>
    %123 = vector.shape_cast %120 : vector<16x16x128xbf16> to vector<1x16x16x128xbf16>
    tpu.vector_store %arg7[%c2_147, %c1_148, %c0_149, %c0_150], %123 {strides = array<i32>} : memref<3x18x16x128xbf16, #tpu.memory_space<vmem>>, vector<1x16x16x128xbf16>,
    %c0_151 = arith.constant 0 : index
    %c0_152 = arith.constant 0 : index
    %c0_153 = arith.constant 0 : index
    %c0_154 = arith.constant 0 : index
    %124 = vector.load %arg7[%c0_151, %c0_152, %c0_153, %c0_154] : memref<3x18x16x128xbf16, #tpu.memory_space<vmem>>, vector<1x16x16x128xbf16>
    %125 = vector.shape_cast %124 : vector<1x16x16x128xbf16> to vector<16x16x128xbf16>
    %126 = vector.shape_cast %125 : vector<16x16x128xbf16> to vector<256x128xbf16>
    %c0_155 = arith.constant 0 : index
    %c0_156 = arith.constant 0 : index
    %c0_157 = arith.constant 0 : index
    %c0_158 = arith.constant 0 : index
    %127 = vector.load %arg4[%c0_155, %c0_156, %c0_157, %c0_158] : memref<3x3x128x128xbf16, #tpu.memory_space<vmem>>, vector<1x1x128x128xbf16>
    %128 = vector.shape_cast %127 : vector<1x1x128x128xbf16> to vector<128x128xbf16>
    %cst_159 = arith.constant dense<0.000000e+00> : vector<256x128xf32>
    %129 = tpu.matmul %126, %128, %cst_159 {dimension_numbers = #tpu.dot_dimension_numbers<[1], [0], [0], [1], [0, 0, 1, 1], [], []>} : vector<256x128xbf16>, vector<128x128xbf16>, vector<256x128xf32> -> vector<256x128xf32>
    %c0_160 = arith.constant 0 : index
    %c0_161 = arith.constant 0 : index
    %130 = vector.load %arg8[%c0_160, %c0_161] : memref<256x128xf32, #tpu.memory_space<vmem>>, vector<256x128xf32>
    tpu.vector_store %arg8[%c0_160, %c0_161], %129 {strides = array<i32>} : memref<256x128xf32, #tpu.memory_space<vmem>>, vector<256x128xf32>,
    %c1_162 = arith.constant 1 : index
    %c0_163 = arith.constant 0 : index
    %c0_164 = arith.constant 0 : index
    %c0_165 = arith.constant 0 : index
    %131 = vector.load %arg7[%c1_162, %c0_163, %c0_164, %c0_165] : memref<3x18x16x128xbf16, #tpu.memory_space<vmem>>, vector<1x16x16x128xbf16>
    %132 = vector.shape_cast %131 : vector<1x16x16x128xbf16> to vector<16x16x128xbf16>
    %133 = vector.shape_cast %132 : vector<16x16x128xbf16> to vector<256x128xbf16>
    %c0_166 = arith.constant 0 : index
    %c1_167 = arith.constant 1 : index
    %c0_168 = arith.constant 0 : index
    %c0_169 = arith.constant 0 : index
    %134 = vector.load %arg4[%c0_166, %c1_167, %c0_168, %c0_169] : memref<3x3x128x128xbf16, #tpu.memory_space<vmem>>, vector<1x1x128x128xbf16>
    %135 = vector.shape_cast %134 : vector<1x1x128x128xbf16> to vector<128x128xbf16>
    %cst_170 = arith.constant dense<0.000000e+00> : vector<256x128xf32>
    %136 = tpu.matmul %133, %135, %cst_170 {dimension_numbers = #tpu.dot_dimension_numbers<[1], [0], [0], [1], [0, 0, 1, 1], [], []>} : vector<256x128xbf16>, vector<128x128xbf16>, vector<256x128xf32> -> vector<256x128xf32>
    %c0_171 = arith.constant 0 : index
    %c0_172 = arith.constant 0 : index
    %137 = vector.load %arg8[%c0_171, %c0_172] : memref<256x128xf32, #tpu.memory_space<vmem>>, vector<256x128xf32>
    %138 = arith.addf %137, %136 : vector<256x128xf32>
    %c0_173 = arith.constant 0 : index
    %c0_174 = arith.constant 0 : index
    %139 = vector.load %arg8[%c0_173, %c0_174] : memref<256x128xf32, #tpu.memory_space<vmem>>, vector<256x128xf32>
    tpu.vector_store %arg8[%c0_173, %c0_174], %138 {strides = array<i32>} : memref<256x128xf32, #tpu.memory_space<vmem>>, vector<256x128xf32>,
    %c2_175 = arith.constant 2 : index
    %c0_176 = arith.constant 0 : index
    %c0_177 = arith.constant 0 : index
    %c0_178 = arith.constant 0 : index
    %140 = vector.load %arg7[%c2_175, %c0_176, %c0_177, %c0_178] : memref<3x18x16x128xbf16, #tpu.memory_space<vmem>>, vector<1x16x16x128xbf16>
    %141 = vector.shape_cast %140 : vector<1x16x16x128xbf16> to vector<16x16x128xbf16>
    %142 = vector.shape_cast %141 : vector<16x16x128xbf16> to vector<256x128xbf16>
    %c0_179 = arith.constant 0 : index
    %c2_180 = arith.constant 2 : index
    %c0_181 = arith.constant 0 : index
    %c0_182 = arith.constant 0 : index
    %143 = vector.load %arg4[%c0_179, %c2_180, %c0_181, %c0_182] : memref<3x3x128x128xbf16, #tpu.memory_space<vmem>>, vector<1x1x128x128xbf16>
    %144 = vector.shape_cast %143 : vector<1x1x128x128xbf16> to vector<128x128xbf16>
    %cst_183 = arith.constant dense<0.000000e+00> : vector<256x128xf32>
    %145 = tpu.matmul %142, %144, %cst_183 {dimension_numbers = #tpu.dot_dimension_numbers<[1], [0], [0], [1], [0, 0, 1, 1], [], []>} : vector<256x128xbf16>, vector<128x128xbf16>, vector<256x128xf32> -> vector<256x128xf32>
    %c0_184 = arith.constant 0 : index
    %c0_185 = arith.constant 0 : index
    %146 = vector.load %arg8[%c0_184, %c0_185] : memref<256x128xf32, #tpu.memory_space<vmem>>, vector<256x128xf32>
    %147 = arith.addf %146, %145 : vector<256x128xf32>
    %c0_186 = arith.constant 0 : index
    %c0_187 = arith.constant 0 : index
    %148 = vector.load %arg8[%c0_186, %c0_187] : memref<256x128xf32, #tpu.memory_space<vmem>>, vector<256x128xf32>
    tpu.vector_store %arg8[%c0_186, %c0_187], %147 {strides = array<i32>} : memref<256x128xf32, #tpu.memory_space<vmem>>, vector<256x128xf32>,
    %c0_188 = arith.constant 0 : index
    %c1_189 = arith.constant 1 : index
    %c0_190 = arith.constant 0 : index
    %c0_191 = arith.constant 0 : index
    %149 = vector.load %arg7[%c0_188, %c1_189, %c0_190, %c0_191] : memref<3x18x16x128xbf16, #tpu.memory_space<vmem>>, vector<1x16x16x128xbf16>
    %150 = vector.shape_cast %149 : vector<1x16x16x128xbf16> to vector<16x16x128xbf16>
    %151 = vector.shape_cast %150 : vector<16x16x128xbf16> to vector<256x128xbf16>
    %c1_192 = arith.constant 1 : index
    %c0_193 = arith.constant 0 : index
    %c0_194 = arith.constant 0 : index
    %c0_195 = arith.constant 0 : index
    %152 = vector.load %arg4[%c1_192, %c0_193, %c0_194, %c0_195] : memref<3x3x128x128xbf16, #tpu.memory_space<vmem>>, vector<1x1x128x128xbf16>
    %153 = vector.shape_cast %152 : vector<1x1x128x128xbf16> to vector<128x128xbf16>
    %cst_196 = arith.constant dense<0.000000e+00> : vector<256x128xf32>
    %154 = tpu.matmul %151, %153, %cst_196 {dimension_numbers = #tpu.dot_dimension_numbers<[1], [0], [0], [1], [0, 0, 1, 1], [], []>} : vector<256x128xbf16>, vector<128x128xbf16>, vector<256x128xf32> -> vector<256x128xf32>
    %c0_197 = arith.constant 0 : index
    %c0_198 = arith.constant 0 : index
    %155 = vector.load %arg8[%c0_197, %c0_198] : memref<256x128xf32, #tpu.memory_space<vmem>>, vector<256x128xf32>
    %156 = arith.addf %155, %154 : vector<256x128xf32>
    %c0_199 = arith.constant 0 : index
    %c0_200 = arith.constant 0 : index
    %157 = vector.load %arg8[%c0_199, %c0_200] : memref<256x128xf32, #tpu.memory_space<vmem>>, vector<256x128xf32>
    tpu.vector_store %arg8[%c0_199, %c0_200], %156 {strides = array<i32>} : memref<256x128xf32, #tpu.memory_space<vmem>>, vector<256x128xf32>,
    %c1_201 = arith.constant 1 : index
    %c1_202 = arith.constant 1 : index
    %c0_203 = arith.constant 0 : index
    %c0_204 = arith.constant 0 : index
    %158 = vector.load %arg7[%c1_201, %c1_202, %c0_203, %c0_204] : memref<3x18x16x128xbf16, #tpu.memory_space<vmem>>, vector<1x16x16x128xbf16>
    %159 = vector.shape_cast %158 : vector<1x16x16x128xbf16> to vector<16x16x128xbf16>
    %160 = vector.shape_cast %159 : vector<16x16x128xbf16> to vector<256x128xbf16>
    %c1_205 = arith.constant 1 : index
    %c1_206 = arith.constant 1 : index
    %c0_207 = arith.constant 0 : index
    %c0_208 = arith.constant 0 : index
    %161 = vector.load %arg4[%c1_205, %c1_206, %c0_207, %c0_208] : memref<3x3x128x128xbf16, #tpu.memory_space<vmem>>, vector<1x1x128x128xbf16>
    %162 = vector.shape_cast %161 : vector<1x1x128x128xbf16> to vector<128x128xbf16>
    %cst_209 = arith.constant dense<0.000000e+00> : vector<256x128xf32>
    %163 = tpu.matmul %160, %162, %cst_209 {dimension_numbers = #tpu.dot_dimension_numbers<[1], [0], [0], [1], [0, 0, 1, 1], [], []>} : vector<256x128xbf16>, vector<128x128xbf16>, vector<256x128xf32> -> vector<256x128xf32>
    %c0_210 = arith.constant 0 : index
    %c0_211 = arith.constant 0 : index
    %164 = vector.load %arg8[%c0_210, %c0_211] : memref<256x128xf32, #tpu.memory_space<vmem>>, vector<256x128xf32>
    %165 = arith.addf %164, %163 : vector<256x128xf32>
    %c0_212 = arith.constant 0 : index
    %c0_213 = arith.constant 0 : index
    %166 = vector.load %arg8[%c0_212, %c0_213] : memref<256x128xf32, #tpu.memory_space<vmem>>, vector<256x128xf32>
    tpu.vector_store %arg8[%c0_212, %c0_213], %165 {strides = array<i32>} : memref<256x128xf32, #tpu.memory_space<vmem>>, vector<256x128xf32>,
    %c2_214 = arith.constant 2 : index
    %c1_215 = arith.constant 1 : index
    %c0_216 = arith.constant 0 : index
    %c0_217 = arith.constant 0 : index
    %167 = vector.load %arg7[%c2_214, %c1_215, %c0_216, %c0_217] : memref<3x18x16x128xbf16, #tpu.memory_space<vmem>>, vector<1x16x16x128xbf16>
    %168 = vector.shape_cast %167 : vector<1x16x16x128xbf16> to vector<16x16x128xbf16>
    %169 = vector.shape_cast %168 : vector<16x16x128xbf16> to vector<256x128xbf16>
    %c1_218 = arith.constant 1 : index
    %c2_219 = arith.constant 2 : index
    %c0_220 = arith.constant 0 : index
    %c0_221 = arith.constant 0 : index
    %170 = vector.load %arg4[%c1_218, %c2_219, %c0_220, %c0_221] : memref<3x3x128x128xbf16, #tpu.memory_space<vmem>>, vector<1x1x128x128xbf16>
    %171 = vector.shape_cast %170 : vector<1x1x128x128xbf16> to vector<128x128xbf16>
    %cst_222 = arith.constant dense<0.000000e+00> : vector<256x128xf32>
    %172 = tpu.matmul %169, %171, %cst_222 {dimension_numbers = #tpu.dot_dimension_numbers<[1], [0], [0], [1], [0, 0, 1, 1], [], []>} : vector<256x128xbf16>, vector<128x128xbf16>, vector<256x128xf32> -> vector<256x128xf32>
    %c0_223 = arith.constant 0 : index
    %c0_224 = arith.constant 0 : index
    %173 = vector.load %arg8[%c0_223, %c0_224] : memref<256x128xf32, #tpu.memory_space<vmem>>, vector<256x128xf32>
    %174 = arith.addf %173, %172 : vector<256x128xf32>
    %c0_225 = arith.constant 0 : index
    %c0_226 = arith.constant 0 : index
    %175 = vector.load %arg8[%c0_225, %c0_226] : memref<256x128xf32, #tpu.memory_space<vmem>>, vector<256x128xf32>
    tpu.vector_store %arg8[%c0_225, %c0_226], %174 {strides = array<i32>} : memref<256x128xf32, #tpu.memory_space<vmem>>, vector<256x128xf32>,
    %c0_227 = arith.constant 0 : index
    %c2_228 = arith.constant 2 : index
    %c0_229 = arith.constant 0 : index
    %c0_230 = arith.constant 0 : index
    %176 = vector.load %arg7[%c0_227, %c2_228, %c0_229, %c0_230] : memref<3x18x16x128xbf16, #tpu.memory_space<vmem>>, vector<1x16x16x128xbf16>
    %177 = vector.shape_cast %176 : vector<1x16x16x128xbf16> to vector<16x16x128xbf16>
    %178 = vector.shape_cast %177 : vector<16x16x128xbf16> to vector<256x128xbf16>
    %c2_231 = arith.constant 2 : index
    %c0_232 = arith.constant 0 : index
    %c0_233 = arith.constant 0 : index
    %c0_234 = arith.constant 0 : index
    %179 = vector.load %arg4[%c2_231, %c0_232, %c0_233, %c0_234] : memref<3x3x128x128xbf16, #tpu.memory_space<vmem>>, vector<1x1x128x128xbf16>
    %180 = vector.shape_cast %179 : vector<1x1x128x128xbf16> to vector<128x128xbf16>
    %cst_235 = arith.constant dense<0.000000e+00> : vector<256x128xf32>
    %181 = tpu.matmul %178, %180, %cst_235 {dimension_numbers = #tpu.dot_dimension_numbers<[1], [0], [0], [1], [0, 0, 1, 1], [], []>} : vector<256x128xbf16>, vector<128x128xbf16>, vector<256x128xf32> -> vector<256x128xf32>
    %c0_236 = arith.constant 0 : index
    %c0_237 = arith.constant 0 : index
    %182 = vector.load %arg8[%c0_236, %c0_237] : memref<256x128xf32, #tpu.memory_space<vmem>>, vector<256x128xf32>
    %183 = arith.addf %182, %181 : vector<256x128xf32>
    %c0_238 = arith.constant 0 : index
    %c0_239 = arith.constant 0 : index
    %184 = vector.load %arg8[%c0_238, %c0_239] : memref<256x128xf32, #tpu.memory_space<vmem>>, vector<256x128xf32>
    tpu.vector_store %arg8[%c0_238, %c0_239], %183 {strides = array<i32>} : memref<256x128xf32, #tpu.memory_space<vmem>>, vector<256x128xf32>,
    %c1_240 = arith.constant 1 : index
    %c2_241 = arith.constant 2 : index
    %c0_242 = arith.constant 0 : index
    %c0_243 = arith.constant 0 : index
    %185 = vector.load %arg7[%c1_240, %c2_241, %c0_242, %c0_243] : memref<3x18x16x128xbf16, #tpu.memory_space<vmem>>, vector<1x16x16x128xbf16>
    %186 = vector.shape_cast %185 : vector<1x16x16x128xbf16> to vector<16x16x128xbf16>
    %187 = vector.shape_cast %186 : vector<16x16x128xbf16> to vector<256x128xbf16>
    %c2_244 = arith.constant 2 : index
    %c1_245 = arith.constant 1 : index
    %c0_246 = arith.constant 0 : index
    %c0_247 = arith.constant 0 : index
    %188 = vector.load %arg4[%c2_244, %c1_245, %c0_246, %c0_247] : memref<3x3x128x128xbf16, #tpu.memory_space<vmem>>, vector<1x1x128x128xbf16>
    %189 = vector.shape_cast %188 : vector<1x1x128x128xbf16> to vector<128x128xbf16>
    %cst_248 = arith.constant dense<0.000000e+00> : vector<256x128xf32>
    %190 = tpu.matmul %187, %189, %cst_248 {dimension_numbers = #tpu.dot_dimension_numbers<[1], [0], [0], [1], [0, 0, 1, 1], [], []>} : vector<256x128xbf16>, vector<128x128xbf16>, vector<256x128xf32> -> vector<256x128xf32>
    %c0_249 = arith.constant 0 : index
    %c0_250 = arith.constant 0 : index
    %191 = vector.load %arg8[%c0_249, %c0_250] : memref<256x128xf32, #tpu.memory_space<vmem>>, vector<256x128xf32>
    %192 = arith.addf %191, %190 : vector<256x128xf32>
    %c0_251 = arith.constant 0 : index
    %c0_252 = arith.constant 0 : index
    %193 = vector.load %arg8[%c0_251, %c0_252] : memref<256x128xf32, #tpu.memory_space<vmem>>, vector<256x128xf32>
    tpu.vector_store %arg8[%c0_251, %c0_252], %192 {strides = array<i32>} : memref<256x128xf32, #tpu.memory_space<vmem>>, vector<256x128xf32>,
    %c2_253 = arith.constant 2 : index
    %c2_254 = arith.constant 2 : index
    %c0_255 = arith.constant 0 : index
    %c0_256 = arith.constant 0 : index
    %194 = vector.load %arg7[%c2_253, %c2_254, %c0_255, %c0_256] : memref<3x18x16x128xbf16, #tpu.memory_space<vmem>>, vector<1x16x16x128xbf16>
    %195 = vector.shape_cast %194 : vector<1x16x16x128xbf16> to vector<16x16x128xbf16>
    %196 = vector.shape_cast %195 : vector<16x16x128xbf16> to vector<256x128xbf16>
    %c2_257 = arith.constant 2 : index
    %c2_258 = arith.constant 2 : index
    %c0_259 = arith.constant 0 : index
    %c0_260 = arith.constant 0 : index
    %197 = vector.load %arg4[%c2_257, %c2_258, %c0_259, %c0_260] : memref<3x3x128x128xbf16, #tpu.memory_space<vmem>>, vector<1x1x128x128xbf16>
    %198 = vector.shape_cast %197 : vector<1x1x128x128xbf16> to vector<128x128xbf16>
    %cst_261 = arith.constant dense<0.000000e+00> : vector<256x128xf32>
    %199 = tpu.matmul %196, %198, %cst_261 {dimension_numbers = #tpu.dot_dimension_numbers<[1], [0], [0], [1], [0, 0, 1, 1], [], []>} : vector<256x128xbf16>, vector<128x128xbf16>, vector<256x128xf32> -> vector<256x128xf32>
    %c0_262 = arith.constant 0 : index
    %c0_263 = arith.constant 0 : index
    %200 = vector.load %arg8[%c0_262, %c0_263] : memref<256x128xf32, #tpu.memory_space<vmem>>, vector<256x128xf32>
    %201 = arith.addf %200, %199 : vector<256x128xf32>
    %c0_264 = arith.constant 0 : index
    %c0_265 = arith.constant 0 : index
    %202 = vector.load %arg8[%c0_264, %c0_265] : memref<256x128xf32, #tpu.memory_space<vmem>>, vector<256x128xf32>
    tpu.vector_store %arg8[%c0_264, %c0_265], %201 {strides = array<i32>} : memref<256x128xf32, #tpu.memory_space<vmem>>, vector<256x128xf32>,
    %c0_266 = arith.constant 0 : index
    %c0_267 = arith.constant 0 : index
    %203 = vector.load %arg8[%c0_266, %c0_267] : memref<256x128xf32, #tpu.memory_space<vmem>>, vector<256x128xf32>
    %c0_268 = arith.constant 0 : index
    %c0_269 = arith.constant 0 : index
    %204 = vector.load %arg5[%c0_268, %c0_269] : memref<1x128xf32, #tpu.memory_space<vmem>>, vector<1x128xf32>
    %205 = vector.broadcast %204 : vector<1x128xf32> to vector<256x128xf32>
    %206 = arith.addf %203, %205 : vector<256x128xf32>
    %207 = vector.shape_cast %206 : vector<256x128xf32> to vector<16x16x128xf32>
    %c0_270 = arith.constant 0 : index
    %c0_271 = arith.constant 0 : index
    %c0_272 = arith.constant 0 : index
    %c0_273 = arith.constant 0 : index
    %208 = vector.load %arg1[%c0_270, %c0_271, %c0_272, %c0_273] : memref<1x16x16x128xf32, #tpu.memory_space<vmem>>, vector<1x16x16x128xf32>
    %209 = vector.shape_cast %208 : vector<1x16x16x128xf32> to vector<16x16x128xf32>
    %210 = arith.addf %207, %209 : vector<16x16x128xf32>
    %cst_274 = arith.constant 0.000000e+00 : f32
    %211 = vector.broadcast %cst_274 : f32 to vector<16x16x128xf32>
    %212 = arith.maximumf %210, %211 : vector<16x16x128xf32>
    %c0_275 = arith.constant 0 : index
    %c0_276 = arith.constant 0 : index
    %c0_277 = arith.constant 0 : index
    %c0_278 = arith.constant 0 : index
    %213 = vector.load %arg6[%c0_275, %c0_276, %c0_277, %c0_278] : memref<1x16x16x128xf32, #tpu.memory_space<vmem>>, vector<1x16x16x128xf32>
    %214 = vector.shape_cast %213 : vector<1x16x16x128xf32> to vector<16x16x128xf32>
    %215 = vector.shape_cast %212 : vector<16x16x128xf32> to vector<1x16x16x128xf32>
    tpu.vector_store %arg6[%c0_275, %c0_276, %c0_277, %c0_278], %215 {strides = array<i32>} : memref<1x16x16x128xf32, #tpu.memory_space<vmem>>, vector<1x16x16x128xf32>,
    return
  }
  func.func @transform_0(%arg0: i32) -> (i32, i32, i32, i32) {
    %c0_i32 = arith.constant 0 : i32
    %c0_i32_0 = arith.constant 0 : i32
    %c0_i32_1 = arith.constant 0 : i32
    %c0_i32_2 = arith.constant 0 : i32
    return %arg0, %c0_i32, %c0_i32_0, %c0_i32_1 : i32, i32, i32, i32
  }
  func.func @transform_1(%arg0: i32) -> (i32, i32, i32, i32) {
    %c0_i32 = arith.constant 0 : i32
    %c0_i32_0 = arith.constant 0 : i32
    %c0_i32_1 = arith.constant 0 : i32
    %c0_i32_2 = arith.constant 0 : i32
    %c0_i32_3 = arith.constant 0 : i32
    return %c0_i32, %c0_i32_0, %c0_i32_1, %c0_i32_2 : i32, i32, i32, i32
  }
  func.func @transform_2(%arg0: i32) -> (i32, i32) {
    %c0_i32 = arith.constant 0 : i32
    %c0_i32_0 = arith.constant 0 : i32
    %c0_i32_1 = arith.constant 0 : i32
    return %c0_i32, %c0_i32_0 : i32, i32
  }
  func.func @transform_3(%arg0: i32) -> (i32, i32, i32, i32) {
    %c0_i32 = arith.constant 0 : i32
    %c0_i32_0 = arith.constant 0 : i32
    %c0_i32_1 = arith.constant 0 : i32
    %c0_i32_2 = arith.constant 0 : i32
    %c0_i32_3 = arith.constant 0 : i32
    return %c0_i32, %c0_i32_0, %c0_i32_1, %c0_i32_2 : i32, i32, i32, i32
  }
  func.func @transform_4(%arg0: i32) -> (i32, i32) {
    %c0_i32 = arith.constant 0 : i32
    %c0_i32_0 = arith.constant 0 : i32
    %c0_i32_1 = arith.constant 0 : i32
    return %c0_i32, %c0_i32_0 : i32, i32
  }
  func.func @transform_5(%arg0: i32) -> (i32, i32, i32, i32) {
    %c0_i32 = arith.constant 0 : i32
    %c0_i32_0 = arith.constant 0 : i32
    %c0_i32_1 = arith.constant 0 : i32
    %c0_i32_2 = arith.constant 0 : i32
    return %arg0, %c0_i32, %c0_i32_0, %c0_i32_1 : i32, i32, i32, i32
  }
}

</mosaic_0001>

<bundles_post_ra>
// kernel: basic_block_forward.1
= control target key start
LH: loop header
LB: loop body
LE: loop exit
PB: predicated region body
PF: predicated region fallthrough
CT: control target
= control target key end

     0   :  { %s10334_s18 = smov 0   ;;  %s12098_s0 = inlined_call_operand.vmem [shape: f32[2,16,16,128], index: 0, kind: input, shape index: {}]   ;;  %s12099_s1 = inlined_call_operand.vmem [shape: bf16[3,3,128,128], index: 1, kind: input, shape index: {}]   ;;  %s12100_s2 = inlined_call_operand.vmem [shape: f32[1,128], index: 2, kind: input, shape index: {}]   ;;  %s12101_s3 = inlined_call_operand.vmem [shape: bf16[3,3,128,128], index: 3, kind: input, shape index: {}]   ;;  %s12102_s4 = inlined_call_operand.vmem [shape: f32[1,128], index: 4, kind: input, shape index: {}]   ;;  %s12103_s5 = inlined_call_operand.vmem [shape: f32[2,16,16,128], index: 5, kind: output, shape index: {}]  }
   0x1 LB: > { %s7273_s19 = sadd.s32 4294967295, %s10300_s18   ;;  %p7277_p0 = scmp.ge.s32.totalorder %s10300_s18, 1  ;;  %s10300_s18 = sphi %s10334_s18, %s15_s18  }
   0x2   : > { %p187_p1 = scmp.lt.s32.totalorder %s10300_s18, 3 }
   0x4   : > { %p188_p2 = pnand %p7277_p0, %p187_p1 }
   0x6   : > { %191 = sbr.rel (%p188_p2) target bundleno = 1573 (0x625), region = 40 }
   0xd   : > { %v10150_v0 = vld [vmem:[%s12099_s1] sm:$0xff]   ;;  %v10151_v1 = vld [vmem:[%s12099_s1 + $0x8] sm:$0xff]   ;;  %v12104_v2 = vmov 0   ;;  %p215_p3 = scmp.lt.s32.totalorder %s7273_s19, 1  ;;  %v10152_v3 = vld [vmem:[%s12099_s1 + $0x10] sm:$0xff]   ;;  %vm377_vm0 = vcmask 1040384  }
   0xe   : > { %8780 = vmatprep.mubr.bf16.mxu0 %v12104_v2  ;;  %9212 = vmatprep.mubr.bf16.mxu1 %v12104_v2  ;;  %v10153_v4 = vld [vmem:[%s12099_s1 + $0x18] sm:$0xff]   ;;  %v10154_v8 = vld [vmem:[%s12099_s1 + $0x20] sm:$0xff]   ;;  %v10155_v15 = vld [vmem:[%s12099_s1 + $0x28] sm:$0xff]   ;;  %vm507_vm2 = vcmask 1046528   ;;  %vm10303_vm3 = vmmov 1  }
   0xf   : > { %8764 = vmatprep.subr.bf16.mxu0 %v10150_v0  ;;  %s12151_s19 = smov (!%p215_p3, %s7273_s19), 1  ;;  %v10156_v30 = vld [vmem:[%s12099_s1 + $0x30] sm:$0xff]   ;;  %v10157_v45 = vld [vmem:[%s12099_s1 + $0x38] sm:$0xff]   ;;  %vm10497_vm1 = vmneg %vm377_vm0 }
  0x10   : > { %8765 = vmatpush3.bf16.msra.mxu0 %v10150_v0  ;;  %s7686_s26 = sshll.u32 %s12151_s19, 8  ;;  %v10158_v62 = vld [vmem:[%s12099_s1 + $0x40] sm:$0xff]   ;;  %vm10559_vm4 = vmpackc.low %vm10303_vm3, %vm10497_vm1 }
  0x11   : > { %8766 = vmatprep.subr.bf16.mxu0 %v10151_v1  ;;  %s10361_s29 = scalar_lea.vmem %s12098_s0, %s7686_s26  ;;  %vm10845_vm5 = vmpackc.low %vm507_vm2, %vm10303_vm3  ;;  %s12004_s22 = scalar_lea.vmem %s12103_s5, %s7686_s26 }
  0x12   : > { %v10367_v5 = vld [vmem:[%s10361_s29] sm:$0xff]  ;;  %v10370_v6 = vld [vmem:[%s10361_s29 + $0x8] sm:$0xff]  ;;  %v10380_v9 = vld [vmem:[%s10361_s29 + $0x10] sm:$0xff] }
  0x13   : > { %v10374_v7 = vpack.c.bf16 %v10370_v6, %v10367_v5  ;;  %v10383_v10 = vld [vmem:[%s10361_s29 + $0x18] sm:$0xff]  ;;  %v10386_v11 = vld [vmem:[%s10361_s29 + $0x20] sm:$0xff]  ;;  %v10389_v12 = vld [vmem:[%s10361_s29 + $0x28] sm:$0xff]  ;;  %v378_v39 = vrot.slane %v10367_v5, 7  ;;  %v379_v40 = vrot.slane %v10370_v6, 7  ;;  %v381_v47 = vrot.slane %v10380_v9, 7 }
  0x14   : > { %8767 = vmatpush3.bf16.msra.mxu0 %v10151_v1  ;;  %v10393_v13 = vpack.c.bf16 %v10383_v10, %v10380_v9  ;;  %v10397_v14 = vpack.c.bf16 %v10389_v12, %v10386_v11  ;;  %v10403_v16 = vld [vmem:[%s10361_s29 + $0x30] sm:$0xff]  ;;  %v10406_v17 = vld [vmem:[%s10361_s29 + $0x38] sm:$0xff]  ;;  %v10409_v18 = vld [vmem:[%s10361_s29 + $0x40] sm:$0xff]  ;;  %v382_v48 = vrot.slane %v10383_v10, 7  ;;  %v508_v52 = vrot.slane %v10367_v5, 1 }
  0x15   : > { %8768 = vmatprep.subr.bf16.mxu0 %v10152_v3  ;;  %v10412_v19 = vld [vmem:[%s10361_s29 + $0x48] sm:$0xff]  ;;  %v10415_v20 = vld [vmem:[%s10361_s29 + $0x50] sm:$0xff]  ;;  %v10418_v21 = vld [vmem:[%s10361_s29 + $0x58] sm:$0xff]  ;;  %v10425_v23 = vpack.c.bf16 %v10406_v17, %v10403_v16  ;;  %v509_v53 = vrot.slane %v10370_v6, 1  ;;  %v384_v54 = vrot.slane %v10386_v11, 7  ;;  %v380_v59 = vsel %vm377_vm0, %v378_v39, %v379_v40 }
  0x16   : > { %v10421_v22 = vld [vmem:[%s10361_s29 + $0x60] sm:$0xff]  ;;  %v10429_v24 = vpack.c.bf16 %v10412_v19, %v10409_v18  ;;  %v10432_v25 = vld [vmem:[%s10361_s29 + $0x68] sm:$0xff]  ;;  %v10435_v26 = vld [vmem:[%s10361_s29 + $0x70] sm:$0xff]  ;;  %v10442_v28 = vpack.c.bf16 %v10418_v21, %v10415_v20  ;;  %v385_v60 = vrot.slane %v10389_v12, 7  ;;  %v383_v63 = vsel %vm377_vm0, %v381_v47, %v382_v48 }
  0x17   : > { %v10438_v27 = vld [vmem:[%s10361_s29 + $0x78] sm:$0xff]  ;;  %v10446_v29 = vpack.c.bf16 %v10432_v25, %v10421_v22  ;;  %v10456_v32 = vld [vmem:[%s10361_s29 + $0x80] sm:$0xff]  ;;  %v10459_v33 = vld [vmem:[%s10361_s29 + $0x88] sm:$0xff]  ;;  %v387_v0 = vrot.slane %v10403_v16, 7  ;;  %v10548_v5 = vpack.c.bf16 %v380_v59, %v378_v39  ;;  %v10563_v39 = vpack.c.bf16 %v383_v63, %v381_v47 }
  0x18   : > { %8769 = vmatpush3.bf16.msra.mxu0 %v10152_v3  ;;  %v10453_v31 = vpack.c.bf16 %v10438_v27, %v10435_v26  ;;  %v10462_v34 = vld [vmem:[%s10361_s29 + $0x90] sm:$0xff]  ;;  %v10465_v35 = vld [vmem:[%s10361_s29 + $0x98] sm:$0xff]  ;;  %v10468_v36 = vld [vmem:[%s10361_s29 + $0xa0] sm:$0xff]  ;;  %v10472_v37 = vpack.c.bf16 %v10459_v33, %v10456_v32  ;;  %v393_v48 = vrot.slane %v10415_v20, 7  ;;  %v394_v59 = vrot.slane %v10418_v21, 7 }
  0x19   : > { %8770 = vmatprep.subr.bf16.mxu0 %v10153_v4  ;;  %v10475_v38 = vld [vmem:[%s10361_s29 + $0xa8] sm:$0xff]  ;;  %v10480_v41 = vld [vmem:[%s10361_s29 + $0xb0] sm:$0xff]  ;;  %v10483_v42 = vld [vmem:[%s10361_s29 + $0xb8] sm:$0xff]  ;;  %v10487_v43 = vpack.c.bf16 %v10465_v35, %v10462_v34  ;;  %12122 = vst [vmem:[#allocation6_spill] sm:$0xff] %v10548_v5  ;;  %v514_v63 = vrot.slane %v10386_v11, 1 }
  0x1a   : > { %v10491_v44 = vpack.c.bf16 %v10475_v38, %v10468_v36  ;;  %v10505_v49 = vpack.c.bf16 %v10483_v42, %v10480_v41  ;;  %v10508_v50 = vld [vmem:[%s10361_s29 + $0xc0] sm:$0xff]  ;;  %v10511_v51 = vld [vmem:[%s10361_s29 + $0xc8] sm:$0xff]  ;;  %v10517_v55 = vld [vmem:[%s10361_s29 + $0xd0] sm:$0xff]  ;;  %12125 = vst [vmem:[#allocation7_spill] sm:$0xff] %v10563_v39 }
  0x1b   : > { %v10520_v56 = vld [vmem:[%s10361_s29 + $0xd8] sm:$0xff]  ;;  %v10523_v57 = vld [vmem:[%s10361_s29 + $0xe0] sm:$0xff]  ;;  %v10527_v58 = vpack.c.bf16 %v10511_v51, %v10508_v50  ;;  %v10532_v61 = vld [vmem:[%s10361_s29 + $0xe8] sm:$0xff] }
  0x1c   : > { %8771 = vmatpush3.bf16.msra.mxu0 %v10153_v4  ;;  %v10541_v1 = vpack.c.bf16 %v10520_v56, %v10517_v55  ;;  %v10545_v3 = vpack.c.bf16 %v10532_v61, %v10523_v57  ;;  %v388_v4 = vrot.slane %v10406_v17, 7  ;;  %v10159_v6 = vld [vmem:[%s12099_s1 + $0x48] sm:$0xff]   ;;  %v10160_v47 = vld [vmem:[%s12099_s1 + $0x50] sm:$0xff]   ;;  %v10289_v40 = vld [vmem:[%s12101_s3 + $0x218] sm:$0xff]  }
  0x1d   : > { %8772 = vmatprep.subr.bf16.mxu0 %v10154_v8 }
  0x1e   : > { %12120 = vst [vmem:[#allocation4_spill] sm:$0xff] %v10541_v1  ;;  %12121 = vst [vmem:[#allocation5_spill] sm:$0xff] %v10545_v3  ;;  %v400_v3 = vrot.slane %v10438_v27, 7  ;;  %v389_v46 = vsel %vm377_vm0, %v387_v0, %v388_v4  ;;  %v408_v1 = vrot.slane %v10468_v36, 7  ;;  %v10161_v4 = vld [vmem:[%s12099_s1 + $0x58] sm:$0xff]  }
  0x20   : > { %8773 = vmatpush3.bf16.msra.mxu0 %v10154_v8  ;;  %v390_v8 = vrot.slane %v10409_v18, 7 }
  0x21   : > { %8774 = vmatprep.subr.bf16.mxu0 %v10155_v15 }
  0x24   : > { %8775 = vmatpush3.bf16.msra.mxu0 %v10155_v15  ;;  %v391_v15 = vrot.slane %v10412_v19, 7 }
  0x25   : > { %8776 = vmatprep.subr.bf16.mxu0 %v10156_v30 }
  0x28   : > { %8777 = vmatpush3.bf16.msra.mxu0 %v10156_v30  ;;  %v510_v30 = vsel %vm507_vm2, %v508_v52, %v509_v53 }
  0x29   : > { %8778 = vmatprep.subr.bf16.mxu0 %v10157_v45  ;;  %v10567_v2 = vpack.c.bf16 %v509_v53, %v510_v30  ;;  %v386_v30 = vsel %vm377_vm0, %v384_v54, %v385_v60  ;;  %v512_v53 = vrot.slane %v10383_v10, 1  ;;  %v10601_v10 = vpack.c.bf16 %v389_v46, %v387_v0 }
  0x2a   : > { %v10594_v60 = vpack.c.bf16 %v386_v30, %v384_v54  ;;  %v10162_v54 = vld [vmem:[%s12099_s1 + $0x60] sm:$0xff]   ;;  %v517_v0 = vrot.slane %v10403_v16, 1  ;;  %v520_v46 = vrot.slane %v10409_v18, 1  ;;  %v395_v30 = vsel %vm377_vm0, %v393_v48, %v394_v59 }
  0x2b   : > { %12126 = vst [vmem:[#allocation8_spill] sm:$0xff] %v10567_v2  ;;  %v406_v2 = vrot.slane %v10465_v35, 7  ;;  %v10635_v18 = vpack.c.bf16 %v395_v30, %v393_v48  ;;  %v523_v59 = vrot.slane %v10415_v20, 1  ;;  %v12127_v48 = vrot.slane %v10421_v22, 7 }
  0x2c   : > { %8779 = vmatpush3.bf16.msra.mxu0 %v10157_v45  ;;  %v397_v45 = vrot.slane %v10432_v25, 7 }
  0x2d   : > { %8812 = vmatprep.subr.bf16.mxu0 %v10158_v62 }
  0x2f   : > { %8781 = vmatmul.mubr.msk.bf16.vlgmr.msra.gmra.mrb[0].mxu0 %vm10559_vm4, %v10548_v5  ;;  %v511_v5 = vrot.slane %v10380_v9, 1 }
  0x30   : > { %8813 = vmatpush3.bf16.msra.mxu0 %v10158_v62  ;;  %8784 = vmatprep.mubr.msk.bf16.mxu0 %vm10559_vm4, %v10563_v39  ;;  %v515_v62 = vrot.slane %v10389_v12, 1  ;;  %v409_v39 = vrot.slane %v10475_v38, 7 }
  0x31   : > { %8814 = vmatprep.subr.bf16.mxu0 %v10159_v6  ;;  %v513_v9 = vsel %vm507_vm2, %v511_v5, %v512_v53  ;;  %v411_v5 = vrot.slane %v10480_v41, 7 }
  0x32   : > { %v516_v52 = vsel %vm507_vm2, %v514_v63, %v515_v62  ;;  %v10603_v11 = vpack.c.bf16 %v512_v53, %v513_v9  ;;  %v412_v63 = vrot.slane %v10483_v42, 7  ;;  %v521_v53 = vrot.slane %v10412_v19, 1 }
  0x33   : > { %v10605_v12 = vpack.c.bf16 %v515_v62, %v516_v52  ;;  %v392_v52 = vsel %vm377_vm0, %v390_v8, %v391_v15  ;;  %v10163_v15 = vld [vmem:[%s12099_s1 + $0x68] sm:$0xff]   ;;  %v414_v19 = vrot.slane %v10508_v50, 7 }
  0x34   : > { %8815 = vmatpush3.bf16.msra.mxu0 %v10159_v6  ;;  %v518_v6 = vrot.slane %v10406_v17, 1  ;;  %v522_v16 = vsel %vm507_vm2, %v520_v46, %v521_v53  ;;  %v10628_v17 = vpack.c.bf16 %v392_v52, %v390_v8  ;;  %v10164_v8 = vld [vmem:[%s12099_s1 + $0x70] sm:$0xff]   ;;  %v527_v52 = vrot.slane %v10432_v25, 1 }
  0x35   : > { %8816 = vmatprep.subr.bf16.mxu0 %v10160_v47  ;;  %v12128_v46 = vrot.slane %v10435_v26, 7 }
  0x36   : > { %v519_v62 = vsel %vm507_vm2, %v517_v0, %v518_v6  ;;  %v524_v0 = vrot.slane %v10418_v21, 1 }
  0x37   : > { %8785 = vmatmul.mubr.msk.bf16.gmra.mrb[4].mxu0 %vm10559_vm4, %v10594_v60  ;;  %v10625_v9 = vpack.c.bf16 %v518_v6, %v519_v62  ;;  %v526_v6 = vrot.slane %v10421_v22, 1  ;;  %v12129_v62 = vmov %v12127_v48  ;;  %v415_v22 = vrot.slane %v10511_v51, 7 }
  0x38   : > { %8788 = vmatprep.mubr.msk.bf16.mxu0 %vm10559_vm4, %v10601_v10  ;;  %8817 = vmatpush3.bf16.msra.mxu0 %v10160_v47  ;;  %v10633_v47 = vpack.c.bf16 %v521_v53, %v522_v16  ;;  %v401_v53 = vsel %vm377_vm0, %v12128_v46, %v400_v3  ;;  %v525_v20 = vsel %vm507_vm2, %v523_v59, %v524_v0  ;;  %v10681_v59 = vld [vmem:[%s12099_s1 + $0x80] sm:$0xff]  }
  0x39   : > { %8818 = vmatprep.subr.bf16.mxu0 %v10161_v4  ;;  %v10658_v21 = vpack.c.bf16 %v524_v0, %v525_v20  ;;  %v528_v30 = vsel %vm507_vm2, %v526_v6, %v527_v52  ;;  %v529_v0 = vrot.slane %v10435_v26, 1  ;;  %v12133_v26 = vrot.slane %v10462_v34, 7 }
  0x3a   : > { %v10668_v25 = vpack.c.bf16 %v527_v52, %v528_v30  ;;  %v532_v52 = vrot.slane %v10456_v32, 1 }
  0x3c   : > { %8819 = vmatpush3.bf16.msra.mxu0 %v10161_v4  ;;  %v398_v4 = vsel %vm377_vm0, %v12127_v48, %v397_v45  ;;  %v10165_v45 = vld [vmem:[%s12099_s1 + $0x78] sm:$0xff]   ;;  %v530_v48 = vrot.slane %v10438_v27, 1  ;;  %v407_v27 = vsel %vm377_vm0, %v12133_v26, %v406_v2  ;;  %v417_v2 = vrot.slane %v10517_v55, 7 }
  0x3d   : > { %8820 = vmatprep.subr.bf16.mxu0 %v10162_v54  ;;  %v10663_v16 = vpack.c.bf16 %v398_v4, %v12129_v62  ;;  %v12132_v4 = vrot.slane %v10456_v32, 7  ;;  %v535_v32 = vrot.slane %v10462_v34, 1  ;;  %v413_v34 = vsel %vm377_vm0, %v411_v5, %v412_v63 }
  0x3e   : > { %v420_v63 = vrot.slane %v10523_v57, 7 }
  0x3f   : > { %8789 = vmatmul.mubr.msk.bf16.gmra.mrb[8].mxu0 %vm10559_vm4, %v10628_v17  ;;  %v12134_v62 = vmov %v12132_v4 }
  0x40   : > { %8792 = vmatprep.mubr.msk.bf16.mxu0 %vm10559_vm4, %v10635_v18  ;;  %8821 = vmatpush3.bf16.msra.mxu0 %v10162_v54  ;;  %v12130_v54 = vmov %v12128_v46  ;;  %v533_v46 = vrot.slane %v10459_v33, 1 }
  0x41   : > { %8822 = vmatprep.subr.bf16.mxu0 %v10163_v15  ;;  %v10672_v3 = vpack.c.bf16 %v401_v53, %v12130_v54  ;;  %v531_v53 = vsel %vm507_vm2, %v529_v0, %v530_v48  ;;  %v418_v0 = vrot.slane %v10520_v56, 7 }
  0x42   : > { %v10701_v20 = vpack.c.bf16 %v530_v48, %v531_v53  ;;  %v534_v30 = vsel %vm507_vm2, %v532_v52, %v533_v46  ;;  %v536_v48 = vrot.slane %v10465_v35, 1  ;;  %v541_v53 = vrot.slane %v10480_v41, 1 }
  0x43   : > { %v10708_v54 = vpack.c.bf16 %v533_v46, %v534_v30  ;;  %v545_v30 = vrot.slane %v10511_v51, 1  ;;  %v547_v51 = vrot.slane %v10517_v55, 1 }
  0x44   : > { %8823 = vmatpush3.bf16.msra.mxu0 %v10163_v15  ;;  %v12131_v15 = vrot.slane %v10459_v33, 7  ;;  %v12135_v33 = vmov %v12133_v26  ;;  %v537_v35 = vsel %vm507_vm2, %v535_v32, %v536_v48 }
  0x45   : > { %8824 = vmatprep.subr.bf16.mxu0 %v10164_v8  ;;  %v10738_v52 = vpack.c.bf16 %v536_v48, %v537_v35  ;;  %v10169_v35 = vld [vmem:[%s12099_s1 + $0x98] sm:$0xff]  }
  0x46   : > { %v404_v6 = vsel %vm377_vm0, %v12132_v4, %v12131_v15  ;;  %v10712_v15 = vpack.c.bf16 %v407_v27, %v12135_v33  ;;  %v538_v4 = vrot.slane %v10468_v36, 1  ;;  %v421_v27 = vrot.slane %v10532_v61, 7 }
  0x47   : > { %8793 = vmatmul.mubr.msk.bf16.gmra.mrb[12].mxu0 %vm10559_vm4, %v10663_v16  ;;  %v542_v36 = vrot.slane %v10483_v42, 1 }
  0x48   : > { %8796 = vmatprep.mubr.msk.bf16.mxu0 %vm10559_vm4, %v10672_v3  ;;  %8825 = vmatpush3.bf16.msra.mxu0 %v10164_v8  ;;  %v10706_v8 = vpack.c.bf16 %v404_v6, %v12134_v62  ;;  %v539_v6 = vrot.slane %v10475_v38, 1  ;;  %v10749_v38 = vpack.c.bf16 %v413_v34, %v411_v5  ;;  %v544_v5 = vrot.slane %v10508_v50, 1 }
  0x49   : > { %8826 = vmatprep.subr.bf16.mxu0 %v10165_v45  ;;  %v419_v62 = vsel %vm377_vm0, %v417_v2, %v418_v0  ;;  %v543_v33 = vsel %vm507_vm2, %v541_v53, %v542_v36  ;;  %v422_v50 = vsel %vm377_vm0, %v420_v63, %v421_v27  ;;  %v551_v0 = vrot.slane %v10532_v61, 1  ;;  %v10168_v61 = vld [vmem:[%s12099_s1 + $0x90] sm:$0xff]   ;;  %v10173_v27 = vld [vmem:[%s12099_s1 + $0xb8] sm:$0xff]   ;;  %v10174_v53 = vld [vmem:[%s12099_s1 + $0xc0] sm:$0xff]  }
  0x4a   : > { %v540_v46 = vsel %vm507_vm2, %v538_v4, %v539_v6  ;;  %v10768_v32 = vpack.c.bf16 %v542_v36, %v543_v33  ;;  %v546_v41 = vsel %vm507_vm2, %v544_v5, %v545_v30  ;;  %v10794_v34 = vpack.c.bf16 %v422_v50, %v420_v63  ;;  %v10172_v63 = vld [vmem:[%s12099_s1 + $0xb0] sm:$0xff]   ;;  %v12137_v36 = vld [vmem:[#allocation4_spill] sm:$0xff] }
  0x4b   : > { %v10775_v48 = vpack.c.bf16 %v545_v30, %v546_v41  ;;  %v10175_v30 = vld [vmem:[%s12099_s1 + $0xc8] sm:$0xff]   ;;  %v10176_v33 = vld [vmem:[%s12099_s1 + $0xd0] sm:$0xff]   ;;  %v10177_v41 = vld [vmem:[%s12099_s1 + $0xd8] sm:$0xff]  }
  0x4c   : > { %8827 = vmatpush3.bf16.msra.mxu0 %v10165_v45  ;;  %v410_v45 = vsel %vm377_vm0, %v408_v1, %v409_v39  ;;  %v10745_v39 = vpack.c.bf16 %v539_v6, %v540_v46  ;;  %v10170_v46 = vld [vmem:[%s12099_s1 + $0xa0] sm:$0xff]   ;;  %v10180_v50 = vld [vmem:[%s12099_s1 + $0xf0] sm:$0xff]  }
  0x4d   : > { %8860 = vmatprep.subr.bf16.mxu0 %v10681_v59  ;;  %v10743_v26 = vpack.c.bf16 %v410_v45, %v408_v1  ;;  %v416_v1 = vsel %vm377_vm0, %v414_v19, %v415_v22  ;;  %v10777_v45 = vpack.c.bf16 %v419_v62, %v417_v2  ;;  %v548_v22 = vrot.slane %v10520_v56, 1  ;;  %v12141_v62 = vld [vmem:[#allocation8_spill] sm:$0xff] }
  0x4e   : > { %v10773_v42 = vpack.c.bf16 %v416_v1, %v414_v19  ;;  %v550_v19 = vrot.slane %v10523_v57, 1  ;;  %v12136_v56 = vmov 0   ;;  %v10167_v57 = vld [vmem:[%s12099_s1 + $0x88] sm:$0xff]  }
  0x4f   : > { %8797 = vmatmul.mubr.msk.bf16.gmra.mrb[16].mxu0 %vm10559_vm4, %v10706_v8  ;;  %v549_v2 = vsel %vm507_vm2, %v547_v51, %v548_v22  ;;  %v12138_v1 = vld [vmem:[#allocation5_spill] sm:$0xff]  ;;  %v10178_v51 = vld [vmem:[%s12099_s1 + $0xe0] sm:$0xff]  }
  0x50   : > { %8800 = vmatprep.mubr.msk.bf16.mxu0 %vm10559_vm4, %v10712_v15  ;;  %v10791_v4 = vpack.c.bf16 %v548_v22, %v549_v2  ;;  %v552_v6 = vsel %vm507_vm2, %v550_v19, %v551_v0  ;;  %v10179_v22 = vld [vmem:[%s12099_s1 + $0xe8] sm:$0xff]   ;;  %v10181_v19 = vld [vmem:[%s12099_s1 + $0xf8] sm:$0xff]   ;;  %v12142_v2 = vld [vmem:[#allocation6_spill] sm:$0xff] }
  0x51   : > { %v10796_v55 = vpack.c.bf16 %v551_v0, %v552_v6  ;;  %v10182_v0 = vld [vmem:[%s12099_s1 + $0x100] sm:$0xff]   ;;  %v10183_v6 = vld [vmem:[%s12099_s1 + $0x108] sm:$0xff]  }
  0x57   : > { %8801 = vmatmul.mubr.msk.bf16.gmra.mrb[20].mxu0 %vm10559_vm4, %v10743_v26 }
  0x58   : > { %8804 = vmatprep.mubr.msk.bf16.mxu0 %vm10559_vm4, %v10749_v38 }
  0x5f   : > { %8805 = vmatmul.mubr.msk.bf16.gmra.mrb[24].mxu0 %vm10559_vm4, %v10773_v42 }
  0x60   : > { %8808 = vmatprep.mubr.msk.bf16.mxu0 %vm10559_vm4, %v10777_v45 }
  0x67   : > { %8809 = vmatmul.mubr.msk.bf16.gmra.mrb[28].mxu0 %vm10559_vm4, %v10794_v34 }
  0x68   : > { %8828 = vmatprep.mubr.bf16.mxu0 %v12136_v56 }
  0x6f   : > { %8829 = vmatmul.mubr.bf16.vlgmr.msra.gmra.mrb[0].mxu0 %v10374_v7 }
  0x70   : > { %8861 = vmatpush3.bf16.msra.mxu0 %v10681_v59  ;;  %8832 = vmatprep.mubr.bf16.mxu0 %v10393_v13  ;;  %v10171_v59 = vld [vmem:[%s12099_s1 + $0xa8] sm:$0xff]  }
  0x71   : > { %8862 = vmatprep.subr.bf16.mxu0 %v10167_v57 }
  0x74   : > { %8863 = vmatpush3.bf16.msra.mxu0 %v10167_v57  ;;  %v12143_v57 = vld [vmem:[#allocation7_spill] sm:$0xff] }
  0x75   : > { %8864 = vmatprep.subr.bf16.mxu0 %v10168_v61 }
  0x77   : > { %8833 = vmatmul.mubr.bf16.gmra.mrb[4].mxu0 %v10397_v14 }
  0x78   : > { %8836 = vmatprep.mubr.bf16.mxu0 %v10425_v23  ;;  %8865 = vmatpush3.bf16.msra.mxu0 %v10168_v61  ;;  %v10184_v61 = vld [vmem:[%s12099_s1 + $0x110] sm:$0xff]  }
  0x79   : > { %8866 = vmatprep.subr.bf16.mxu0 %v10169_v35 }
  0x7c   : > { %8867 = vmatpush3.bf16.msra.mxu0 %v10169_v35  ;;  %v10185_v35 = vld [vmem:[%s12099_s1 + $0x118] sm:$0xff]  }
  0x7d   : > { %8868 = vmatprep.subr.bf16.mxu0 %v10170_v46 }
  0x7f   : > { %8837 = vmatmul.mubr.bf16.gmra.mrb[8].mxu0 %v10429_v24 }
  0x80   : > { %8840 = vmatprep.mubr.bf16.mxu0 %v10442_v28  ;;  %8869 = vmatpush3.bf16.msra.mxu0 %v10170_v46  ;;  %v10186_v46 = vld [vmem:[%s12099_s1 + $0x120] sm:$0xff]  }
  0x81   : > { %8870 = vmatprep.subr.bf16.mxu0 %v10171_v59 }
  0x84   : > { %8871 = vmatpush3.bf16.msra.mxu0 %v10171_v59  ;;  %v10187_v59 = vld [vmem:[%s12099_s1 + $0x128] sm:$0xff]  }
  0x85   : > { %8872 = vmatprep.subr.bf16.mxu0 %v10172_v63 }
  0x87   : > { %8841 = vmatmul.mubr.bf16.gmra.mrb[12].mxu0 %v10446_v29 }
  0x88   : > { %8844 = vmatprep.mubr.bf16.mxu0 %v10453_v31  ;;  %8873 = vmatpush3.bf16.msra.mxu0 %v10172_v63  ;;  %v10188_v63 = vld [vmem:[%s12099_s1 + $0x130] sm:$0xff]  }
  0x89   : > { %8874 = vmatprep.subr.bf16.mxu0 %v10173_v27 }
  0x8c   : > { %8875 = vmatpush3.bf16.msra.mxu0 %v10173_v27  ;;  %v10189_v27 = vld [vmem:[%s12099_s1 + $0x138] sm:$0xff]  }
  0x8d   : > { %8908 = vmatprep.subr.bf16.mxu0 %v10174_v53 }
  0x8f   : > { %8845 = vmatmul.mubr.bf16.gmra.mrb[16].mxu0 %v10472_v37 }
  0x90   : > { %8848 = vmatprep.mubr.bf16.mxu0 %v10487_v43 }
  0x97   : > { %8849 = vmatmul.mubr.bf16.gmra.mrb[20].mxu0 %v10491_v44 }
  0x98   : > { %8852 = vmatprep.mubr.bf16.mxu0 %v10505_v49 }
  0x9f   : > { %8853 = vmatmul.mubr.bf16.gmra.mrb[24].mxu0 %v10527_v58 }
  0xa0   : > { %8856 = vmatprep.mubr.bf16.mxu0 %v12137_v36 }
  0xa7   : > { %8857 = vmatmul.mubr.bf16.gmra.mrb[28].mxu0 %v12138_v1 }
  0xa8   : > { %8876 = vmatprep.mubr.bf16.mxu0 %v12136_v56 }
  0xaf   : > { %8877 = vmatmul.mubr.msk.bf16.vlgmr.msra.gmra.mrb[0].mxu0 %vm10845_vm5, %v12141_v62 }
  0xb0   : > { %8909 = vmatpush3.bf16.msra.mxu0 %v10174_v53  ;;  %8880 = vmatprep.mubr.msk.bf16.mxu0 %vm10845_vm5, %v10603_v11  ;;  %v10190_v53 = vld [vmem:[%s12099_s1 + $0x140] sm:$0xff]  }
  0xb1   : > { %8910 = vmatprep.subr.bf16.mxu0 %v10175_v30 }
  0xb4   : > { %8911 = vmatpush3.bf16.msra.mxu0 %v10175_v30  ;;  %v10982_v30 = vld [vmem:[%s10361_s29 + $0xf0] sm:$0xff] }
  0xb5   : > { %8912 = vmatprep.subr.bf16.mxu0 %v10176_v33 }
  0xb7   : > { %8881 = vmatmul.mubr.msk.bf16.gmra.mrb[4].mxu0 %vm10845_vm5, %v10605_v12 }
  0xb8   : > { %8884 = vmatprep.mubr.msk.bf16.mxu0 %vm10845_vm5, %v10625_v9  ;;  %8913 = vmatpush3.bf16.msra.mxu0 %v10176_v33  ;;  %v10985_v33 = vld [vmem:[%s10361_s29 + $0xf8] sm:$0xff] }
  0xb9   : > { %8914 = vmatprep.subr.bf16.mxu0 %v10177_v41 }
  0xbc   : > { %8915 = vmatpush3.bf16.msra.mxu0 %v10177_v41  ;;  %v423_v41 = vrot.slane %v10982_v30, 7 }
  0xbd   : > { %8916 = vmatprep.subr.bf16.mxu0 %v10178_v51 }
  0xbf   : > { %8885 = vmatmul.mubr.msk.bf16.gmra.mrb[8].mxu0 %vm10845_vm5, %v10633_v47 }
  0xc0   : > { %8888 = vmatprep.mubr.msk.bf16.mxu0 %vm10845_vm5, %v10658_v21  ;;  %8917 = vmatpush3.bf16.msra.mxu0 %v10178_v51  ;;  %v424_v51 = vrot.slane %v10985_v33, 7 }
  0xc1   : > { %8918 = vmatprep.subr.bf16.mxu0 %v10179_v22 }
  0xc4   : > { %8919 = vmatpush3.bf16.msra.mxu0 %v10179_v22  ;;  %v425_v22 = vsel %vm377_vm0, %v423_v41, %v424_v51  ;;  %v10204_v51 = vld [vmem:[%s12099_s1 + $0x1b0] sm:$0xff]  }
  0xc5   : > { %8920 = vmatprep.subr.bf16.mxu0 %v10180_v50 }
  0xc7   : > { %8889 = vmatmul.mubr.msk.bf16.gmra.mrb[12].mxu0 %vm10845_vm5, %v10668_v25 }
  0xc8   : > { %8892 = vmatprep.mubr.msk.bf16.mxu0 %vm10845_vm5, %v10701_v20  ;;  %8921 = vmatpush3.bf16.msra.mxu0 %v10180_v50  ;;  %v10996_v50 = vpack.c.bf16 %v425_v22, %v423_v41  ;;  %v10203_v41 = vld [vmem:[%s12099_s1 + $0x1a8] sm:$0xff]   ;;  %v10205_v22 = vld [vmem:[%s12099_s1 + $0x1b8] sm:$0xff]  }
  0xc9   : > { %8922 = vmatprep.subr.bf16.mxu0 %v10181_v19 }
  0xcc   : > { %8923 = vmatpush3.bf16.msra.mxu0 %v10181_v19  ;;  %v10191_v19 = vld [vmem:[%s12099_s1 + $0x148] sm:$0xff]  }
  0xcd   : > { %8956 = vmatprep.subr.bf16.mxu0 %v10182_v0 }
  0xcf   : > { %8893 = vmatmul.mubr.msk.bf16.gmra.mrb[16].mxu0 %vm10845_vm5, %v10708_v54 }
  0xd0   : > { %8896 = vmatprep.mubr.msk.bf16.mxu0 %vm10845_vm5, %v10738_v52 }
  0xd7   : > { %8897 = vmatmul.mubr.msk.bf16.gmra.mrb[20].mxu0 %vm10845_vm5, %v10745_v39 }
  0xd8   : > { %8900 = vmatprep.mubr.msk.bf16.mxu0 %vm10845_vm5, %v10768_v32 }
  0xdf   : > { %8901 = vmatmul.mubr.msk.bf16.gmra.mrb[24].mxu0 %vm10845_vm5, %v10775_v48 }
  0xe0   : > { %8904 = vmatprep.mubr.msk.bf16.mxu0 %vm10845_vm5, %v10791_v4 }
  0xe7   : > { %8905 = vmatmul.mubr.msk.bf16.gmra.mrb[28].mxu0 %vm10845_vm5, %v10796_v55 }
  0xe8   : > { %8924 = vmatprep.mubr.msk.bf16.mxu0 %vm10559_vm4, %v12142_v2  ;;  %v10194_v2 = vld [vmem:[%s12099_s1 + $0x160] sm:$0xff]  }
  0xef   : > { %8925 = vmatmul.mubr.msk.bf16.vlgmr.msra.gmra.mrb[0].mxu0 %vm10559_vm4, %v12143_v57 }
  0xf0   : > { %8957 = vmatpush3.bf16.msra.mxu0 %v10182_v0  ;;  %8928 = vmatprep.mubr.msk.bf16.mxu0 %vm10559_vm4, %v10594_v60  ;;  %v10192_v0 = vld [vmem:[%s12099_s1 + $0x150] sm:$0xff]  }
  0xf1   : > { %8958 = vmatprep.subr.bf16.mxu0 %v10183_v6 }
  0xf4   : > { %8959 = vmatpush3.bf16.msra.mxu0 %v10183_v6  ;;  %v10195_v6 = vld [vmem:[%s12099_s1 + $0x168] sm:$0xff]  }
  0xf5   : > { %8960 = vmatprep.subr.bf16.mxu0 %v10184_v61 }
  0xf7   : > { %8929 = vmatmul.mubr.msk.bf16.gmra.mrb[4].mxu0 %vm10559_vm4, %v10601_v10 }
  0xf8   : > { %8932 = vmatprep.mubr.msk.bf16.mxu0 %vm10559_vm4, %v10628_v17  ;;  %8961 = vmatpush3.bf16.msra.mxu0 %v10184_v61  ;;  %v10196_v61 = vld [vmem:[%s12099_s1 + $0x170] sm:$0xff]  }
  0xf9   : > { %8962 = vmatprep.subr.bf16.mxu0 %v10185_v35 }
  0xfc   : > { %8963 = vmatpush3.bf16.msra.mxu0 %v10185_v35  ;;  %v10197_v35 = vld [vmem:[%s12099_s1 + $0x178] sm:$0xff]  }
  0xfd   : > { %8964 = vmatprep.subr.bf16.mxu0 %v10186_v46 }
  0xff   : > { %8933 = vmatmul.mubr.msk.bf16.gmra.mrb[8].mxu0 %vm10559_vm4, %v10635_v18 }
 0x100   : > { %8936 = vmatprep.mubr.msk.bf16.mxu0 %vm10559_vm4, %v10663_v16  ;;  %8965 = vmatpush3.bf16.msra.mxu0 %v10186_v46  ;;  %v10198_v46 = vld [vmem:[%s12099_s1 + $0x180] sm:$0xff]  }
 0x101   : > { %8966 = vmatprep.subr.bf16.mxu0 %v10187_v59 }
 0x104   : > { %8967 = vmatpush3.bf16.msra.mxu0 %v10187_v59  ;;  %v11042_v59 = vpack.c.bf16 %v10985_v33, %v10982_v30 }
 0x105   : > { %8968 = vmatprep.subr.bf16.mxu0 %v10188_v63 }
 0x107   : > { %8937 = vmatmul.mubr.msk.bf16.gmra.mrb[12].mxu0 %vm10559_vm4, %v10672_v3 }
 0x108   : > { %8940 = vmatprep.mubr.msk.bf16.mxu0 %vm10559_vm4, %v10706_v8  ;;  %8969 = vmatpush3.bf16.msra.mxu0 %v10188_v63  ;;  %v10199_v63 = vld [vmem:[%s12099_s1 + $0x188] sm:$0xff]  }
 0x109   : > { %8970 = vmatprep.subr.bf16.mxu0 %v10189_v27 }
 0x10c   : > { %8971 = vmatpush3.bf16.msra.mxu0 %v10189_v27  ;;  %v10200_v27 = vld [vmem:[%s12099_s1 + $0x190] sm:$0xff]  }
 0x10d   : > { %9004 = vmatprep.subr.bf16.mxu0 %v10190_v53 }
 0x10f   : > { %8941 = vmatmul.mubr.msk.bf16.gmra.mrb[16].mxu0 %vm10559_vm4, %v10712_v15 }
 0x110   : > { %8944 = vmatprep.mubr.msk.bf16.mxu0 %vm10559_vm4, %v10743_v26 }
 0x117   : > { %8945 = vmatmul.mubr.msk.bf16.gmra.mrb[20].mxu0 %vm10559_vm4, %v10749_v38 }
 0x118   : > { %8948 = vmatprep.mubr.msk.bf16.mxu0 %vm10559_vm4, %v10773_v42 }
 0x11f   : > { %8949 = vmatmul.mubr.msk.bf16.gmra.mrb[24].mxu0 %vm10559_vm4, %v10777_v45 }
 0x120   : > { %8952 = vmatprep.mubr.msk.bf16.mxu0 %vm10559_vm4, %v10794_v34 }
 0x127   : > { %8953 = vmatmul.mubr.msk.bf16.gmra.mrb[28].mxu0 %vm10559_vm4, %v10996_v50 }
 0x128   : > { %8972 = vmatprep.mubr.bf16.mxu0 %v10374_v7  ;;  %v10193_v7 = vld [vmem:[%s12099_s1 + $0x158] sm:$0xff]  }
 0x12f   : > { %8973 = vmatmul.mubr.bf16.vlgmr.msra.gmra.mrb[0].mxu0 %v10393_v13 }
 0x130   : > { %9005 = vmatpush3.bf16.msra.mxu0 %v10190_v53  ;;  %8976 = vmatprep.mubr.bf16.mxu0 %v10397_v14  ;;  %v10202_v53 = vld [vmem:[%s12099_s1 + $0x1a0] sm:$0xff]  }
 0x131   : > { %9006 = vmatprep.subr.bf16.mxu0 %v10191_v19 }
 0x134   : > { %9007 = vmatpush3.bf16.msra.mxu0 %v10191_v19  ;;  %v10206_v19 = vld [vmem:[%s12099_s1 + $0x1c0] sm:$0xff]  }
 0x135   : > { %9008 = vmatprep.subr.bf16.mxu0 %v10192_v0 }
 0x137   : > { %8977 = vmatmul.mubr.bf16.gmra.mrb[4].mxu0 %v10425_v23 }
 0x138   : > { %8980 = vmatprep.mubr.bf16.mxu0 %v10429_v24  ;;  %9009 = vmatpush3.bf16.msra.mxu0 %v10192_v0  ;;  %v553_v0 = vrot.slane %v10982_v30, 1  ;;  %v10207_v30 = vld [vmem:[%s12099_s1 + $0x1c8] sm:$0xff]  }
 0x139   : > { %9010 = vmatprep.subr.bf16.mxu0 %v10193_v7 }
 0x13c   : > { %9011 = vmatpush3.bf16.msra.mxu0 %v10193_v7  ;;  %v554_v7 = vrot.slane %v10985_v33, 1  ;;  %v10208_v33 = vld [vmem:[%s12099_s1 + $0x1d0] sm:$0xff]  }
 0x13d   : > { %9012 = vmatprep.subr.bf16.mxu0 %v10194_v2 }
 0x13f   : > { %8981 = vmatmul.mubr.bf16.gmra.mrb[8].mxu0 %v10442_v28 }
 0x140   : > { %8984 = vmatprep.mubr.bf16.mxu0 %v10446_v29  ;;  %9013 = vmatpush3.bf16.msra.mxu0 %v10194_v2  ;;  %v555_v2 = vsel %vm507_vm2, %v553_v0, %v554_v7 }
 0x141   : > { %9014 = vmatprep.subr.bf16.mxu0 %v10195_v6 }
 0x144   : > { %9015 = vmatpush3.bf16.msra.mxu0 %v10195_v6  ;;  %v11117_v6 = vpack.c.bf16 %v554_v7, %v555_v2 }
 0x145   : > { %9016 = vmatprep.subr.bf16.mxu0 %v10196_v61 }
 0x147   : > { %8985 = vmatmul.mubr.bf16.gmra.mrb[12].mxu0 %v10453_v31 }
 0x148   : > { %8988 = vmatprep.mubr.bf16.mxu0 %v10472_v37  ;;  %9017 = vmatpush3.bf16.msra.mxu0 %v10196_v61 }
 0x149   : > { %9018 = vmatprep.subr.bf16.mxu0 %v10197_v35 }
 0x14c   : > { %9019 = vmatpush3.bf16.msra.mxu0 %v10197_v35 }
 0x14d   : > { %9052 = vmatprep.subr.bf16.mxu0 %v10198_v46 }
 0x14f   : > { %8989 = vmatmul.mubr.bf16.gmra.mrb[16].mxu0 %v10487_v43 }
 0x150   : > { %8992 = vmatprep.mubr.bf16.mxu0 %v10491_v44 }
 0x157   : > { %8993 = vmatmul.mubr.bf16.gmra.mrb[20].mxu0 %v10505_v49 }
 0x158   : > { %8996 = vmatprep.mubr.bf16.mxu0 %v10527_v58 }
 0x15f   : > { %8997 = vmatmul.mubr.bf16.gmra.mrb[24].mxu0 %v12137_v36 }
 0x160   : > { %9000 = vmatprep.mubr.bf16.mxu0 %v12138_v1 }
 0x167   : > { %9001 = vmatmul.mubr.bf16.gmra.mrb[28].mxu0 %v11042_v59 }
 0x168   : > { %9020 = vmatprep.mubr.msk.bf16.mxu0 %vm10845_vm5, %v12141_v62  ;;  %v10201_v62 = vld [vmem:[%s12099_s1 + $0x198] sm:$0xff]  }
 0x16f   : > { %9021 = vmatmul.mubr.msk.bf16.vlgmr.msra.gmra.mrb[0].mxu0 %vm10845_vm5, %v10603_v11 }
 0x170   : > { %9053 = vmatpush3.bf16.msra.mxu0 %v10198_v46  ;;  %9024 = vmatprep.mubr.msk.bf16.mxu0 %vm10845_vm5, %v10605_v12 }
 0x171   : > { %9054 = vmatprep.subr.bf16.mxu0 %v10199_v63 }
 0x174   : > { %9055 = vmatpush3.bf16.msra.mxu0 %v10199_v63 }
 0x175   : > { %9056 = vmatprep.subr.bf16.mxu0 %v10200_v27 }
 0x177   : > { %9025 = vmatmul.mubr.msk.bf16.gmra.mrb[4].mxu0 %vm10845_vm5, %v10625_v9 }
 0x178   : > { %9028 = vmatprep.mubr.msk.bf16.mxu0 %vm10845_vm5, %v10633_v47  ;;  %9057 = vmatpush3.bf16.msra.mxu0 %v10200_v27 }
 0x179   : > { %9058 = vmatprep.subr.bf16.mxu0 %v10201_v62 }
 0x17c   : > { %9059 = vmatpush3.bf16.msra.mxu0 %v10201_v62 }
 0x17d   : > { %9060 = vmatprep.subr.bf16.mxu0 %v10202_v53 }
 0x17f   : > { %9029 = vmatmul.mubr.msk.bf16.gmra.mrb[8].mxu0 %vm10845_vm5, %v10658_v21 }
 0x180   : > { %9032 = vmatprep.mubr.msk.bf16.mxu0 %vm10845_vm5, %v10668_v25  ;;  %9061 = vmatpush3.bf16.msra.mxu0 %v10202_v53 }
 0x181   : > { %9062 = vmatprep.subr.bf16.mxu0 %v10203_v41 }
 0x184   : > { %9063 = vmatpush3.bf16.msra.mxu0 %v10203_v41 }
 0x185   : > { %9064 = vmatprep.subr.bf16.mxu0 %v10204_v51 }
 0x187   : > { %9033 = vmatmul.mubr.msk.bf16.gmra.mrb[12].mxu0 %vm10845_vm5, %v10701_v20 }
 0x188   : > { %9036 = vmatprep.mubr.msk.bf16.mxu0 %vm10845_vm5, %v10708_v54  ;;  %9065 = vmatpush3.bf16.msra.mxu0 %v10204_v51 }
 0x189   : > { %9066 = vmatprep.subr.bf16.mxu0 %v10205_v22 }
 0x18c   : > { %9067 = vmatpush3.bf16.msra.mxu0 %v10205_v22 }
 0x18d   : > { %9100 = vmatprep.subr.bf16.mxu0 %v10206_v19 }
 0x18f   : > { %9037 = vmatmul.mubr.msk.bf16.gmra.mrb[16].mxu0 %vm10845_vm5, %v10738_v52 }
 0x190   : > { %9040 = vmatprep.mubr.msk.bf16.mxu0 %vm10845_vm5, %v10745_v39 }
 0x197   : > { %9041 = vmatmul.mubr.msk.bf16.gmra.mrb[20].mxu0 %vm10845_vm5, %v10768_v32 }
 0x198   : > { %9044 = vmatprep.mubr.msk.bf16.mxu0 %vm10845_vm5, %v10775_v48 }
 0x19f   : > { %9045 = vmatmul.mubr.msk.bf16.gmra.mrb[24].mxu0 %vm10845_vm5, %v10791_v4 }
 0x1a0   : > { %9048 = vmatprep.mubr.msk.bf16.mxu0 %vm10845_vm5, %v10796_v55 }
 0x1a7   : > { %9049 = vmatmul.mubr.msk.bf16.gmra.mrb[28].mxu0 %vm10845_vm5, %v11117_v6 }
 0x1a8   : > { %9068 = vmatprep.mubr.msk.bf16.mxu0 %vm10559_vm4, %v12143_v57  ;;  %v10209_v57 = vld [vmem:[%s12099_s1 + $0x1d8] sm:$0xff]  }
 0x1af   : > { %9069 = vmatmul.mubr.msk.bf16.vlgmr.msra.gmra.mrb[0].mxu0 %vm10559_vm4, %v10594_v60  ;;  %v10210_v60 = vld [vmem:[%s12099_s1 + $0x1e0] sm:$0xff]  }
 0x1b0   : > { %9101 = vmatpush3.bf16.msra.mxu0 %v10206_v19  ;;  %9072 = vmatprep.mubr.msk.bf16.mxu0 %vm10559_vm4, %v10601_v10  ;;  %v10211_v10 = vld [vmem:[%s12099_s1 + $0x1e8] sm:$0xff]  }
 0x1b1   : > { %9102 = vmatprep.subr.bf16.mxu0 %v10207_v30 }
 0x1b4   : > { %9103 = vmatpush3.bf16.msra.mxu0 %v10207_v30 }
 0x1b5   : > { %9104 = vmatprep.subr.bf16.mxu0 %v10208_v33 }
 0x1b7   : > { %9073 = vmatmul.mubr.msk.bf16.gmra.mrb[4].mxu0 %vm10559_vm4, %v10628_v17  ;;  %v10212_v17 = vld [vmem:[%s12099_s1 + $0x1f0] sm:$0xff]  }
 0x1b8   : > { %9076 = vmatprep.mubr.msk.bf16.mxu0 %vm10559_vm4, %v10635_v18  ;;  %9105 = vmatpush3.bf16.msra.mxu0 %v10208_v33  ;;  %v10213_v18 = vld [vmem:[%s12099_s1 + $0x1f8] sm:$0xff]   ;;  %v10231_v33 = vld [vmem:[%s12101_s3 + $0x48] sm:$0xff]  }
 0x1b9   : > { %9106 = vmatprep.subr.bf16.mxu0 %v10209_v57 }
 0x1bc   : > { %9107 = vmatpush3.bf16.msra.mxu0 %v10209_v57 }
 0x1bd   : > { %9108 = vmatprep.subr.bf16.mxu0 %v10210_v60 }
 0x1bf   : > { %9077 = vmatmul.mubr.msk.bf16.gmra.mrb[8].mxu0 %vm10559_vm4, %v10663_v16  ;;  %v10214_v16 = vld [vmem:[%s12099_s1 + $0x200] sm:$0xff]  }
 0x1c0   : > { %9080 = vmatprep.mubr.msk.bf16.mxu0 %vm10559_vm4, %v10672_v3  ;;  %9109 = vmatpush3.bf16.msra.mxu0 %v10210_v60  ;;  %v10222_v3 = vld [vmem:[%s12101_s3] sm:$0xff]  }
 0x1c1   : > { %9110 = vmatprep.subr.bf16.mxu0 %v10211_v10  ;;  %9196 = vmatprep.subr.bf16.mxu1 %v10222_v3 }
 0x1c2   : > { %9197 = vmatpush3.bf16.msra.mxu1 %v10222_v3 }
 0x1c4   : > { %9111 = vmatpush3.bf16.msra.mxu0 %v10211_v10 }
 0x1c5   : > { %9112 = vmatprep.subr.bf16.mxu0 %v10212_v17 }
 0x1c7   : > { %9081 = vmatmul.mubr.msk.bf16.gmra.mrb[12].mxu0 %vm10559_vm4, %v10706_v8  ;;  %v10223_v8 = vld [vmem:[%s12101_s3 + $0x8] sm:$0xff]  }
 0x1c8   : > { %9084 = vmatprep.mubr.msk.bf16.mxu0 %vm10559_vm4, %v10712_v15  ;;  %9113 = vmatpush3.bf16.msra.mxu0 %v10212_v17  ;;  %v10224_v15 = vld [vmem:[%s12101_s3 + $0x10] sm:$0xff]  }
 0x1c9   : > { %9114 = vmatprep.subr.bf16.mxu0 %v10213_v18  ;;  %9198 = vmatprep.subr.bf16.mxu1 %v10223_v8 }
 0x1ca   : > { %9199 = vmatpush3.bf16.msra.mxu1 %v10223_v8 }
 0x1cb   : > { %9200 = vmatprep.subr.bf16.mxu1 %v10224_v15 }
 0x1cc   : > { %9115 = vmatpush3.bf16.msra.mxu0 %v10213_v18 }
 0x1cd   : > { %9148 = vmatprep.subr.bf16.mxu0 %v10214_v16 }
 0x1ce   : > { %9201 = vmatpush3.bf16.msra.mxu1 %v10224_v15 }
 0x1cf   : > { %9085 = vmatmul.mubr.msk.bf16.gmra.mrb[16].mxu0 %vm10559_vm4, %v10743_v26  ;;  %v10215_v26 = vld [vmem:[%s12099_s1 + $0x208] sm:$0xff]  }
 0x1d0   : > { %9088 = vmatprep.mubr.msk.bf16.mxu0 %vm10559_vm4, %v10749_v38  ;;  %v10225_v38 = vld [vmem:[%s12101_s3 + $0x18] sm:$0xff]  }
 0x1d1   : > { %9202 = vmatprep.subr.bf16.mxu1 %v10225_v38 }
 0x1d2   : > { %9203 = vmatpush3.bf16.msra.mxu1 %v10225_v38  ;;  %v10232_v38 = vld [vmem:[%s12101_s3 + $0x50] sm:$0xff]  }
 0x1d7   : > { %9089 = vmatmul.mubr.msk.bf16.gmra.mrb[20].mxu0 %vm10559_vm4, %v10773_v42  ;;  %v10226_v42 = vld [vmem:[%s12101_s3 + $0x20] sm:$0xff]  }
 0x1d8   : > { %9092 = vmatprep.mubr.msk.bf16.mxu0 %vm10559_vm4, %v10777_v45  ;;  %9204 = vmatprep.subr.bf16.mxu1 %v10226_v42  ;;  %v10219_v45 = vld [vmem:[%s12099_s1 + $0x228] sm:$0xff]  }
 0x1d9   : > { %9205 = vmatpush3.bf16.msra.mxu1 %v10226_v42 }
 0x1df   : > { %9093 = vmatmul.mubr.msk.bf16.gmra.mrb[24].mxu0 %vm10559_vm4, %v10794_v34 }
 0x1e0   : > { %9096 = vmatprep.mubr.msk.bf16.mxu0 %vm10559_vm4, %v10996_v50 }
 0x1e7   : > { %9097 = vmatmul.mubr.bf16.gmra.mrb[28].mxu0 %v12136_v56 }
 0x1e8   : > { %9116 = vmatprep.mubr.bf16.mxu0 %v10393_v13  ;;  %v10216_v13 = vld [vmem:[%s12099_s1 + $0x210] sm:$0xff]  }
 0x1ef   : > { %9117 = vmatmul.mubr.bf16.vlgmr.msra.gmra.mrb[0].mxu0 %v10397_v14  ;;  %v10217_v14 = vld [vmem:[%s12099_s1 + $0x218] sm:$0xff]  }
 0x1f0   : > { %9149 = vmatpush3.bf16.msra.mxu0 %v10214_v16  ;;  %9120 = vmatprep.mubr.bf16.mxu0 %v10425_v23  ;;  %v10218_v23 = vld [vmem:[%s12099_s1 + $0x220] sm:$0xff]  }
 0x1f1   : > { %9150 = vmatprep.subr.bf16.mxu0 %v10215_v26 }
 0x1f4   : > { %9151 = vmatpush3.bf16.msra.mxu0 %v10215_v26 }
 0x1f5   : > { %9152 = vmatprep.subr.bf16.mxu0 %v10216_v13 }
 0x1f7   : > { %9121 = vmatmul.mubr.bf16.gmra.mrb[4].mxu0 %v10429_v24  ;;  %v10220_v24 = vld [vmem:[%s12099_s1 + $0x230] sm:$0xff]  }
 0x1f8   : > { %9124 = vmatprep.mubr.bf16.mxu0 %v10442_v28  ;;  %9153 = vmatpush3.bf16.msra.mxu0 %v10216_v13  ;;  %v10221_v28 = vld [vmem:[%s12099_s1 + $0x238] sm:$0xff]  }
 0x1f9   : > { %9154 = vmatprep.subr.bf16.mxu0 %v10217_v14 }
 0x1fc   : > { %9155 = vmatpush3.bf16.msra.mxu0 %v10217_v14 }
 0x1fd   : > { %9156 = vmatprep.subr.bf16.mxu0 %v10218_v23 }
 0x1ff   : > { %9125 = vmatmul.mubr.bf16.gmra.mrb[8].mxu0 %v10446_v29  ;;  %v10227_v29 = vld [vmem:[%s12101_s3 + $0x28] sm:$0xff]  }
 0x200   : > { %9128 = vmatprep.mubr.bf16.mxu0 %v10453_v31  ;;  %9157 = vmatpush3.bf16.msra.mxu0 %v10218_v23  ;;  %v10228_v31 = vld [vmem:[%s12101_s3 + $0x30] sm:$0xff]  }
 0x201   : > { %9158 = vmatprep.subr.bf16.mxu0 %v10219_v45  ;;  %9206 = vmatprep.subr.bf16.mxu1 %v10227_v29 }
 0x202   : > { %9207 = vmatpush3.bf16.msra.mxu1 %v10227_v29 }
 0x203   : > { %9208 = vmatprep.subr.bf16.mxu1 %v10228_v31 }
 0x204   : > { %9159 = vmatpush3.bf16.msra.mxu0 %v10219_v45 }
 0x205   : > { %9160 = vmatprep.subr.bf16.mxu0 %v10220_v24 }
 0x206   : > { %9209 = vmatpush3.bf16.msra.mxu1 %v10228_v31 }
 0x207   : > { %9129 = vmatmul.mubr.bf16.gmra.mrb[12].mxu0 %v10472_v37  ;;  %v10229_v37 = vld [vmem:[%s12101_s3 + $0x38] sm:$0xff]  }
 0x208   : > { %9132 = vmatprep.mubr.bf16.mxu0 %v10487_v43  ;;  %9161 = vmatpush3.bf16.msra.mxu0 %v10220_v24  ;;  %v10230_v43 = vld [vmem:[%s12101_s3 + $0x40] sm:$0xff]  }
 0x209   : > { %9162 = vmatprep.subr.bf16.mxu0 %v10221_v28  ;;  %9210 = vmatprep.subr.bf16.mxu1 %v10229_v37 }
 0x20a   : > { %9211 = vmatpush3.bf16.msra.mxu1 %v10229_v37 }
 0x20b   : > { %9244 = vmatprep.subr.bf16.mxu1 %v10230_v43 }
 0x20c   : > { %9163 = vmatpush3.bf16.msra.mxu0 %v10221_v28 }
 0x20f   : > { %9133 = vmatmul.mubr.bf16.gmra.mrb[16].mxu0 %v10491_v44  ;;  %v11305_v44 = vld [vmem:[%s12100_s2] ss:$0 sm:$0xff] }
 0x210   : > { %9136 = vmatprep.mubr.bf16.mxu0 %v10505_v49 }
 0x217   : > { %9137 = vmatmul.mubr.bf16.gmra.mrb[20].mxu0 %v10527_v58 }
 0x218   : > { %9140 = vmatprep.mubr.bf16.mxu0 %v12137_v36 }
 0x21f   : > { %9141 = vmatmul.mubr.bf16.gmra.mrb[24].mxu0 %v12138_v1 }
 0x220   : > { %9144 = vmatprep.mubr.bf16.mxu0 %v11042_v59 }
 0x227   : > { %9145 = vmatmul.mubr.bf16.gmra.mrb[28].mxu0 %v12136_v56 }
 0x228   : > { %9164 = vmatprep.mubr.msk.bf16.mxu0 %vm10845_vm5, %v10603_v11 }
 0x22f   : > { %9165 = vmatmul.mubr.msk.bf16.vlgmr.msra.gmra.mrb[0].mxu0 %vm10845_vm5, %v10605_v12 }
 0x230   : > { %9168 = vmatprep.mubr.msk.bf16.mxu0 %vm10845_vm5, %v10625_v9 }
 0x237   : > { %9169 = vmatmul.mubr.msk.bf16.gmra.mrb[4].mxu0 %vm10845_vm5, %v10633_v47 }
 0x238   : > { %9172 = vmatprep.mubr.msk.bf16.mxu0 %vm10845_vm5, %v10658_v21 }
 0x23f   : > { %9173 = vmatmul.mubr.msk.bf16.gmra.mrb[8].mxu0 %vm10845_vm5, %v10668_v25 }
 0x240   : > { %9176 = vmatprep.mubr.msk.bf16.mxu0 %vm10845_vm5, %v10701_v20 }
 0x247   : > { %9177 = vmatmul.mubr.msk.bf16.gmra.mrb[12].mxu0 %vm10845_vm5, %v10708_v54 }
 0x248   : > { %9180 = vmatprep.mubr.msk.bf16.mxu0 %vm10845_vm5, %v10738_v52 }
 0x24f   : > { %9181 = vmatmul.mubr.msk.bf16.gmra.mrb[16].mxu0 %vm10845_vm5, %v10745_v39 }
 0x250   : > { %9184 = vmatprep.mubr.msk.bf16.mxu0 %vm10845_vm5, %v10768_v32 }
 0x257   : > { %9185 = vmatmul.mubr.msk.bf16.gmra.mrb[20].mxu0 %vm10845_vm5, %v10775_v48 }
 0x258   : > { %9188 = vmatprep.mubr.msk.bf16.mxu0 %vm10845_vm5, %v10791_v4 }
 0x25f   : > { %9189 = vmatmul.mubr.msk.bf16.gmra.mrb[24].mxu0 %vm10845_vm5, %v10796_v55 }
 0x260   : > { %9192 = vmatprep.mubr.msk.bf16.mxu0 %vm10845_vm5, %v11117_v6 }
 0x267   : > { %9193 = vmatmul.mubr.bf16.gmra.mrb[28].mxu0 %v12136_v56 }
 0x302   : > { %v9166_v49 = vpop.f32.mrb[0].mxu0 }
 0x303   : > { %v3660_v58 = vadd.f32 %v9166_v49, %v11305_v44  ;;  %v3396_v11 = vpop.f32.mrb[1].mxu0 }
 0x304   : > { %v3658_v12 = vadd.f32 %v11305_v44, %v3396_v11  ;;  %v9167_v9 = vpop.f32.mrb[2].mxu0 }
 0x305   : > { %v3692_v47 = vmax.f32 %v3660_v58, 0.0  ;;  %v3661_v21 = vadd.f32 %v9167_v9, %v11305_v44  ;;  %v3399_v25 = vpop.f32.mrb[3].mxu0 }
 0x306   : > { %v3690_v20 = vmax.f32 %v3658_v12, 0.0  ;;  %v3659_v54 = vadd.f32 %v11305_v44, %v3399_v25 }
 0x307   : > { %v3693_v52 = vmax.f32 %v3661_v21, 0.0  ;;  %v3789_v39 = vrot.slane %v3692_v47, 7  ;;  %v3917_v32 = vrot.slane %v3692_v47, 1 }
 0x308   : > { %v3691_v48 = vmax.f32 %v3659_v54, 0.0  ;;  %v3786_v4 = vrot.slane %v3690_v20, 7  ;;  %v3914_v1 = vrot.slane %v3690_v20, 1 }
 0x309   : > { %v3790_v34 = vrot.slane %v3693_v52, 7  ;;  %v3918_v55 = vrot.slane %v3693_v52, 1  ;;  %v11311_v36 = vpack.c.bf16 %v3693_v52, %v3692_v47 }
 0x30a   : > { %v11313_v50 = vpack.c.bf16 %v3691_v48, %v3690_v20  ;;  %v3787_v61 = vrot.slane %v3691_v48, 7  ;;  %v3915_v35 = vrot.slane %v3691_v48, 1  ;;  %v9170_v46 = vpop.f32.mrb[4].mxu0  ;;  %v10233_v20 = vld [vmem:[%s12101_s3 + $0x58] sm:$0xff]  }
 0x30b   : > { %v3664_v59 = vadd.f32 %v9170_v46, %v11305_v44  ;;  %v3412_v63 = vpop.f32.mrb[5].mxu0  ;;  %v3791_v27 = vsel %vm377_vm0, %v3789_v39, %v3790_v34  ;;  %v3919_v62 = vsel %vm507_vm2, %v3917_v32, %v3918_v55  ;;  %v10234_v46 = vld [vmem:[%s12101_s3 + $0x60] sm:$0xff]  }
 0x30c   : > { %v3916_v53 = vsel %vm507_vm2, %v3914_v1, %v3915_v35  ;;  %v3662_v41 = vadd.f32 %v11305_v44, %v3412_v63  ;;  %v9171_v51 = vpop.f32.mrb[6].mxu0  ;;  %v3788_v22 = vsel %vm377_vm0, %v3786_v4, %v3787_v61  ;;  %v11321_v19 = vpack.c.bf16 %v3791_v27, %v3789_v39 }
 0x30d   : > { %v11323_v0 = vpack.c.bf16 %v3915_v35, %v3916_v53  ;;  %v3696_v7 = vmax.f32 %v3664_v59, 0.0  ;;  %v3665_v2 = vadd.f32 %v9171_v51, %v11305_v44  ;;  %v3415_v6 = vpop.f32.mrb[7].mxu0  ;;  %v11326_v30 = vpack.c.bf16 %v3788_v22, %v3786_v4 }
 0x30e   : > { %v3694_v57 = vmax.f32 %v3662_v41, 0.0  ;;  %v3663_v60 = vadd.f32 %v11305_v44, %v3415_v6  ;;  %v11332_v10 = vpack.c.bf16 %v3918_v55, %v3919_v62 }
 0x30f   : > { %v3697_v17 = vmax.f32 %v3665_v2, 0.0  ;;  %9213 = vmatmul.mubr.msk.bf16.vlgmr.msra.gmra.mrb[0].mxu1 %vm10559_vm4, %v11326_v30  ;;  %v3795_v18 = vrot.slane %v3696_v7, 7  ;;  %v3923_v16 = vrot.slane %v3696_v7, 1 }
 0x310   : > { %v3695_v3 = vmax.f32 %v3663_v60, 0.0  ;;  %9216 = vmatprep.mubr.msk.bf16.mxu1 %vm10559_vm4, %v11321_v19  ;;  %9245 = vmatpush3.bf16.msra.mxu1 %v10230_v43  ;;  %v3792_v8 = vrot.slane %v3694_v57, 7  ;;  %v3920_v42 = vrot.slane %v3694_v57, 1 }
 0x311   : > { %v3796_v15 = vrot.slane %v3697_v17, 7  ;;  %v3924_v26 = vrot.slane %v3697_v17, 1  ;;  %9246 = vmatprep.subr.bf16.mxu1 %v10231_v33  ;;  %v11343_v13 = vpack.c.bf16 %v3697_v17, %v3696_v7 }
 0x312   : > { %v3793_v14 = vrot.slane %v3695_v3, 7  ;;  %v3921_v23 = vrot.slane %v3695_v3, 1  ;;  %v9174_v45 = vpop.f32.mrb[8].mxu0  ;;  %v11345_v24 = vpack.c.bf16 %v3695_v3, %v3694_v57 }
 0x313   : > { %v3668_v28 = vadd.f32 %v9174_v45, %v11305_v44  ;;  %v3428_v29 = vpop.f32.mrb[9].mxu0  ;;  %v3797_v31 = vsel %vm377_vm0, %v3795_v18, %v3796_v15  ;;  %v3925_v37 = vsel %vm507_vm2, %v3923_v16, %v3924_v26  ;;  %v10235_v15 = vld [vmem:[%s12101_s3 + $0x68] sm:$0xff]  }
 0x314   : > { %v3666_v43 = vadd.f32 %v11305_v44, %v3428_v29  ;;  %v9175_v49 = vpop.f32.mrb[10].mxu0  ;;  %v3794_v58 = vsel %vm377_vm0, %v3792_v8, %v3793_v14  ;;  %v11352_v11 = vpack.c.bf16 %v3797_v31, %v3795_v18  ;;  %9247 = vmatpush3.bf16.msra.mxu1 %v10231_v33  ;;  %v3922_v12 = vsel %vm507_vm2, %v3920_v42, %v3921_v23 }
 0x315   : > { %v3700_v9 = vmax.f32 %v3668_v28, 0.0  ;;  %v3669_v47 = vadd.f32 %v9175_v49, %v11305_v44  ;;  %v3431_v21 = vpop.f32.mrb[11].mxu0  ;;  %v11356_v25 = vpack.c.bf16 %v3794_v58, %v3792_v8  ;;  %9248 = vmatprep.subr.bf16.mxu1 %v10232_v38  ;;  %v11361_v54 = vpack.c.bf16 %v3921_v23, %v3922_v12  ;;  %v10236_v49 = vld [vmem:[%s12101_s3 + $0x70] sm:$0xff]  }
 0x316   : > { %v3698_v52 = vmax.f32 %v3666_v43, 0.0  ;;  %v3667_v39 = vadd.f32 %v11305_v44, %v3431_v21  ;;  %v11364_v32 = vpack.c.bf16 %v3924_v26, %v3925_v37 }
 0x317   : > { %v3701_v48 = vmax.f32 %v3669_v47, 0.0  ;;  %9217 = vmatmul.mubr.msk.bf16.gmra.mrb[4].mxu1 %vm10559_vm4, %v11356_v25  ;;  %v3801_v4 = vrot.slane %v3700_v9, 7  ;;  %v3929_v34 = vrot.slane %v3700_v9, 1 }
 0x318   : > { %v3699_v55 = vmax.f32 %v3667_v39, 0.0  ;;  %9220 = vmatprep.mubr.msk.bf16.mxu1 %vm10559_vm4, %v11352_v11  ;;  %9249 = vmatpush3.bf16.msra.mxu1 %v10232_v38  ;;  %v3798_v1 = vrot.slane %v3698_v52, 7  ;;  %v3926_v63 = vrot.slane %v3698_v52, 1 }
 0x319   : > { %v3802_v61 = vrot.slane %v3701_v48, 7  ;;  %v3930_v35 = vrot.slane %v3701_v48, 1  ;;  %9250 = vmatprep.subr.bf16.mxu1 %v10233_v20  ;;  %v11375_v59 = vpack.c.bf16 %v3701_v48, %v3700_v9 }
 0x31a   : > { %v3799_v27 = vrot.slane %v3699_v55, 7  ;;  %v3927_v62 = vrot.slane %v3699_v55, 1  ;;  %v9178_v53 = vpop.f32.mrb[12].mxu0  ;;  %v11377_v41 = vpack.c.bf16 %v3699_v55, %v3698_v52 }
 0x31b   : > { %v3672_v51 = vadd.f32 %v9178_v53, %v11305_v44  ;;  %v3444_v22 = vpop.f32.mrb[13].mxu0  ;;  %v3803_v7 = vsel %vm377_vm0, %v3801_v4, %v3802_v61  ;;  %v3931_v2 = vsel %vm507_vm2, %v3929_v34, %v3930_v35  ;;  %v10237_v53 = vld [vmem:[%s12101_s3 + $0x78] sm:$0xff]  }
 0x31c   : > { %v3670_v6 = vadd.f32 %v11305_v44, %v3444_v22  ;;  %v9179_v33 = vpop.f32.mrb[14].mxu0  ;;  %v3800_v57 = vsel %vm377_vm0, %v3798_v1, %v3799_v27  ;;  %v11384_v60 = vpack.c.bf16 %v3803_v7, %v3801_v4  ;;  %9251 = vmatpush3.bf16.msra.mxu1 %v10233_v20  ;;  %v3928_v17 = vsel %vm507_vm2, %v3926_v63, %v3927_v62 }
 0x31d   : > { %v3704_v18 = vmax.f32 %v3672_v51, 0.0  ;;  %v3673_v16 = vadd.f32 %v9179_v33, %v11305_v44  ;;  %v3447_v3 = vpop.f32.mrb[15].mxu0  ;;  %v11388_v8 = vpack.c.bf16 %v3800_v57, %v3798_v1  ;;  %9252 = vmatprep.subr.bf16.mxu1 %v10234_v46  ;;  %v11393_v26 = vpack.c.bf16 %v3927_v62, %v3928_v17 }
 0x31e   : > { %v3702_v38 = vmax.f32 %v3670_v6, 0.0  ;;  %v3671_v42 = vadd.f32 %v11305_v44, %v3447_v3  ;;  %v11396_v14 = vpack.c.bf16 %v3930_v35, %v3931_v2 }
 0x31f   : > { %v3705_v23 = vmax.f32 %v3673_v16, 0.0  ;;  %9221 = vmatmul.mubr.msk.bf16.gmra.mrb[8].mxu1 %vm10559_vm4, %v11388_v8  ;;  %v3807_v45 = vrot.slane %v3704_v18, 7  ;;  %v3935_v28 = vrot.slane %v3704_v18, 1 }
 0x320   : > { %v3703_v29 = vmax.f32 %v3671_v42, 0.0  ;;  %9224 = vmatprep.mubr.msk.bf16.mxu1 %vm10559_vm4, %v11384_v60  ;;  %9253 = vmatpush3.bf16.msra.mxu1 %v10234_v46  ;;  %v3804_v31 = vrot.slane %v3702_v38, 7  ;;  %v3932_v12 = vrot.slane %v3702_v38, 1 }
 0x321   : > { %v3808_v37 = vrot.slane %v3705_v23, 7  ;;  %v3936_v43 = vrot.slane %v3705_v23, 1  ;;  %9254 = vmatprep.subr.bf16.mxu1 %v10235_v15  ;;  %v11407_v58 = vpack.c.bf16 %v3705_v23, %v3704_v18 }
 0x322   : > { %v3805_v9 = vrot.slane %v3703_v29, 7  ;;  %v3933_v47 = vrot.slane %v3703_v29, 1  ;;  %v9182_v21 = vpop.f32.mrb[16].mxu0  ;;  %v11409_v20 = vpack.c.bf16 %v3703_v29, %v3702_v38 }
 0x323   : > { %v3676_v52 = vadd.f32 %v9182_v21, %v11305_v44  ;;  %v3460_v39 = vpop.f32.mrb[17].mxu0  ;;  %v3809_v48 = vsel %vm377_vm0, %v3807_v45, %v3808_v37  ;;  %v3937_v4 = vsel %vm507_vm2, %v3935_v28, %v3936_v43 }
 0x324   : > { %v3674_v34 = vadd.f32 %v11305_v44, %v3460_v39  ;;  %v9183_v55 = vpop.f32.mrb[18].mxu0  ;;  %v3806_v1 = vsel %vm377_vm0, %v3804_v31, %v3805_v9  ;;  %v11416_v61 = vpack.c.bf16 %v3809_v48, %v3807_v45  ;;  %9255 = vmatpush3.bf16.msra.mxu1 %v10235_v15  ;;  %v3934_v35 = vsel %vm507_vm2, %v3932_v12, %v3933_v47  ;;  %v11439_v15 = vld [vmem:[%s12101_s3 + $0x80] sm:$0xff]  }
 0x325   : > { %v3708_v46 = vmax.f32 %v3676_v52, 0.0  ;;  %v3677_v63 = vadd.f32 %v9183_v55, %v11305_v44  ;;  %v3463_v27 = vpop.f32.mrb[19].mxu0  ;;  %v11420_v62 = vpack.c.bf16 %v3806_v1, %v3804_v31  ;;  %9256 = vmatprep.subr.bf16.mxu1 %v10236_v49  ;;  %v11425_v51 = vpack.c.bf16 %v3933_v47, %v3934_v35 }
 0x326   : > { %v3706_v22 = vmax.f32 %v3674_v34, 0.0  ;;  %v3675_v7 = vadd.f32 %v11305_v44, %v3463_v27  ;;  %v11428_v2 = vpack.c.bf16 %v3936_v43, %v3937_v4 }
 0x327   : > { %v3709_v6 = vmax.f32 %v3677_v63, 0.0  ;;  %9225 = vmatmul.mubr.msk.bf16.gmra.mrb[12].mxu1 %vm10559_vm4, %v11420_v62  ;;  %v3813_v33 = vrot.slane %v3708_v46, 7  ;;  %v3941_v57 = vrot.slane %v3708_v46, 1 }
 0x328   : > { %v3707_v17 = vmax.f32 %v3675_v7, 0.0  ;;  %9228 = vmatprep.mubr.msk.bf16.mxu1 %vm10559_vm4, %v11416_v61  ;;  %9257 = vmatpush3.bf16.msra.mxu1 %v10236_v49  ;;  %v3810_v18 = vrot.slane %v3706_v22, 7  ;;  %v3938_v42 = vrot.slane %v3706_v22, 1 }
 0x329   : > { %v3814_v16 = vrot.slane %v3709_v6, 7  ;;  %v3942_v3 = vrot.slane %v3709_v6, 1  ;;  %9258 = vmatprep.subr.bf16.mxu1 %v10237_v53  ;;  %v11441_v38 = vpack.c.bf16 %v3709_v6, %v3708_v46 }
 0x32a   : > { %v3811_v23 = vrot.slane %v3707_v17, 7  ;;  %v3939_v45 = vrot.slane %v3707_v17, 1  ;;  %v9186_v28 = vpop.f32.mrb[20].mxu0  ;;  %v11443_v29 = vpack.c.bf16 %v3707_v17, %v3706_v22 }
 0x32b   : > { %v3680_v31 = vadd.f32 %v9186_v28, %v11305_v44  ;;  %v3476_v37 = vpop.f32.mrb[21].mxu0  ;;  %v3815_v43 = vsel %vm377_vm0, %v3813_v33, %v3814_v16  ;;  %v3943_v49 = vsel %vm507_vm2, %v3941_v57, %v3942_v3 }
 0x32c   : > { %v3678_v12 = vadd.f32 %v11305_v44, %v3476_v37  ;;  %v9187_v9 = vpop.f32.mrb[22].mxu0  ;;  %v3812_v47 = vsel %vm377_vm0, %v3810_v18, %v3811_v23  ;;  %v11450_v21 = vpack.c.bf16 %v3815_v43, %v3813_v33  ;;  %9259 = vmatpush3.bf16.msra.mxu1 %v10237_v53  ;;  %v3940_v52 = vsel %vm507_vm2, %v3938_v42, %v3939_v45 }
 0x32d   : > { %v3712_v39 = vmax.f32 %v3680_v31, 0.0  ;;  %v3681_v48 = vadd.f32 %v9187_v9, %v11305_v44  ;;  %v3479_v4 = vpop.f32.mrb[23].mxu0  ;;  %v11454_v34 = vpack.c.bf16 %v3812_v47, %v3810_v18  ;;  %9292 = vmatprep.subr.bf16.mxu1 %v11439_v15  ;;  %v11457_v55 = vpack.c.bf16 %v3939_v45, %v3940_v52 }
 0x32e   : > { %v3710_v1 = vmax.f32 %v3678_v12, 0.0  ;;  %v3679_v35 = vadd.f32 %v11305_v44, %v3479_v4  ;;  %v11460_v46 = vpack.c.bf16 %v3942_v3, %v3943_v49 }
 0x32f   : > { %v3713_v63 = vmax.f32 %v3681_v48, 0.0  ;;  %9229 = vmatmul.mubr.msk.bf16.gmra.mrb[16].mxu1 %vm10559_vm4, %v11454_v34  ;;  %v3819_v27 = vrot.slane %v3712_v39, 7  ;;  %v3947_v53 = vrot.slane %v3712_v39, 1 }
 0x330   : > { %v3711_v22 = vmax.f32 %v3679_v35, 0.0  ;;  %9232 = vmatprep.mubr.msk.bf16.mxu1 %vm10559_vm4, %v11450_v21  ;;  %v3816_v7 = vrot.slane %v3710_v1, 7  ;;  %v3944_v17 = vrot.slane %v3710_v1, 1 }
 0x331   : > { %v3820_v6 = vrot.slane %v3713_v63, 7  ;;  %v3948_v33 = vrot.slane %v3713_v63, 1  ;;  %v11468_v57 = vpack.c.bf16 %v3713_v63, %v3712_v39 }
 0x332   : > { %v3817_v18 = vrot.slane %v3711_v22, 7  ;;  %v3945_v16 = vrot.slane %v3711_v22, 1  ;;  %v9190_v3 = vpop.f32.mrb[24].mxu0  ;;  %v11470_v42 = vpack.c.bf16 %v3711_v22, %v3710_v1 }
 0x333   : > { %v3684_v23 = vadd.f32 %v9190_v3, %v11305_v44  ;;  %v3492_v45 = vpop.f32.mrb[25].mxu0  ;;  %v3821_v28 = vsel %vm377_vm0, %v3819_v27, %v3820_v6  ;;  %v3949_v31 = vsel %vm507_vm2, %v3947_v53, %v3948_v33 }
 0x334   : > { %v3682_v37 = vadd.f32 %v11305_v44, %v3492_v45  ;;  %v9191_v43 = vpop.f32.mrb[26].mxu0  ;;  %v3818_v49 = vsel %vm377_vm0, %v3816_v7, %v3817_v18  ;;  %v11477_v12 = vpack.c.bf16 %v3821_v28, %v3819_v27  ;;  %v3946_v9 = vsel %vm507_vm2, %v3944_v17, %v3945_v16 }
 0x335   : > { %v3716_v47 = vmax.f32 %v3684_v23, 0.0  ;;  %v3685_v52 = vadd.f32 %v9191_v43, %v11305_v44  ;;  %v3495_v39 = vpop.f32.mrb[27].mxu0  ;;  %v11481_v48 = vpack.c.bf16 %v3818_v49, %v3816_v7  ;;  %v11483_v4 = vpack.c.bf16 %v3945_v16, %v3946_v9 }
 0x336   : > { %12144 = vst [vmem:[#allocation4_spill] sm:$0xff] %v11477_v12  ;;  %v3714_v1 = vmax.f32 %v3682_v37, 0.0  ;;  %v3683_v35 = vadd.f32 %v11305_v44, %v3495_v39  ;;  %v11486_v63 = vpack.c.bf16 %v3948_v33, %v3949_v31 }
 0x337   : > { %12145 = vst [vmem:[#allocation5_spill] sm:$0xff] %v11481_v48  ;;  %v3717_v53 = vmax.f32 %v3685_v52, 0.0  ;;  %9233 = vmatmul.mubr.msk.bf16.gmra.mrb[20].mxu1 %vm10559_vm4, %v11481_v48  ;;  %v3825_v27 = vrot.slane %v3716_v47, 7  ;;  %v3953_v22 = vrot.slane %v3716_v47, 1 }
 0x338   : > { %v3715_v6 = vmax.f32 %v3683_v35, 0.0  ;;  %9236 = vmatprep.mubr.msk.bf16.mxu1 %vm10559_vm4, %v11477_v12  ;;  %v3822_v7 = vrot.slane %v3714_v1, 7  ;;  %v3950_v3 = vrot.slane %v3714_v1, 1 }
 0x339   : > { %v3826_v17 = vrot.slane %v3717_v53, 7  ;;  %v3954_v18 = vrot.slane %v3717_v53, 1  ;;  %v11494_v16 = vpack.c.bf16 %v3717_v53, %v3716_v47 }
 0x33a   : > { %v3823_v33 = vrot.slane %v3715_v6, 7  ;;  %v3951_v23 = vrot.slane %v3715_v6, 1  ;;  %v9194_v45 = vpop.f32.mrb[28].mxu0  ;;  %v11496_v28 = vpack.c.bf16 %v3715_v6, %v3714_v1 }
 0x33b   : > { %v3688_v31 = vadd.f32 %v9194_v45, %v11305_v44  ;;  %v3508_v37 = vpop.f32.mrb[29].mxu0  ;;  %v3827_v43 = vsel %vm377_vm0, %v3825_v27, %v3826_v17  ;;  %v3955_v49 = vsel %vm507_vm2, %v3953_v22, %v3954_v18 }
 0x33c   : > { %v3686_v9 = vadd.f32 %v11305_v44, %v3508_v37  ;;  %v9195_v52 = vpop.f32.mrb[30].mxu0  ;;  %v3824_v39 = vsel %vm377_vm0, %v3822_v7, %v3823_v33  ;;  %v11503_v47 = vpack.c.bf16 %v3827_v43, %v3825_v27  ;;  %v3952_v35 = vsel %vm507_vm2, %v3950_v3, %v3951_v23 }
 0x33d   : > { %v3720_v53 = vmax.f32 %v3688_v31, 0.0  ;;  %v3689_v1 = vadd.f32 %v9195_v52, %v11305_v44  ;;  %v3511_v6 = vpop.f32.mrb[31].mxu0  ;;  %v11507_v12 = vpack.c.bf16 %v3824_v39, %v3822_v7  ;;  %v11509_v45 = vpack.c.bf16 %v3951_v23, %v3952_v35 }
 0x33e   : > { %12146 = vst [vmem:[#allocation8_spill] sm:$0xff] %v11503_v47  ;;  %v3718_v17 = vmax.f32 %v3686_v9, 0.0  ;;  %v3687_v22 = vadd.f32 %v11305_v44, %v3511_v6  ;;  %v11512_v48 = vpack.c.bf16 %v3954_v18, %v3955_v49 }
 0x33f   : > { %v3721_v37 = vmax.f32 %v3689_v1, 0.0  ;;  %9237 = vmatmul.mubr.msk.bf16.gmra.mrb[24].mxu1 %vm10559_vm4, %v11507_v12  ;;  %v3831_v27 = vrot.slane %v3720_v53, 7  ;;  %v3959_v3 = vrot.slane %v3720_v53, 1 }
 0x340   : > { %v3719_v33 = vmax.f32 %v3687_v22, 0.0  ;;  %9240 = vmatprep.mubr.msk.bf16.mxu1 %vm10559_vm4, %v11503_v47  ;;  %v3828_v7 = vrot.slane %v3718_v17, 7  ;;  %v3956_v44 = vrot.slane %v3718_v17, 1 }
 0x341   : > { %v3832_v23 = vrot.slane %v3721_v37, 7  ;;  %v3960_v31 = vrot.slane %v3721_v37, 1  ;;  %v11520_v43 = vpack.c.bf16 %v3721_v37, %v3720_v53  ;;  %v10240_v37 = vld [vmem:[%s12101_s3 + $0x90] sm:$0xff]  }
 0x342   : > { %v3829_v18 = vrot.slane %v3719_v33, 7  ;;  %v3957_v49 = vrot.slane %v3719_v33, 1  ;;  %v11522_v9 = vpack.c.bf16 %v3719_v33, %v3718_v17  ;;  %v10239_v17 = vld [vmem:[%s12101_s3 + $0x88] sm:$0xff]   ;;  %v10244_v33 = vld [vmem:[%s12101_s3 + $0xb0] sm:$0xff]  }
 0x343   : > { %v3833_v52 = vsel %vm377_vm0, %v3831_v27, %v3832_v23  ;;  %v3961_v39 = vsel %vm507_vm2, %v3959_v3, %v3960_v31  ;;  %v10243_v3 = vld [vmem:[%s12101_s3 + $0xa8] sm:$0xff]   ;;  %v10246_v23 = vld [vmem:[%s12101_s3 + $0xc0] sm:$0xff]  }
 0x344   : > { %v3830_v35 = vsel %vm377_vm0, %v3828_v7, %v3829_v18  ;;  %v3958_v1 = vsel %vm507_vm2, %v3956_v44, %v3957_v49  ;;  %v11528_v6 = vpack.c.bf16 %v3833_v52, %v3831_v27  ;;  %v11530_v22 = vpack.c.bf16 %v3960_v31, %v3961_v39  ;;  %v10241_v27 = vld [vmem:[%s12101_s3 + $0x98] sm:$0xff]   ;;  %v10247_v31 = vld [vmem:[%s12101_s3 + $0xc8] sm:$0xff]   ;;  %v10248_v44 = vld [vmem:[%s12101_s3 + $0xd0] sm:$0xff]  }
 0x345   : > { %v11532_v47 = vpack.c.bf16 %v3830_v35, %v3828_v7  ;;  %v11534_v53 = vpack.c.bf16 %v3957_v49, %v3958_v1  ;;  %v10245_v7 = vld [vmem:[%s12101_s3 + $0xb8] sm:$0xff]   ;;  %v10250_v49 = vld [vmem:[%s12101_s3 + $0xe0] sm:$0xff]   ;;  %v10251_v52 = vld [vmem:[%s12101_s3 + $0xe8] sm:$0xff]  }
 0x346   : > { %v10249_v18 = vld [vmem:[%s12101_s3 + $0xd8] sm:$0xff]   ;;  %v10252_v39 = vld [vmem:[%s12101_s3 + $0xf0] sm:$0xff]   ;;  %v10254_v1 = vld [vmem:[%s12101_s3 + $0x100] sm:$0xff]  }
 0x347   : > { %9241 = vmatmul.mubr.msk.bf16.gmra.mrb[28].mxu1 %vm10559_vm4, %v11532_v47  ;;  %v10253_v35 = vld [vmem:[%s12101_s3 + $0xf8] sm:$0xff]  }
 0x348   : > { %9260 = vmatprep.mubr.bf16.mxu1 %v12136_v56 }
 0x34f   : > { %9261 = vmatmul.mubr.bf16.vlgmr.msra.gmra.mrb[0].mxu1 %v11313_v50 }
 0x350   : > { %9264 = vmatprep.mubr.bf16.mxu1 %v11311_v36  ;;  %9293 = vmatpush3.bf16.msra.mxu1 %v11439_v15  ;;  %v10242_v15 = vld [vmem:[%s12101_s3 + $0xa0] sm:$0xff]  }
 0x351   : > { %9294 = vmatprep.subr.bf16.mxu1 %v10239_v17 }
 0x354   : > { %9295 = vmatpush3.bf16.msra.mxu1 %v10239_v17  ;;  %v10255_v17 = vld [vmem:[%s12101_s3 + $0x108] sm:$0xff]  }
 0x355   : > { %9296 = vmatprep.subr.bf16.mxu1 %v10240_v37 }
 0x357   : > { %9265 = vmatmul.mubr.bf16.gmra.mrb[4].mxu1 %v11345_v24 }
 0x358   : > { %9268 = vmatprep.mubr.bf16.mxu1 %v11343_v13  ;;  %9297 = vmatpush3.bf16.msra.mxu1 %v10240_v37  ;;  %v10256_v37 = vld [vmem:[%s12101_s3 + $0x110] sm:$0xff]  }
 0x359   : > { %9298 = vmatprep.subr.bf16.mxu1 %v10241_v27 }
 0x35c   : > { %9299 = vmatpush3.bf16.msra.mxu1 %v10241_v27  ;;  %v10258_v27 = vld [vmem:[%s12101_s3 + $0x120] sm:$0xff]  }
 0x35d   : > { %9300 = vmatprep.subr.bf16.mxu1 %v10242_v15 }
 0x35f   : > { %9269 = vmatmul.mubr.bf16.gmra.mrb[8].mxu1 %v11377_v41 }
 0x360   : > { %9272 = vmatprep.mubr.bf16.mxu1 %v11375_v59  ;;  %9301 = vmatpush3.bf16.msra.mxu1 %v10242_v15  ;;  %v10259_v15 = vld [vmem:[%s12101_s3 + $0x128] sm:$0xff]  }
 0x361   : > { %9302 = vmatprep.subr.bf16.mxu1 %v10243_v3 }
 0x364   : > { %9303 = vmatpush3.bf16.msra.mxu1 %v10243_v3  ;;  %v10260_v3 = vld [vmem:[%s12101_s3 + $0x130] sm:$0xff]  }
 0x365   : > { %9304 = vmatprep.subr.bf16.mxu1 %v10244_v33 }
 0x367   : > { %9273 = vmatmul.mubr.bf16.gmra.mrb[12].mxu1 %v11409_v20 }
 0x368   : > { %9276 = vmatprep.mubr.bf16.mxu1 %v11407_v58  ;;  %9305 = vmatpush3.bf16.msra.mxu1 %v10244_v33  ;;  %v10261_v33 = vld [vmem:[%s12101_s3 + $0x138] sm:$0xff]  }
 0x369   : > { %9306 = vmatprep.subr.bf16.mxu1 %v10245_v7 }
 0x36c   : > { %9307 = vmatpush3.bf16.msra.mxu1 %v10245_v7  ;;  %v10262_v7 = vld [vmem:[%s12101_s3 + $0x140] sm:$0xff]  }
 0x36d   : > { %9340 = vmatprep.subr.bf16.mxu1 %v10246_v23 }
 0x36f   : > { %9277 = vmatmul.mubr.bf16.gmra.mrb[16].mxu1 %v11443_v29 }
 0x370   : > { %9280 = vmatprep.mubr.bf16.mxu1 %v11441_v38 }
 0x377   : > { %9281 = vmatmul.mubr.bf16.gmra.mrb[20].mxu1 %v11470_v42 }
 0x378   : > { %9284 = vmatprep.mubr.bf16.mxu1 %v11468_v57 }
 0x37f   : > { %9285 = vmatmul.mubr.bf16.gmra.mrb[24].mxu1 %v11496_v28 }
 0x380   : > { %9288 = vmatprep.mubr.bf16.mxu1 %v11494_v16 }
 0x387   : > { %9289 = vmatmul.mubr.bf16.gmra.mrb[28].mxu1 %v11522_v9 }
 0x388   : > { %9308 = vmatprep.mubr.bf16.mxu1 %v12136_v56 }
 0x38f   : > { %9309 = vmatmul.mubr.msk.bf16.vlgmr.msra.gmra.mrb[0].mxu1 %vm10845_vm5, %v11323_v0 }
 0x390   : > { %9312 = vmatprep.mubr.msk.bf16.mxu1 %vm10845_vm5, %v11332_v10  ;;  %9341 = vmatpush3.bf16.msra.mxu1 %v10246_v23  ;;  %v12147_v23 = vld [vmem:[#allocation5_spill] sm:$0xff] }
 0x391   : > { %9342 = vmatprep.subr.bf16.mxu1 %v10247_v31 }
 0x394   : > { %9343 = vmatpush3.bf16.msra.mxu1 %v10247_v31  ;;  %v12148_v31 = vld [vmem:[#allocation4_spill] sm:$0xff] }
 0x395   : > { %9344 = vmatprep.subr.bf16.mxu1 %v10248_v44 }
 0x397   : > { %9313 = vmatmul.mubr.msk.bf16.gmra.mrb[4].mxu1 %vm10845_vm5, %v11361_v54 }
 0x398   : > { %9316 = vmatprep.mubr.msk.bf16.mxu1 %vm10845_vm5, %v11364_v32  ;;  %9345 = vmatpush3.bf16.msra.mxu1 %v10248_v44  ;;  %v12149_v44 = vld [vmem:[#allocation8_spill] sm:$0xff] }
 0x399   : > { %9346 = vmatprep.subr.bf16.mxu1 %v10249_v18 }
 0x39c   : > { %9347 = vmatpush3.bf16.msra.mxu1 %v10249_v18  ;;  %v10263_v18 = vld [vmem:[%s12101_s3 + $0x148] sm:$0xff]  }
 0x39d   : > { %9348 = vmatprep.subr.bf16.mxu1 %v10250_v49 }
 0x39f   : > { %9317 = vmatmul.mubr.msk.bf16.gmra.mrb[8].mxu1 %vm10845_vm5, %v11393_v26 }
 0x3a0   : > { %9320 = vmatprep.mubr.msk.bf16.mxu1 %vm10845_vm5, %v11396_v14  ;;  %9349 = vmatpush3.bf16.msra.mxu1 %v10250_v49  ;;  %v10264_v49 = vld [vmem:[%s12101_s3 + $0x150] sm:$0xff]  }
 0x3a1   : > { %9350 = vmatprep.subr.bf16.mxu1 %v10251_v52 }
 0x3a4   : > { %9351 = vmatpush3.bf16.msra.mxu1 %v10251_v52  ;;  %v10266_v52 = vld [vmem:[%s12101_s3 + $0x160] sm:$0xff]  }
 0x3a5   : > { %9352 = vmatprep.subr.bf16.mxu1 %v10252_v39 }
 0x3a7   : > { %9321 = vmatmul.mubr.msk.bf16.gmra.mrb[12].mxu1 %vm10845_vm5, %v11425_v51 }
 0x3a8   : > { %9324 = vmatprep.mubr.msk.bf16.mxu1 %vm10845_vm5, %v11428_v2  ;;  %9353 = vmatpush3.bf16.msra.mxu1 %v10252_v39  ;;  %v10267_v39 = vld [vmem:[%s12101_s3 + $0x168] sm:$0xff]  }
 0x3a9   : > { %9354 = vmatprep.subr.bf16.mxu1 %v10253_v35 }
 0x3ac   : > { %9355 = vmatpush3.bf16.msra.mxu1 %v10253_v35  ;;  %v10268_v35 = vld [vmem:[%s12101_s3 + $0x170] sm:$0xff]  }
 0x3ad   : > { %9388 = vmatprep.subr.bf16.mxu1 %v10254_v1 }
 0x3af   : > { %9325 = vmatmul.mubr.msk.bf16.gmra.mrb[16].mxu1 %vm10845_vm5, %v11457_v55 }
 0x3b0   : > { %9328 = vmatprep.mubr.msk.bf16.mxu1 %vm10845_vm5, %v11460_v46 }
 0x3b7   : > { %9329 = vmatmul.mubr.msk.bf16.gmra.mrb[20].mxu1 %vm10845_vm5, %v11483_v4 }
 0x3b8   : > { %9332 = vmatprep.mubr.msk.bf16.mxu1 %vm10845_vm5, %v11486_v63 }
 0x3bf   : > { %9333 = vmatmul.mubr.msk.bf16.gmra.mrb[24].mxu1 %vm10845_vm5, %v11509_v45 }
 0x3c0   : > { %9336 = vmatprep.mubr.msk.bf16.mxu1 %vm10845_vm5, %v11512_v48 }
 0x3c7   : > { %9337 = vmatmul.mubr.msk.bf16.gmra.mrb[28].mxu1 %vm10845_vm5, %v11534_v53 }
 0x3c8   : > { %9356 = vmatprep.mubr.msk.bf16.mxu1 %vm10559_vm4, %v11326_v30  ;;  %v10257_v30 = vld [vmem:[%s12101_s3 + $0x118] sm:$0xff]  }
 0x3cf   : > { %9357 = vmatmul.mubr.msk.bf16.vlgmr.msra.gmra.mrb[0].mxu1 %vm10559_vm4, %v11321_v19 }
 0x3d0   : > { %9360 = vmatprep.mubr.msk.bf16.mxu1 %vm10559_vm4, %v11356_v25  ;;  %9389 = vmatpush3.bf16.msra.mxu1 %v10254_v1  ;;  %v10269_v1 = vld [vmem:[%s12101_s3 + $0x178] sm:$0xff]  }
 0x3d1   : > { %9390 = vmatprep.subr.bf16.mxu1 %v10255_v17 }
 0x3d4   : > { %9391 = vmatpush3.bf16.msra.mxu1 %v10255_v17  ;;  %v10270_v17 = vld [vmem:[%s12101_s3 + $0x180] sm:$0xff]  }
 0x3d5   : > { %9392 = vmatprep.subr.bf16.mxu1 %v10256_v37 }
 0x3d7   : > { %9361 = vmatmul.mubr.msk.bf16.gmra.mrb[4].mxu1 %vm10559_vm4, %v11352_v11 }
 0x3d8   : > { %9364 = vmatprep.mubr.msk.bf16.mxu1 %vm10559_vm4, %v11388_v8  ;;  %9393 = vmatpush3.bf16.msra.mxu1 %v10256_v37  ;;  %v10271_v37 = vld [vmem:[%s12101_s3 + $0x188] sm:$0xff]  }
 0x3d9   : > { %9394 = vmatprep.subr.bf16.mxu1 %v10257_v30 }
 0x3dc   : > { %9395 = vmatpush3.bf16.msra.mxu1 %v10257_v30  ;;  %v10272_v30 = vld [vmem:[%s12101_s3 + $0x190] sm:$0xff]  }
 0x3dd   : > { %9396 = vmatprep.subr.bf16.mxu1 %v10258_v27 }
 0x3df   : > { %9365 = vmatmul.mubr.msk.bf16.gmra.mrb[8].mxu1 %vm10559_vm4, %v11384_v60 }
 0x3e0   : > { %9368 = vmatprep.mubr.msk.bf16.mxu1 %vm10559_vm4, %v11420_v62  ;;  %9397 = vmatpush3.bf16.msra.mxu1 %v10258_v27  ;;  %v10274_v27 = vld [vmem:[%s12101_s3 + $0x1a0] sm:$0xff]  }
 0x3e1   : > { %9398 = vmatprep.subr.bf16.mxu1 %v10259_v15 }
 0x3e4   : > { %9399 = vmatpush3.bf16.msra.mxu1 %v10259_v15  ;;  %v10275_v15 = vld [vmem:[%s12101_s3 + $0x1a8] sm:$0xff]  }
 0x3e5   : > { %9400 = vmatprep.subr.bf16.mxu1 %v10260_v3 }
 0x3e7   : > { %9369 = vmatmul.mubr.msk.bf16.gmra.mrb[12].mxu1 %vm10559_vm4, %v11416_v61 }
 0x3e8   : > { %9372 = vmatprep.mubr.msk.bf16.mxu1 %vm10559_vm4, %v11454_v34  ;;  %9401 = vmatpush3.bf16.msra.mxu1 %v10260_v3  ;;  %v10276_v3 = vld [vmem:[%s12101_s3 + $0x1b0] sm:$0xff]  }
 0x3e9   : > { %9402 = vmatprep.subr.bf16.mxu1 %v10261_v33 }
 0x3ec   : > { %9403 = vmatpush3.bf16.msra.mxu1 %v10261_v33  ;;  %v10277_v33 = vld [vmem:[%s12101_s3 + $0x1b8] sm:$0xff]  }
 0x3ed   : > { %9436 = vmatprep.subr.bf16.mxu1 %v10262_v7 }
 0x3ef   : > { %9373 = vmatmul.mubr.msk.bf16.gmra.mrb[16].mxu1 %vm10559_vm4, %v11450_v21 }
 0x3f0   : > { %9376 = vmatprep.mubr.msk.bf16.mxu1 %vm10559_vm4, %v12147_v23 }
 0x3f7   : > { %9377 = vmatmul.mubr.msk.bf16.gmra.mrb[20].mxu1 %vm10559_vm4, %v12148_v31 }
 0x3f8   : > { %9380 = vmatprep.mubr.msk.bf16.mxu1 %vm10559_vm4, %v11507_v12 }
 0x3ff   : > { %9381 = vmatmul.mubr.msk.bf16.gmra.mrb[24].mxu1 %vm10559_vm4, %v12149_v44 }
 0x400   : > { %9384 = vmatprep.mubr.msk.bf16.mxu1 %vm10559_vm4, %v11532_v47 }
 0x407   : > { %9385 = vmatmul.mubr.msk.bf16.gmra.mrb[28].mxu1 %vm10559_vm4, %v11528_v6 }
 0x408   : > { %9404 = vmatprep.mubr.bf16.mxu1 %v11313_v50  ;;  %v10265_v50 = vld [vmem:[%s12101_s3 + $0x158] sm:$0xff]  }
 0x40f   : > { %9405 = vmatmul.mubr.bf16.vlgmr.msra.gmra.mrb[0].mxu1 %v11311_v36 }
 0x410   : > { %9408 = vmatprep.mubr.bf16.mxu1 %v11345_v24  ;;  %9437 = vmatpush3.bf16.msra.mxu1 %v10262_v7  ;;  %v10278_v7 = vld [vmem:[%s12101_s3 + $0x1c0] sm:$0xff]  }
 0x411   : > { %9438 = vmatprep.subr.bf16.mxu1 %v10263_v18 }
 0x414   : > { %9439 = vmatpush3.bf16.msra.mxu1 %v10263_v18  ;;  %v10279_v18 = vld [vmem:[%s12101_s3 + $0x1c8] sm:$0xff]  }
 0x415   : > { %9440 = vmatprep.subr.bf16.mxu1 %v10264_v49 }
 0x417   : > { %9409 = vmatmul.mubr.bf16.gmra.mrb[4].mxu1 %v11343_v13 }
 0x418   : > { %9412 = vmatprep.mubr.bf16.mxu1 %v11377_v41  ;;  %9441 = vmatpush3.bf16.msra.mxu1 %v10264_v49  ;;  %v10280_v49 = vld [vmem:[%s12101_s3 + $0x1d0] sm:$0xff]  }
 0x419   : > { %9442 = vmatprep.subr.bf16.mxu1 %v10265_v50 }
 0x41c   : > { %9443 = vmatpush3.bf16.msra.mxu1 %v10265_v50 }
 0x41d   : > { %9444 = vmatprep.subr.bf16.mxu1 %v10266_v52 }
 0x41f   : > { %9413 = vmatmul.mubr.bf16.gmra.mrb[8].mxu1 %v11375_v59 }
 0x420   : > { %9416 = vmatprep.mubr.bf16.mxu1 %v11409_v20  ;;  %9445 = vmatpush3.bf16.msra.mxu1 %v10266_v52 }
 0x421   : > { %9446 = vmatprep.subr.bf16.mxu1 %v10267_v39 }
 0x424   : > { %9447 = vmatpush3.bf16.msra.mxu1 %v10267_v39 }
 0x425   : > { %9448 = vmatprep.subr.bf16.mxu1 %v10268_v35 }
 0x427   : > { %9417 = vmatmul.mubr.bf16.gmra.mrb[12].mxu1 %v11407_v58 }
 0x428   : > { %9420 = vmatprep.mubr.bf16.mxu1 %v11443_v29  ;;  %9449 = vmatpush3.bf16.msra.mxu1 %v10268_v35 }
 0x429   : > { %9450 = vmatprep.subr.bf16.mxu1 %v10269_v1 }
 0x42c   : > { %9451 = vmatpush3.bf16.msra.mxu1 %v10269_v1 }
 0x42d   : > { %9484 = vmatprep.subr.bf16.mxu1 %v10270_v17 }
 0x42f   : > { %9421 = vmatmul.mubr.bf16.gmra.mrb[16].mxu1 %v11441_v38 }
 0x430   : > { %9424 = vmatprep.mubr.bf16.mxu1 %v11470_v42 }
 0x437   : > { %9425 = vmatmul.mubr.bf16.gmra.mrb[20].mxu1 %v11468_v57 }
 0x438   : > { %9428 = vmatprep.mubr.bf16.mxu1 %v11496_v28 }
 0x43f   : > { %9429 = vmatmul.mubr.bf16.gmra.mrb[24].mxu1 %v11494_v16 }
 0x440   : > { %9432 = vmatprep.mubr.bf16.mxu1 %v11522_v9 }
 0x447   : > { %9433 = vmatmul.mubr.bf16.gmra.mrb[28].mxu1 %v11520_v43 }
 0x448   : > { %9452 = vmatprep.mubr.msk.bf16.mxu1 %vm10845_vm5, %v11323_v0  ;;  %v10273_v0 = vld [vmem:[%s12101_s3 + $0x198] sm:$0xff]  }
 0x44f   : > { %9453 = vmatmul.mubr.msk.bf16.vlgmr.msra.gmra.mrb[0].mxu1 %vm10845_vm5, %v11332_v10 }
 0x450   : > { %9456 = vmatprep.mubr.msk.bf16.mxu1 %vm10845_vm5, %v11361_v54  ;;  %9485 = vmatpush3.bf16.msra.mxu1 %v10270_v17 }
 0x451   : > { %9486 = vmatprep.subr.bf16.mxu1 %v10271_v37 }
 0x454   : > { %9487 = vmatpush3.bf16.msra.mxu1 %v10271_v37 }
 0x455   : > { %9488 = vmatprep.subr.bf16.mxu1 %v10272_v30 }
 0x457   : > { %9457 = vmatmul.mubr.msk.bf16.gmra.mrb[4].mxu1 %vm10845_vm5, %v11364_v32 }
 0x458   : > { %9460 = vmatprep.mubr.msk.bf16.mxu1 %vm10845_vm5, %v11393_v26  ;;  %9489 = vmatpush3.bf16.msra.mxu1 %v10272_v30  ;;  %v7100_v30 = vld [vmem:[%s10361_s29 + $0x50] sm:$0xff] }
 0x459   : > { %9490 = vmatprep.subr.bf16.mxu1 %v10273_v0 }
 0x45c   : > { %9491 = vmatpush3.bf16.msra.mxu1 %v10273_v0 }
 0x45d   : > { %9492 = vmatprep.subr.bf16.mxu1 %v10274_v27 }
 0x45f   : > { %9461 = vmatmul.mubr.msk.bf16.gmra.mrb[8].mxu1 %vm10845_vm5, %v11396_v14 }
 0x460   : > { %9464 = vmatprep.mubr.msk.bf16.mxu1 %vm10845_vm5, %v11425_v51  ;;  %9493 = vmatpush3.bf16.msra.mxu1 %v10274_v27 }
 0x461   : > { %9494 = vmatprep.subr.bf16.mxu1 %v10275_v15 }
 0x464   : > { %9495 = vmatpush3.bf16.msra.mxu1 %v10275_v15  ;;  %v7098_v15 = vld [vmem:[%s10361_s29 + $0x40] sm:$0xff] }
 0x465   : > { %9496 = vmatprep.subr.bf16.mxu1 %v10276_v3 }
 0x467   : > { %9465 = vmatmul.mubr.msk.bf16.gmra.mrb[12].mxu1 %vm10845_vm5, %v11428_v2 }
 0x468   : > { %9468 = vmatprep.mubr.msk.bf16.mxu1 %vm10845_vm5, %v11457_v55  ;;  %9497 = vmatpush3.bf16.msra.mxu1 %v10276_v3 }
 0x469   : > { %9498 = vmatprep.subr.bf16.mxu1 %v10277_v33 }
 0x46c   : > { %9499 = vmatpush3.bf16.msra.mxu1 %v10277_v33 }
 0x46d   : > { %9532 = vmatprep.subr.bf16.mxu1 %v10278_v7 }
 0x46f   : > { %9469 = vmatmul.mubr.msk.bf16.gmra.mrb[16].mxu1 %vm10845_vm5, %v11460_v46 }
 0x470   : > { %9472 = vmatprep.mubr.msk.bf16.mxu1 %vm10845_vm5, %v11483_v4 }
 0x477   : > { %9473 = vmatmul.mubr.msk.bf16.gmra.mrb[20].mxu1 %vm10845_vm5, %v11486_v63 }
 0x478   : > { %9476 = vmatprep.mubr.msk.bf16.mxu1 %vm10845_vm5, %v11509_v45 }
 0x47f   : > { %9477 = vmatmul.mubr.msk.bf16.gmra.mrb[24].mxu1 %vm10845_vm5, %v11512_v48 }
 0x480   : > { %9480 = vmatprep.mubr.msk.bf16.mxu1 %vm10845_vm5, %v11534_v53 }
 0x487   : > { %9481 = vmatmul.mubr.msk.bf16.gmra.mrb[28].mxu1 %vm10845_vm5, %v11530_v22 }
 0x488   : > { %9500 = vmatprep.mubr.msk.bf16.mxu1 %vm10559_vm4, %v11321_v19  ;;  %v10281_v19 = vld [vmem:[%s12101_s3 + $0x1d8] sm:$0xff]  }
 0x48f   : > { %9501 = vmatmul.mubr.msk.bf16.vlgmr.msra.gmra.mrb[0].mxu1 %vm10559_vm4, %v11356_v25  ;;  %v10283_v25 = vld [vmem:[%s12101_s3 + $0x1e8] sm:$0xff]  }
 0x490   : > { %9504 = vmatprep.mubr.msk.bf16.mxu1 %vm10559_vm4, %v11352_v11  ;;  %9533 = vmatpush3.bf16.msra.mxu1 %v10278_v7  ;;  %v10282_v11 = vld [vmem:[%s12101_s3 + $0x1e0] sm:$0xff]   ;;  %v7101_v7 = vld [vmem:[%s10361_s29 + $0x58] sm:$0xff] }
 0x491   : > { %9534 = vmatprep.subr.bf16.mxu1 %v10279_v18 }
 0x494   : > { %9535 = vmatpush3.bf16.msra.mxu1 %v10279_v18 }
 0x495   : > { %9536 = vmatprep.subr.bf16.mxu1 %v10280_v49 }
 0x497   : > { %9505 = vmatmul.mubr.msk.bf16.gmra.mrb[4].mxu1 %vm10559_vm4, %v11388_v8  ;;  %v10285_v8 = vld [vmem:[%s12101_s3 + $0x1f8] sm:$0xff]  }
 0x498   : > { %9508 = vmatprep.mubr.msk.bf16.mxu1 %vm10559_vm4, %v11384_v60  ;;  %9537 = vmatpush3.bf16.msra.mxu1 %v10280_v49  ;;  %v10284_v60 = vld [vmem:[%s12101_s3 + $0x1f0] sm:$0xff]  }
 0x499   : > { %9538 = vmatprep.subr.bf16.mxu1 %v10281_v19 }
 0x49c   : > { %9539 = vmatpush3.bf16.msra.mxu1 %v10281_v19 }
 0x49d   : > { %9540 = vmatprep.subr.bf16.mxu1 %v10282_v11 }
 0x49f   : > { %9509 = vmatmul.mubr.msk.bf16.gmra.mrb[8].mxu1 %vm10559_vm4, %v11420_v62  ;;  %v10287_v62 = vld [vmem:[%s12101_s3 + $0x208] sm:$0xff]  }
 0x4a0   : > { %9512 = vmatprep.mubr.msk.bf16.mxu1 %vm10559_vm4, %v11416_v61  ;;  %9541 = vmatpush3.bf16.msra.mxu1 %v10282_v11  ;;  %v10286_v61 = vld [vmem:[%s12101_s3 + $0x200] sm:$0xff]   ;;  %v7099_v11 = vld [vmem:[%s10361_s29 + $0x48] sm:$0xff] }
 0x4a1   : > { %9542 = vmatprep.subr.bf16.mxu1 %v10283_v25 }
 0x4a4   : > { %9543 = vmatpush3.bf16.msra.mxu1 %v10283_v25 }
 0x4a5   : > { %9544 = vmatprep.subr.bf16.mxu1 %v10284_v60 }
 0x4a7   : > { %9513 = vmatmul.mubr.msk.bf16.gmra.mrb[12].mxu1 %vm10559_vm4, %v11454_v34 }
 0x4a8   : > { %9516 = vmatprep.mubr.msk.bf16.mxu1 %vm10559_vm4, %v11450_v21  ;;  %9545 = vmatpush3.bf16.msra.mxu1 %v10284_v60  ;;  %v10288_v21 = vld [vmem:[%s12101_s3 + $0x210] sm:$0xff]  }
 0x4a9   : > { %9546 = vmatprep.subr.bf16.mxu1 %v10285_v8 }
 0x4ac   : > { %9547 = vmatpush3.bf16.msra.mxu1 %v10285_v8 }
 0x4ad   : > { %9580 = vmatprep.subr.bf16.mxu1 %v10286_v61 }
 0x4af   : > { %9517 = vmatmul.mubr.msk.bf16.gmra.mrb[16].mxu1 %vm10559_vm4, %v12147_v23  ;;  %v7095_v23 = vld [vmem:[%s10361_s29 + $0x28] sm:$0xff] }
 0x4b0   : > { %9520 = vmatprep.mubr.msk.bf16.mxu1 %vm10559_vm4, %v12148_v31 }
 0x4b7   : > { %9521 = vmatmul.mubr.msk.bf16.gmra.mrb[20].mxu1 %vm10559_vm4, %v11507_v12 }
 0x4b8   : > { %9524 = vmatprep.mubr.msk.bf16.mxu1 %vm10559_vm4, %v12149_v44 }
 0x4bf   : > { %9525 = vmatmul.mubr.msk.bf16.gmra.mrb[24].mxu1 %vm10559_vm4, %v11532_v47  ;;  %v7094_v47 = vld [vmem:[%s10361_s29 + $0x20] sm:$0xff] }
 0x4c0   : > { %9528 = vmatprep.mubr.msk.bf16.mxu1 %vm10559_vm4, %v11528_v6 }
 0x4c7   : > { %9529 = vmatmul.mubr.bf16.gmra.mrb[28].mxu1 %v12136_v56 }
 0x4c8   : > { %9548 = vmatprep.mubr.bf16.mxu1 %v11311_v36  ;;  %v10290_v36 = vld [vmem:[%s12101_s3 + $0x220] sm:$0xff]  }
 0x4cf   : > { %9549 = vmatmul.mubr.bf16.vlgmr.msra.gmra.mrb[0].mxu1 %v11345_v24  ;;  %v10292_v24 = vld [vmem:[%s12101_s3 + $0x230] sm:$0xff]  }
 0x4d0   : > { %9552 = vmatprep.mubr.bf16.mxu1 %v11343_v13  ;;  %9581 = vmatpush3.bf16.msra.mxu1 %v10286_v61  ;;  %v10291_v13 = vld [vmem:[%s12101_s3 + $0x228] sm:$0xff]  }
 0x4d1   : > { %9582 = vmatprep.subr.bf16.mxu1 %v10287_v62 }
 0x4d4   : > { %9583 = vmatpush3.bf16.msra.mxu1 %v10287_v62 }
 0x4d5   : > { %9584 = vmatprep.subr.bf16.mxu1 %v10288_v21 }
 0x4d7   : > { %9553 = vmatmul.mubr.bf16.gmra.mrb[4].mxu1 %v11377_v41 }
 0x4d8   : > { %9556 = vmatprep.mubr.bf16.mxu1 %v11375_v59  ;;  %9585 = vmatpush3.bf16.msra.mxu1 %v10288_v21  ;;  %v10293_v59 = vld [vmem:[%s12101_s3 + $0x238] sm:$0xff]  }
 0x4d9   : > { %9586 = vmatprep.subr.bf16.mxu1 %v10289_v40 }
 0x4dc   : > { %9587 = vmatpush3.bf16.msra.mxu1 %v10289_v40 }
 0x4dd   : > { %9588 = vmatprep.subr.bf16.mxu1 %v10290_v36 }
 0x4df   : > { %9557 = vmatmul.mubr.bf16.gmra.mrb[8].mxu1 %v11409_v20 }
 0x4e0   : > { %9560 = vmatprep.mubr.bf16.mxu1 %v11407_v58  ;;  %9589 = vmatpush3.bf16.msra.mxu1 %v10290_v36 }
 0x4e1   : > { %9590 = vmatprep.subr.bf16.mxu1 %v10291_v13 }
 0x4e4   : > { %9591 = vmatpush3.bf16.msra.mxu1 %v10291_v13 }
 0x4e5   : > { %9592 = vmatprep.subr.bf16.mxu1 %v10292_v24 }
 0x4e7   : > { %9561 = vmatmul.mubr.bf16.gmra.mrb[12].mxu1 %v11443_v29 }
 0x4e8   : > { %9564 = vmatprep.mubr.bf16.mxu1 %v11441_v38  ;;  %9593 = vmatpush3.bf16.msra.mxu1 %v10292_v24  ;;  %v7091_v38 = vld [vmem:[%s10361_s29 + $0x8] sm:$0xff]  ;;  %v7104_v24 = vld [vmem:[%s10361_s29 + $0x70] sm:$0xff] }
 0x4e9   : > { %9594 = vmatprep.subr.bf16.mxu1 %v10293_v59 }
 0x4ec   : > { %9595 = vmatpush3.bf16.msra.mxu1 %v10293_v59 }
 0x4ef   : > { %9565 = vmatmul.mubr.bf16.gmra.mrb[16].mxu1 %v11470_v42 }
 0x4f0   : > { %9568 = vmatprep.mubr.bf16.mxu1 %v11468_v57 }
 0x4f7   : > { %9569 = vmatmul.mubr.bf16.gmra.mrb[20].mxu1 %v11496_v28 }
 0x4f8   : > { %9572 = vmatprep.mubr.bf16.mxu1 %v11494_v16 }
 0x4ff   : > { %9573 = vmatmul.mubr.bf16.gmra.mrb[24].mxu1 %v11522_v9  ;;  %v7097_v9 = vld [vmem:[%s10361_s29 + $0x38] sm:$0xff] }
 0x500   : > { %9576 = vmatprep.mubr.bf16.mxu1 %v11520_v43 }
 0x507   : > { %9577 = vmatmul.mubr.bf16.gmra.mrb[28].mxu1 %v12136_v56 }
 0x508   : > { %9596 = vmatprep.mubr.msk.bf16.mxu1 %vm10845_vm5, %v11332_v10  ;;  %v11990_v10 = vld [vmem:[%s12102_s4] ss:$0 sm:$0xff] }
 0x50f   : > { %9597 = vmatmul.mubr.msk.bf16.vlgmr.msra.gmra.mrb[0].mxu1 %vm10845_vm5, %v11361_v54 }
 0x510   : > { %9600 = vmatprep.mubr.msk.bf16.mxu1 %vm10845_vm5, %v11364_v32  ;;  %v7092_v32 = vld [vmem:[%s10361_s29 + $0x10] sm:$0xff] }
 0x517   : > { %9601 = vmatmul.mubr.msk.bf16.gmra.mrb[4].mxu1 %vm10845_vm5, %v11393_v26 }
 0x518   : > { %9604 = vmatprep.mubr.msk.bf16.mxu1 %vm10845_vm5, %v11396_v14  ;;  %v7090_v14 = vld [vmem:[%s10361_s29] sm:$0xff] }
 0x51f   : > { %9605 = vmatmul.mubr.msk.bf16.gmra.mrb[8].mxu1 %vm10845_vm5, %v11425_v51  ;;  %v7093_v51 = vld [vmem:[%s10361_s29 + $0x18] sm:$0xff] }
 0x520   : > { %9608 = vmatprep.mubr.msk.bf16.mxu1 %vm10845_vm5, %v11428_v2 }
 0x527   : > { %9609 = vmatmul.mubr.msk.bf16.gmra.mrb[12].mxu1 %vm10845_vm5, %v11457_v55 }
 0x528   : > { %9612 = vmatprep.mubr.msk.bf16.mxu1 %vm10845_vm5, %v11460_v46 }
 0x52f   : > { %9613 = vmatmul.mubr.msk.bf16.gmra.mrb[16].mxu1 %vm10845_vm5, %v11483_v4 }
 0x530   : > { %9616 = vmatprep.mubr.msk.bf16.mxu1 %vm10845_vm5, %v11486_v63  ;;  %v7096_v63 = vld [vmem:[%s10361_s29 + $0x30] sm:$0xff] }
 0x537   : > { %9617 = vmatmul.mubr.msk.bf16.gmra.mrb[20].mxu1 %vm10845_vm5, %v11509_v45 }
 0x538   : > { %9620 = vmatprep.mubr.msk.bf16.mxu1 %vm10845_vm5, %v11512_v48 }
 0x53f   : > { %9621 = vmatmul.mubr.msk.bf16.gmra.mrb[24].mxu1 %vm10845_vm5, %v11534_v53 }
 0x540   : > { %9624 = vmatprep.mubr.msk.bf16.mxu1 %vm10845_vm5, %v11530_v22 }
 0x547   : > { %9625 = vmatmul.mubr.bf16.gmra.mrb[28].mxu1 %v12136_v56 }
 0x5e2   : > { %v9598_v54 = vpop.f32.mrb[0].mxu1 }
 0x5e3   : > { %v7060_v41 = vadd.f32 %v9598_v54, %v11990_v10  ;;  %v6796_v26 = vpop.f32.mrb[1].mxu1 }
 0x5e4   : > { %v7058_v58 = vadd.f32 %v11990_v10, %v6796_v26  ;;  %v9599_v20 = vpop.f32.mrb[2].mxu1 }
 0x5e5   : > { %v7124_v5 = vadd.f32 %v7092_v32, %v7060_v41  ;;  %v7061_v2 = vadd.f32 %v9599_v20, %v11990_v10  ;;  %v6799_v56 = vpop.f32.mrb[3].mxu1  ;;  %v7102_v32 = vld [vmem:[%s10361_s29 + $0x60] sm:$0xff] }
 0x5e6   : > { %v7122_v29 = vadd.f32 %v7090_v14, %v7058_v58  ;;  %v7059_v34 = vadd.f32 %v11990_v10, %v6799_v56  ;;  %v7105_v14 = vld [vmem:[%s10361_s29 + $0x78] sm:$0xff] }
 0x5e7   : > { %v7156_v55 = vmax.f32 %v7124_v5, 0.0  ;;  %v7125_v46 = vadd.f32 %v7093_v51, %v7061_v2  ;;  %v7103_v5 = vld [vmem:[%s10361_s29 + $0x68] sm:$0xff] }
 0x5e8   : > { %v7154_v57 = vmax.f32 %v7122_v29, 0.0  ;;  %v7123_v42 = vadd.f32 %v7091_v38, %v7059_v34 }
 0x5e9   : > { %7188 = vst [vmem:[%s12004_s22 + $0x10] sm:$0xff] %v7156_v55  ;;  %v7157_v12 = vmax.f32 %v7125_v46, 0.0 }
 0x5ea   : > { %7186 = vst [vmem:[%s12004_s22] sm:$0xff] %v7154_v57  ;;  %v7155_v48 = vmax.f32 %v7123_v42, 0.0  ;;  %v9602_v4 = vpop.f32.mrb[4].mxu1 }
 0x5eb   : > { %7189 = vst [vmem:[%s12004_s22 + $0x18] sm:$0xff] %v7157_v12  ;;  %v7064_v16 = vadd.f32 %v9602_v4, %v11990_v10  ;;  %v6812_v28 = vpop.f32.mrb[5].mxu1  ;;  %v7108_v12 = vld [vmem:[%s10361_s29 + $0x90] sm:$0xff] }
 0x5ec   : > { %7187 = vst [vmem:[%s12004_s22 + $0x8] sm:$0xff] %v7155_v48  ;;  %v7062_v45 = vadd.f32 %v11990_v10, %v6812_v28  ;;  %v9603_v43 = vpop.f32.mrb[6].mxu1 }
 0x5ed   : > { %v7128_v6 = vadd.f32 %v7096_v63, %v7064_v16  ;;  %v7065_v22 = vadd.f32 %v9603_v43, %v11990_v10  ;;  %v6815_v53 = vpop.f32.mrb[7].mxu1  ;;  %v7106_v63 = vld [vmem:[%s10361_s29 + $0x80] sm:$0xff] }
 0x5ee   : > { %v7126_v31 = vadd.f32 %v7094_v47, %v7062_v45  ;;  %v7063_v44 = vadd.f32 %v11990_v10, %v6815_v53  ;;  %v7109_v47 = vld [vmem:[%s10361_s29 + $0x98] sm:$0xff] }
 0x5ef   : > { %v7160_v50 = vmax.f32 %v7128_v6, 0.0  ;;  %v7129_v52 = vadd.f32 %v7097_v9, %v7065_v22  ;;  %v7107_v6 = vld [vmem:[%s10361_s29 + $0x88] sm:$0xff] }
 0x5f0   : > { %v7158_v39 = vmax.f32 %v7126_v31, 0.0  ;;  %v7127_v35 = vadd.f32 %v7095_v23, %v7063_v44 }
 0x5f1   : > { %7192 = vst [vmem:[%s12004_s22 + $0x30] sm:$0xff] %v7160_v50  ;;  %v7161_v1 = vmax.f32 %v7129_v52, 0.0 }
 0x5f2   : > { %7190 = vst [vmem:[%s12004_s22 + $0x20] sm:$0xff] %v7158_v39  ;;  %v7159_v17 = vmax.f32 %v7127_v35, 0.0  ;;  %v9606_v37 = vpop.f32.mrb[8].mxu1 }
 0x5f3   : > { %7193 = vst [vmem:[%s12004_s22 + $0x38] sm:$0xff] %v7161_v1  ;;  %v7068_v0 = vadd.f32 %v9606_v37, %v11990_v10  ;;  %v6828_v27 = vpop.f32.mrb[9].mxu1  ;;  %v7112_v1 = vld [vmem:[%s10361_s29 + $0xb0] sm:$0xff] }
 0x5f4   : > { %7191 = vst [vmem:[%s12004_s22 + $0x28] sm:$0xff] %v7159_v17  ;;  %v7066_v3 = vadd.f32 %v11990_v10, %v6828_v27  ;;  %v9607_v33 = vpop.f32.mrb[10].mxu1 }
 0x5f5   : > { %v7132_v18 = vadd.f32 %v7100_v30, %v7068_v0  ;;  %v7069_v49 = vadd.f32 %v9607_v33, %v11990_v10  ;;  %v6831_v19 = vpop.f32.mrb[11].mxu1  ;;  %v7110_v30 = vld [vmem:[%s10361_s29 + $0xa0] sm:$0xff] }
 0x5f6   : > { %v7130_v25 = vadd.f32 %v7098_v15, %v7066_v3  ;;  %v7067_v60 = vadd.f32 %v11990_v10, %v6831_v19  ;;  %v7113_v15 = vld [vmem:[%s10361_s29 + $0xb8] sm:$0xff] }
 0x5f7   : > { %v7164_v8 = vmax.f32 %v7132_v18, 0.0  ;;  %v7133_v61 = vadd.f32 %v7101_v7, %v7069_v49  ;;  %v7111_v18 = vld [vmem:[%s10361_s29 + $0xa8] sm:$0xff] }
 0x5f8   : > { %v7162_v62 = vmax.f32 %v7130_v25, 0.0  ;;  %v7131_v21 = vadd.f32 %v7099_v11, %v7067_v60 }
 0x5f9   : > { %7196 = vst [vmem:[%s12004_s22 + $0x50] sm:$0xff] %v7164_v8  ;;  %v7165_v40 = vmax.f32 %v7133_v61, 0.0 }
 0x5fa   : > { %7194 = vst [vmem:[%s12004_s22 + $0x40] sm:$0xff] %v7162_v62  ;;  %v7163_v36 = vmax.f32 %v7131_v21, 0.0  ;;  %v9610_v13 = vpop.f32.mrb[12].mxu1 }
 0x5fb   : > { %7197 = vst [vmem:[%s12004_s22 + $0x58] sm:$0xff] %v7165_v40  ;;  %v7072_v59 = vadd.f32 %v9610_v13, %v11990_v10  ;;  %v6844_v54 = vpop.f32.mrb[13].mxu1  ;;  %v7116_v40 = vld [vmem:[%s10361_s29 + $0xd0] sm:$0xff] }
 0x5fc   : > { %7195 = vst [vmem:[%s12004_s22 + $0x48] sm:$0xff] %v7163_v36  ;;  %v7070_v41 = vadd.f32 %v11990_v10, %v6844_v54  ;;  %v9611_v26 = vpop.f32.mrb[14].mxu1 }
 0x5fd   : > { %v7136_v58 = vadd.f32 %v7104_v24, %v7072_v59  ;;  %v7073_v20 = vadd.f32 %v9611_v26, %v11990_v10  ;;  %v6847_v51 = vpop.f32.mrb[15].mxu1  ;;  %v7114_v24 = vld [vmem:[%s10361_s29 + $0xc0] sm:$0xff] }
 0x5fe   : > { %v7134_v2 = vadd.f32 %v7102_v32, %v7070_v41  ;;  %v7071_v56 = vadd.f32 %v11990_v10, %v6847_v51  ;;  %v7117_v32 = vld [vmem:[%s10361_s29 + $0xd8] sm:$0xff] }
 0x5ff   : > { %v7168_v38 = vmax.f32 %v7136_v58, 0.0  ;;  %v7137_v29 = vadd.f32 %v7105_v14, %v7073_v20  ;;  %v7115_v58 = vld [vmem:[%s10361_s29 + $0xc8] sm:$0xff] }
 0x600   : > { %v7166_v34 = vmax.f32 %v7134_v2, 0.0  ;;  %v7135_v55 = vadd.f32 %v7103_v5, %v7071_v56 }
 0x601   : > { %7200 = vst [vmem:[%s12004_s22 + $0x70] sm:$0xff] %v7168_v38  ;;  %v7169_v46 = vmax.f32 %v7137_v29, 0.0 }
 0x602   : > { %7198 = vst [vmem:[%s12004_s22 + $0x60] sm:$0xff] %v7166_v34  ;;  %v7167_v57 = vmax.f32 %v7135_v55, 0.0  ;;  %v9614_v42 = vpop.f32.mrb[16].mxu1 }
 0x603   : > { %7201 = vst [vmem:[%s12004_s22 + $0x78] sm:$0xff] %v7169_v46  ;;  %v7076_v48 = vadd.f32 %v9614_v42, %v11990_v10  ;;  %v6860_v4 = vpop.f32.mrb[17].mxu1  ;;  %v7120_v46 = vld [vmem:[%s10361_s29 + $0xf0] sm:$0xff] }
 0x604   : > { %7199 = vst [vmem:[%s12004_s22 + $0x68] sm:$0xff] %v7167_v57  ;;  %v7074_v16 = vadd.f32 %v11990_v10, %v6860_v4  ;;  %v9615_v28 = vpop.f32.mrb[18].mxu1 }
 0x605   : > { %v7140_v45 = vadd.f32 %v7108_v12, %v7076_v48  ;;  %v7077_v43 = vadd.f32 %v9615_v28, %v11990_v10  ;;  %v6863_v9 = vpop.f32.mrb[19].mxu1  ;;  %v7118_v12 = vld [vmem:[%s10361_s29 + $0xe0] sm:$0xff] }
 0x606   : > { %v7138_v22 = vadd.f32 %v7106_v63, %v7074_v16  ;;  %v7075_v53 = vadd.f32 %v11990_v10, %v6863_v9  ;;  %v7121_v63 = vld [vmem:[%s10361_s29 + $0xf8] sm:$0xff] }
 0x607   : > { %v7172_v23 = vmax.f32 %v7140_v45, 0.0  ;;  %v7141_v31 = vadd.f32 %v7109_v47, %v7077_v43  ;;  %v7119_v45 = vld [vmem:[%s10361_s29 + $0xe8] sm:$0xff] }
 0x608   : > { %v7170_v44 = vmax.f32 %v7138_v22, 0.0  ;;  %v7139_v50 = vadd.f32 %v7107_v6, %v7075_v53 }
 0x609   : > { %7204 = vst [vmem:[%s12004_s22 + $0x90] sm:$0xff] %v7172_v23  ;;  %v7173_v52 = vmax.f32 %v7141_v31, 0.0 }
 0x60a   : > { %7202 = vst [vmem:[%s12004_s22 + $0x80] sm:$0xff] %v7170_v44  ;;  %v7171_v39 = vmax.f32 %v7139_v50, 0.0  ;;  %v9618_v35 = vpop.f32.mrb[20].mxu1 }
 0x60b   : > { %7205 = vst [vmem:[%s12004_s22 + $0x98] sm:$0xff] %v7173_v52  ;;  %v7080_v17 = vadd.f32 %v9618_v35, %v11990_v10  ;;  %v6876_v37 = vpop.f32.mrb[21].mxu1 }
 0x60c   : > { %7203 = vst [vmem:[%s12004_s22 + $0x88] sm:$0xff] %v7171_v39  ;;  %v7078_v0 = vadd.f32 %v11990_v10, %v6876_v37  ;;  %v9619_v27 = vpop.f32.mrb[22].mxu1 }
 0x60d   : > { %v7144_v3 = vadd.f32 %v7112_v1, %v7080_v17  ;;  %v7081_v33 = vadd.f32 %v9619_v27, %v11990_v10  ;;  %v6879_v7 = vpop.f32.mrb[23].mxu1 }
 0x60e   : > { %v7142_v49 = vadd.f32 %v7110_v30, %v7078_v0  ;;  %v7079_v19 = vadd.f32 %v11990_v10, %v6879_v7 }
 0x60f   : > { %v7176_v11 = vmax.f32 %v7144_v3, 0.0  ;;  %v7145_v25 = vadd.f32 %v7113_v15, %v7081_v33 }
 0x610   : > { %v7174_v60 = vmax.f32 %v7142_v49, 0.0  ;;  %v7143_v8 = vadd.f32 %v7111_v18, %v7079_v19 }
 0x611   : > { %7208 = vst [vmem:[%s12004_s22 + $0xb0] sm:$0xff] %v7176_v11  ;;  %v7177_v61 = vmax.f32 %v7145_v25, 0.0 }
 0x612   : > { %7206 = vst [vmem:[%s12004_s22 + $0xa0] sm:$0xff] %v7174_v60  ;;  %v7175_v62 = vmax.f32 %v7143_v8, 0.0  ;;  %v9622_v21 = vpop.f32.mrb[24].mxu1 }
 0x613   : > { %7209 = vst [vmem:[%s12004_s22 + $0xb8] sm:$0xff] %v7177_v61  ;;  %v7084_v36 = vadd.f32 %v9622_v21, %v11990_v10  ;;  %v6892_v13 = vpop.f32.mrb[25].mxu1 }
 0x614   : > { %7207 = vst [vmem:[%s12004_s22 + $0xa8] sm:$0xff] %v7175_v62  ;;  %v7082_v59 = vadd.f32 %v11990_v10, %v6892_v13  ;;  %v9623_v54 = vpop.f32.mrb[26].mxu1 }
 0x615   : > { %v7148_v41 = vadd.f32 %v7116_v40, %v7084_v36  ;;  %v7085_v26 = vadd.f32 %v9623_v54, %v11990_v10  ;;  %v6895_v14 = vpop.f32.mrb[27].mxu1 }
 0x616   : > { %v7146_v20 = vadd.f32 %v7114_v24, %v7082_v59  ;;  %v7083_v51 = vadd.f32 %v11990_v10, %v6895_v14 }
 0x617   : > { %v7180_v5 = vmax.f32 %v7148_v41, 0.0  ;;  %v7149_v2 = vadd.f32 %v7117_v32, %v7085_v26 }
 0x618   : > { %v7178_v56 = vmax.f32 %v7146_v20, 0.0  ;;  %v7147_v38 = vadd.f32 %v7115_v58, %v7083_v51 }
 0x619   : > { %7212 = vst [vmem:[%s12004_s22 + $0xd0] sm:$0xff] %v7180_v5  ;;  %v7181_v29 = vmax.f32 %v7149_v2, 0.0 }
 0x61a   : > { %7210 = vst [vmem:[%s12004_s22 + $0xc0] sm:$0xff] %v7178_v56  ;;  %v7179_v34 = vmax.f32 %v7147_v38, 0.0  ;;  %v9626_v55 = vpop.f32.mrb[28].mxu1 }
 0x61b   : > { %7213 = vst [vmem:[%s12004_s22 + $0xd8] sm:$0xff] %v7181_v29  ;;  %v7088_v57 = vadd.f32 %v9626_v55, %v11990_v10  ;;  %v6908_v42 = vpop.f32.mrb[29].mxu1 }
 0x61c   : > { %7211 = vst [vmem:[%s12004_s22 + $0xc8] sm:$0xff] %v7179_v34  ;;  %v7086_v48 = vadd.f32 %v11990_v10, %v6908_v42  ;;  %v9627_v4 = vpop.f32.mrb[30].mxu1 }
 0x61d   : > { %v7152_v16 = vadd.f32 %v7120_v46, %v7088_v57  ;;  %v7089_v28 = vadd.f32 %v9627_v4, %v11990_v10  ;;  %v6911_v47 = vpop.f32.mrb[31].mxu1 }
 0x61e   : > { %v7150_v43 = vadd.f32 %v7118_v12, %v7086_v48  ;;  %v7087_v9 = vadd.f32 %v11990_v10, %v6911_v47 }
 0x61f   : > { %v7184_v6 = vmax.f32 %v7152_v16, 0.0  ;;  %v7153_v22 = vadd.f32 %v7121_v63, %v7089_v28 }
 0x620   : > { %v7182_v53 = vmax.f32 %v7150_v43, 0.0  ;;  %v7151_v23 = vadd.f32 %v7119_v45, %v7087_v9 }
 0x621   : > { %7216 = vst [vmem:[%s12004_s22 + $0xf0] sm:$0xff] %v7184_v6  ;;  %v7185_v31 = vmax.f32 %v7153_v22, 0.0 }
 0x622   : > { %7214 = vst [vmem:[%s12004_s22 + $0xe0] sm:$0xff] %v7182_v53  ;;  %v7183_v44 = vmax.f32 %v7151_v23, 0.0 }
 0x623   : > { %7217 = vst [vmem:[%s12004_s22 + $0xf8] sm:$0xff] %v7185_v31 }
 0x624   : > { %7215 = vst [vmem:[%s12004_s22 + $0xe8] sm:$0xff] %v7183_v44 }
 0x625 PF: > { %s15_s18 = sadd.s32 1, %s10300_s18  }
 0x626   : > { %p12_p4 = scmp.ge.s32.totalorder %s15_s18, 4  }
 0x628   :  { %14 = sbr.rel (!%p12_p4) target bundleno = 1 (0x1), region = 94 }

</bundles_post_ra>
